<compile_context>
chip_gen: v5e
topology: v5e:2x2
jax: 0.10.0
libtpu: 0.0.40
codegen_flags: <defaults>
</compile_context>

<pallas_src>
import functools
import math

import jax
import jax.numpy as jnp
from jax import lax
from jax.experimental import pallas as pl
from jax.experimental.pallas import tpu as pltpu


def _full_spec(shape):
    return pl.BlockSpec(shape, lambda *_: (0,) * len(shape))


# --------------------------- kernel A: conv1 stage --------------------------
def _conv1_pool_kernel(p1_ref, w_ref, b_ref, o_ref, *, valid_rows):
    """relu(P1 @ w + b) on rows indexed (b, h, w); MaxPool2d(2,1) is a 4-way
    max over row shifts {0, 1, 15, 16}.  Rows >= valid_rows are zero filler
    that the wrapper drops."""
    y = jnp.dot(p1_ref[...], w_ref[...], preferred_element_type=jnp.float32)
    y = jnp.maximum(y + b_ref[...], 0.0)                      # (B*225, 16)
    n = valid_rows
    pooled = jnp.maximum(jnp.maximum(y[0:n, :], y[1:n + 1, :]),
                         jnp.maximum(y[15:n + 15, :], y[16:n + 16, :]))
    o_ref[0:n, :] = pooled
    o_ref[n:, :] = jnp.zeros((o_ref.shape[0] - n, o_ref.shape[1]), o_ref.dtype)


def conv1_pool(p1, w1, b1):
    M = p1.shape[0]                                           # B * 15 * 15
    return pl.pallas_call(
        functools.partial(_conv1_pool_kernel, valid_rows=M - 16),
        out_shape=jax.ShapeDtypeStruct((M, 16), jnp.float32),
        in_specs=[_full_spec(p1.shape), _full_spec(w1.shape), _full_spec(b1.shape)],
        out_specs=_full_spec((M, 16)),
    )(p1, w1, b1)


# ------------------ kernel B: conv2 stage + fused 4-way head ----------------
def _conv2_head_kernel(p2_ref, xc_ref, w2_ref, b2_ref, w01_ref, wc2_ref,
                       bf1_ref, wf2_ref, bsum_ref, o_ref, c2f_ref, *, batch):
    f32 = jnp.float32
    # conv2 matmul + bias + ReLU; rows are (b, oh, ow) with oh, ow in [0, 6).
    y = jnp.dot(p2_ref[...], w2_ref[...], preferred_element_type=f32)
    y = jnp.maximum(y + b2_ref[...], 0.0)                     # (B*36, 32)
    n = batch * 36 - 7
    # MaxPool2d(2,1): row shifts {0, 1, 6, 7}.
    pooled = jnp.maximum(jnp.maximum(y[0:n, :], y[1:n + 1, :]),
                         jnp.maximum(y[6:n + 6, :], y[7:n + 7, :]))
    # NHWC flatten of the valid 5x5x32 window into the (B, 800) VMEM scratch
    # (static slice stores only -- no lane-collapsing reshape).
    for b in range(batch):
        for oh in range(5):
            for ow in range(5):
                r = b * 36 + oh * 6 + ow
                dst = (oh * 5 + ow) * 32
                c2f_ref[b:b + 1, dst:dst + 32] = pooled[r:r + 1, :]
    c2 = c2f_ref[...]                                         # (B, 800)
    # Fused heads: [x_flat | c1_flat] @ [w0 ; wl1], c2 @ [wf1 | wl2], fc2,
    # and a single pre-summed bias.
    lin01 = jnp.dot(xc_ref[...], w01_ref[...], preferred_element_type=f32)
    t = jnp.dot(c2, wc2_ref[...], preferred_element_type=f32)  # (B, 32 + nc)
    h = jnp.maximum(t[:, :32] + bf1_ref[...], 0.0)
    out3 = jnp.dot(h, wf2_ref[...], preferred_element_type=f32)
    o_ref[...] = (lin01 + t[:, 32:] + out3 + bsum_ref[...]).astype(o_ref.dtype)


def conv2_head(p2, xc, kp, batch):
    nc = kp["wf2"].shape[1]
    args = (p2, xc, kp["w2"], kp["b2"], kp["w01"], kp["wc2"],
            kp["bf1"], kp["wf2"], kp["bsum"])
    return pl.pallas_call(
        functools.partial(_conv2_head_kernel, batch=batch),
        out_shape=jax.ShapeDtypeStruct((batch, nc), jnp.float32),
        in_specs=[_full_spec(a.shape) for a in args],
        out_specs=_full_spec((batch, nc)),
        scratch_shapes=[pltpu.VMEM((batch, 800), jnp.float32)],
    )(*args)


# ------------------------------- wrapper glue -------------------------------
def _im2col_conv1(x):
    """Gather-free im2col for conv1 (k=8, s=2, p=2) on NCHW x.
    Returns (B*225, C*64), feature order (c, kh, kw)."""
    B, C, _, _ = x.shape
    xp = jnp.pad(x, ((0, 0), (0, 0), (2, 2), (2, 2)))         # (B, C, 36, 36)
    slabs = []
    for kh in range(8):
        for kw in range(8):
            slabs.append(lax.slice(xp, (0, 0, kh, kw),
                                   (B, C, kh + 29, kw + 29), (1, 1, 2, 2)))
    pat = jnp.stack(slabs, axis=1)                            # (B, 64, C, 15, 15)
    pat = pat.transpose(0, 3, 4, 2, 1)                        # (B, 15, 15, C, 64)
    return pat.reshape(B * 225, C * 64)


def _im2col_conv2(c1):
    """Gather-free im2col for conv2 (k=4, s=2) on NHWC c1 (B,14,14,16).
    Returns (B*36, 256), feature order (kh, kw, c)."""
    B = c1.shape[0]
    slabs = [lax.slice(c1, (0, kh, kw, 0), (B, kh + 11, kw + 11, 16), (1, 2, 2, 1))
             for kh in range(4) for kw in range(4)]
    p2 = jnp.concatenate(slabs, axis=-1)                      # (B, 6, 6, 256)
    return p2.reshape(B * 36, 256)


def forward_pallas(x, kp):
    B = x.shape[0]
    # conv1 + ReLU + MaxPool(2,1)   (kernel A)
    p1 = _im2col_conv1(x)                                     # (B*225, 192)
    pooled1 = conv1_pool(p1, kp["w1"], kp["b1"])              # (B*225, 16)
    c1 = pooled1.reshape(B, 15, 15, 16)[:, :14, :14, :]       # NHWC (B,14,14,16)
    # conv2 patches + fused conv2 / pool2 / all heads   (kernel B)
    p2 = _im2col_conv2(c1)                                    # (B*36, 256)
    xc = jnp.concatenate([x.reshape(B, -1), c1.reshape(B, -1)], axis=1)  # (B, 6208)
    return conv2_head(p2, xc, kp, B)


# ------------------------------ parameters ----------------------------------
def init_params(key, num_classes=10, in_channels=3):
    ks = jax.random.split(key, 14)

    def u(k, shape, fan_in):
        bound = 1.0 / math.sqrt(fan_in)
        return jax.random.uniform(k, shape, jnp.float32, -bound, bound)

    return {
        "conv1_w": u(ks[0], (16, in_channels, 8, 8), in_channels * 64),
        "conv1_b": u(ks[1], (16,), in_channels * 64),
        "conv2_w": u(ks[2], (32, 16, 4, 4), 256),
        "conv2_b": u(ks[3], (32,), 256),
        "fc1_w": u(ks[4], (32, 800), 800),
        "fc1_b": u(ks[5], (32,), 800),
        "fc2_w": u(ks[6], (num_classes, 32), 32),
        "fc2_b": u(ks[7], (num_classes,), 32),
        "lin0_w": u(ks[8], (num_classes, 32 * 32 * in_channels), 32 * 32 * in_channels),
        "lin0_b": u(ks[9], (num_classes,), 32 * 32 * in_channels),
        "lin1_w": u(ks[10], (num_classes, 3136), 3136),
        "lin1_b": u(ks[11], (num_classes,), 3136),
        "lin2_w": u(ks[12], (num_classes, 800), 800),
        "lin2_b": u(ks[13], (num_classes,), 800),
    }


def pack_params(p):
    """One-time re-layout of torch-style parameters for the Pallas kernels.

    Conv weights become (K, C_out) matmul operands matching the wrapper's
    im2col feature order; linear1/linear2/fc1 rows are permuted from NCHW to
    NHWC flatten order so the kernels never transpose activations; linear0 and
    linear1 are stacked into one matrix, fc1|linear2 into another, and all
    output-side biases are pre-summed."""
    nc = p["lin0_w"].shape[0]
    w1 = p["conv1_w"].reshape(16, -1).T                        # rows (c, kh, kw)
    w2 = p["conv2_w"].transpose(2, 3, 1, 0).reshape(256, 32)   # rows (kh, kw, c)
    w0 = p["lin0_w"].T                                         # (3072, nc)
    wl1 = p["lin1_w"].T.reshape(16, 14, 14, nc).transpose(1, 2, 0, 3).reshape(3136, nc)
    wl2 = p["lin2_w"].T.reshape(32, 5, 5, nc).transpose(1, 2, 0, 3).reshape(800, nc)
    wf1 = p["fc1_w"].T.reshape(32, 5, 5, 32).transpose(1, 2, 0, 3).reshape(800, 32)
    return {
        "w1": w1, "b1": p["conv1_b"].reshape(1, 16),
        "w2": w2, "b2": p["conv2_b"].reshape(1, 32),
        "w01": jnp.concatenate([w0, wl1], axis=0),             # (6208, nc)
        "wc2": jnp.concatenate([wf1, wl2], axis=1),            # (800, 32 + nc)
        "bf1": p["fc1_b"].reshape(1, 32),
        "wf2": p["fc2_w"].T,                                   # (32, nc)
        "bsum": (p["lin0_b"] + p["lin1_b"] + p["lin2_b"] + p["fc2_b"]).reshape(1, nc),
    }


# ------------------------------- reference ----------------------------------
def forward_ref(x, p):
    """Pure-XLA reference with torch semantics (NCHW convs, NCHW flattens)."""
    B = x.shape[0]
    dn = ("NCHW", "OIHW", "NCHW")
    y1 = lax.conv_general_dilated(x, p["conv1_w"], (2, 2), ((2, 2), (2, 2)),
                                  dimension_numbers=dn)
    y1 = jnp.maximum(y1 + p["conv1_b"][None, :, None, None], 0.0)
    c1 = lax.reduce_window(y1, -jnp.inf, lax.max, (1, 1, 2, 2), (1, 1, 1, 1), "VALID")
    y2 = lax.conv_general_dilated(c1, p["conv2_w"], (2, 2), ((0, 0), (0, 0)),
                                  dimension_numbers=dn)
    y2 = jnp.maximum(y2 + p["conv2_b"][None, :, None, None], 0.0)
    c2 = lax.reduce_window(y2, -jnp.inf, lax.max, (1, 1, 2, 2), (1, 1, 1, 1), "VALID")
    x_f, c1_f, c2_f = x.reshape(B, -1), c1.reshape(B, -1), c2.reshape(B, -1)
    out0 = x_f @ p["lin0_w"].T + p["lin0_b"]
    out1 = c1_f @ p["lin1_w"].T + p["lin1_b"]
    out2 = c2_f @ p["lin2_w"].T + p["lin2_b"]
    h = jnp.maximum(c2_f @ p["fc1_w"].T + p["fc1_b"], 0.0)
    out3 = h @ p["fc2_w"].T + p["fc2_b"]
    return out0 + out1 + out2 + out3


if __name__ == "__main__":
    key = jax.random.PRNGKey(0)
    kx, kparam = jax.random.split(key)
    # CIFAR-shaped input: the module's linear0 (3072-in) fixes (3, 32, 32).
    x = jax.random.normal(kx, (2, 3, 32, 32), jnp.float32)
    params = init_params(kparam)
    kparams = pack_params(params)          # one-time weight re-layout

    out = jax.block_until_ready(jax.jit(forward_pallas)(x, kparams))

    ref = forward_ref(x, params)
    assert out.shape == (2, 10), out.shape
    assert jnp.allclose(out, ref, atol=5e-3, rtol=5e-3), \
        float(jnp.max(jnp.abs(out - ref)))
    print("KERNEL_OK")
</pallas_src>

<mosaic_0001>
module attributes {stable_mosaic.version = 11 : i64} {
  func.func @_conv1_pool_kernel(%arg0: memref<450x192xf32, #tpu.memory_space<vmem>>, %arg1: memref<192x16xf32, #tpu.memory_space<vmem>>, %arg2: memref<1x16xf32, #tpu.memory_space<vmem>>, %arg3: memref<450x16xf32, #tpu.memory_space<vmem>>) attributes {dimension_semantics = [], scalar_prefetch = 0 : i64, scratch_operands = 0 : i64, tpu.core_type = #tpu.core_type<tc>} {
    %c0 = arith.constant 0 : index
    %c0_0 = arith.constant 0 : index
    %0 = vector.load %arg0[%c0, %c0_0] : memref<450x192xf32, #tpu.memory_space<vmem>>, vector<450x192xf32>
    %c0_1 = arith.constant 0 : index
    %c0_2 = arith.constant 0 : index
    %1 = vector.load %arg1[%c0_1, %c0_2] : memref<192x16xf32, #tpu.memory_space<vmem>>, vector<192x16xf32>
    %cst = arith.constant dense<0.000000e+00> : vector<450x16xf32>
    %2 = tpu.matmul %0, %1, %cst {dimension_numbers = #tpu.dot_dimension_numbers<[1], [0], [0], [1], [0, 0, 1, 1], [], []>} : vector<450x192xf32>, vector<192x16xf32>, vector<450x16xf32> -> vector<450x16xf32>
    %c0_3 = arith.constant 0 : index
    %c0_4 = arith.constant 0 : index
    %3 = vector.load %arg2[%c0_3, %c0_4] : memref<1x16xf32, #tpu.memory_space<vmem>>, vector<1x16xf32>
    %4 = vector.broadcast %3 : vector<1x16xf32> to vector<450x16xf32>
    %5 = arith.addf %2, %4 : vector<450x16xf32>
    %cst_5 = arith.constant 0.000000e+00 : f32
    %6 = vector.broadcast %cst_5 : f32 to vector<450x16xf32>
    %7 = arith.maximumf %5, %6 : vector<450x16xf32>
    %8 = vector.extract_strided_slice %7 {offsets = [0, 0], sizes = [434, 16], strides = [1, 1]} : vector<450x16xf32> to vector<434x16xf32>
    %9 = vector.extract_strided_slice %7 {offsets = [1, 0], sizes = [434, 16], strides = [1, 1]} : vector<450x16xf32> to vector<434x16xf32>
    %10 = arith.maximumf %8, %9 : vector<434x16xf32>
    %11 = vector.extract_strided_slice %7 {offsets = [15, 0], sizes = [434, 16], strides = [1, 1]} : vector<450x16xf32> to vector<434x16xf32>
    %12 = vector.extract_strided_slice %7 {offsets = [16, 0], sizes = [434, 16], strides = [1, 1]} : vector<450x16xf32> to vector<434x16xf32>
    %13 = arith.maximumf %11, %12 : vector<434x16xf32>
    %14 = arith.maximumf %10, %13 : vector<434x16xf32>
    %c0_6 = arith.constant 0 : index
    %c0_7 = arith.constant 0 : index
    %15 = vector.load %arg3[%c0_6, %c0_7] : memref<450x16xf32, #tpu.memory_space<vmem>>, vector<434x16xf32>
    tpu.vector_store %arg3[%c0_6, %c0_7], %14 {strides = array<i32>} : memref<450x16xf32, #tpu.memory_space<vmem>>, vector<434x16xf32>,
    %cst_8 = arith.constant 0.000000e+00 : f32
    %16 = vector.broadcast %cst_8 : f32 to vector<16x16xf32>
    %c434 = arith.constant 434 : index
    %c0_9 = arith.constant 0 : index
    %17 = vector.load %arg3[%c434, %c0_9] : memref<450x16xf32, #tpu.memory_space<vmem>>, vector<16x16xf32>
    tpu.vector_store %arg3[%c434, %c0_9], %16 {strides = array<i32>} : memref<450x16xf32, #tpu.memory_space<vmem>>, vector<16x16xf32>,
    return
  }
}

module attributes {stable_mosaic.version = 11 : i64} {
  func.func @_conv2_head_kernel(%arg0: memref<72x256xf32, #tpu.memory_space<vmem>>, %arg1: memref<2x6208xf32, #tpu.memory_space<vmem>>, %arg2: memref<256x32xf32, #tpu.memory_space<vmem>>, %arg3: memref<1x32xf32, #tpu.memory_space<vmem>>, %arg4: memref<6208x10xf32, #tpu.memory_space<vmem>>, %arg5: memref<800x42xf32, #tpu.memory_space<vmem>>, %arg6: memref<1x32xf32, #tpu.memory_space<vmem>>, %arg7: memref<32x10xf32, #tpu.memory_space<vmem>>, %arg8: memref<1x10xf32, #tpu.memory_space<vmem>>, %arg9: memref<2x10xf32, #tpu.memory_space<vmem>>, %arg10: memref<2x800xf32, #tpu.memory_space<vmem>>) attributes {dimension_semantics = [], scalar_prefetch = 0 : i64, scratch_operands = 1 : i64, tpu.core_type = #tpu.core_type<tc>} {
    %c0 = arith.constant 0 : index
    %c0_0 = arith.constant 0 : index
    %0 = vector.load %arg0[%c0, %c0_0] : memref<72x256xf32, #tpu.memory_space<vmem>>, vector<72x256xf32>
    %c0_1 = arith.constant 0 : index
    %c0_2 = arith.constant 0 : index
    %1 = vector.load %arg2[%c0_1, %c0_2] : memref<256x32xf32, #tpu.memory_space<vmem>>, vector<256x32xf32>
    %cst = arith.constant dense<0.000000e+00> : vector<72x32xf32>
    %2 = tpu.matmul %0, %1, %cst {dimension_numbers = #tpu.dot_dimension_numbers<[1], [0], [0], [1], [0, 0, 1, 1], [], []>} : vector<72x256xf32>, vector<256x32xf32>, vector<72x32xf32> -> vector<72x32xf32>
    %c0_3 = arith.constant 0 : index
    %c0_4 = arith.constant 0 : index
    %3 = vector.load %arg3[%c0_3, %c0_4] : memref<1x32xf32, #tpu.memory_space<vmem>>, vector<1x32xf32>
    %4 = vector.broadcast %3 : vector<1x32xf32> to vector<72x32xf32>
    %5 = arith.addf %2, %4 : vector<72x32xf32>
    %cst_5 = arith.constant 0.000000e+00 : f32
    %6 = vector.broadcast %cst_5 : f32 to vector<72x32xf32>
    %7 = arith.maximumf %5, %6 : vector<72x32xf32>
    %8 = vector.extract_strided_slice %7 {offsets = [0, 0], sizes = [65, 32], strides = [1, 1]} : vector<72x32xf32> to vector<65x32xf32>
    %9 = vector.extract_strided_slice %7 {offsets = [1, 0], sizes = [65, 32], strides = [1, 1]} : vector<72x32xf32> to vector<65x32xf32>
    %10 = arith.maximumf %8, %9 : vector<65x32xf32>
    %11 = vector.extract_strided_slice %7 {offsets = [6, 0], sizes = [65, 32], strides = [1, 1]} : vector<72x32xf32> to vector<65x32xf32>
    %12 = vector.extract_strided_slice %7 {offsets = [7, 0], sizes = [65, 32], strides = [1, 1]} : vector<72x32xf32> to vector<65x32xf32>
    %13 = arith.maximumf %11, %12 : vector<65x32xf32>
    %14 = arith.maximumf %10, %13 : vector<65x32xf32>
    %15 = vector.extract_strided_slice %14 {offsets = [0, 0], sizes = [1, 32], strides = [1, 1]} : vector<65x32xf32> to vector<1x32xf32>
    %c0_6 = arith.constant 0 : index
    %c0_7 = arith.constant 0 : index
    %16 = vector.load %arg10[%c0_6, %c0_7] : memref<2x800xf32, #tpu.memory_space<vmem>>, vector<1x32xf32>
    tpu.vector_store %arg10[%c0_6, %c0_7], %15 {strides = array<i32>} : memref<2x800xf32, #tpu.memory_space<vmem>>, vector<1x32xf32>,
    %17 = vector.extract_strided_slice %14 {offsets = [1, 0], sizes = [1, 32], strides = [1, 1]} : vector<65x32xf32> to vector<1x32xf32>
    %c0_8 = arith.constant 0 : index
    %c32 = arith.constant 32 : index
    %18 = vector.load %arg10[%c0_8, %c32] : memref<2x800xf32, #tpu.memory_space<vmem>>, vector<1x32xf32>
    tpu.vector_store %arg10[%c0_8, %c32], %17 {strides = array<i32>} : memref<2x800xf32, #tpu.memory_space<vmem>>, vector<1x32xf32>,
    %19 = vector.extract_strided_slice %14 {offsets = [2, 0], sizes = [1, 32], strides = [1, 1]} : vector<65x32xf32> to vector<1x32xf32>
    %c0_9 = arith.constant 0 : index
    %c64 = arith.constant 64 : index
    %20 = vector.load %arg10[%c0_9, %c64] : memref<2x800xf32, #tpu.memory_space<vmem>>, vector<1x32xf32>
    tpu.vector_store %arg10[%c0_9, %c64], %19 {strides = array<i32>} : memref<2x800xf32, #tpu.memory_space<vmem>>, vector<1x32xf32>,
    %21 = vector.extract_strided_slice %14 {offsets = [3, 0], sizes = [1, 32], strides = [1, 1]} : vector<65x32xf32> to vector<1x32xf32>
    %c0_10 = arith.constant 0 : index
    %c96 = arith.constant 96 : index
    %22 = vector.load %arg10[%c0_10, %c96] : memref<2x800xf32, #tpu.memory_space<vmem>>, vector<1x32xf32>
    tpu.vector_store %arg10[%c0_10, %c96], %21 {strides = array<i32>} : memref<2x800xf32, #tpu.memory_space<vmem>>, vector<1x32xf32>,
    %23 = vector.extract_strided_slice %14 {offsets = [4, 0], sizes = [1, 32], strides = [1, 1]} : vector<65x32xf32> to vector<1x32xf32>
    %c0_11 = arith.constant 0 : index
    %c128 = arith.constant 128 : index
    %24 = vector.load %arg10[%c0_11, %c128] : memref<2x800xf32, #tpu.memory_space<vmem>>, vector<1x32xf32>
    tpu.vector_store %arg10[%c0_11, %c128], %23 {strides = array<i32>} : memref<2x800xf32, #tpu.memory_space<vmem>>, vector<1x32xf32>,
    %25 = vector.extract_strided_slice %14 {offsets = [6, 0], sizes = [1, 32], strides = [1, 1]} : vector<65x32xf32> to vector<1x32xf32>
    %c0_12 = arith.constant 0 : index
    %c160 = arith.constant 160 : index
    %26 = vector.load %arg10[%c0_12, %c160] : memref<2x800xf32, #tpu.memory_space<vmem>>, vector<1x32xf32>
    tpu.vector_store %arg10[%c0_12, %c160], %25 {strides = array<i32>} : memref<2x800xf32, #tpu.memory_space<vmem>>, vector<1x32xf32>,
    %27 = vector.extract_strided_slice %14 {offsets = [7, 0], sizes = [1, 32], strides = [1, 1]} : vector<65x32xf32> to vector<1x32xf32>
    %c0_13 = arith.constant 0 : index
    %c192 = arith.constant 192 : index
    %28 = vector.load %arg10[%c0_13, %c192] : memref<2x800xf32, #tpu.memory_space<vmem>>, vector<1x32xf32>
    tpu.vector_store %arg10[%c0_13, %c192], %27 {strides = array<i32>} : memref<2x800xf32, #tpu.memory_space<vmem>>, vector<1x32xf32>,
    %29 = vector.extract_strided_slice %14 {offsets = [8, 0], sizes = [1, 32], strides = [1, 1]} : vector<65x32xf32> to vector<1x32xf32>
    %c0_14 = arith.constant 0 : index
    %c224 = arith.constant 224 : index
    %30 = vector.load %arg10[%c0_14, %c224] : memref<2x800xf32, #tpu.memory_space<vmem>>, vector<1x32xf32>
    tpu.vector_store %arg10[%c0_14, %c224], %29 {strides = array<i32>} : memref<2x800xf32, #tpu.memory_space<vmem>>, vector<1x32xf32>,
    %31 = vector.extract_strided_slice %14 {offsets = [9, 0], sizes = [1, 32], strides = [1, 1]} : vector<65x32xf32> to vector<1x32xf32>
    %c0_15 = arith.constant 0 : index
    %c256 = arith.constant 256 : index
    %32 = vector.load %arg10[%c0_15, %c256] : memref<2x800xf32, #tpu.memory_space<vmem>>, vector<1x32xf32>
    tpu.vector_store %arg10[%c0_15, %c256], %31 {strides = array<i32>} : memref<2x800xf32, #tpu.memory_space<vmem>>, vector<1x32xf32>,
    %33 = vector.extract_strided_slice %14 {offsets = [10, 0], sizes = [1, 32], strides = [1, 1]} : vector<65x32xf32> to vector<1x32xf32>
    %c0_16 = arith.constant 0 : index
    %c288 = arith.constant 288 : index
    %34 = vector.load %arg10[%c0_16, %c288] : memref<2x800xf32, #tpu.memory_space<vmem>>, vector<1x32xf32>
    tpu.vector_store %arg10[%c0_16, %c288], %33 {strides = array<i32>} : memref<2x800xf32, #tpu.memory_space<vmem>>, vector<1x32xf32>,
    %35 = vector.extract_strided_slice %14 {offsets = [12, 0], sizes = [1, 32], strides = [1, 1]} : vector<65x32xf32> to vector<1x32xf32>
    %c0_17 = arith.constant 0 : index
    %c320 = arith.constant 320 : index
    %36 = vector.load %arg10[%c0_17, %c320] : memref<2x800xf32, #tpu.memory_space<vmem>>, vector<1x32xf32>
    tpu.vector_store %arg10[%c0_17, %c320], %35 {strides = array<i32>} : memref<2x800xf32, #tpu.memory_space<vmem>>, vector<1x32xf32>,
    %37 = vector.extract_strided_slice %14 {offsets = [13, 0], sizes = [1, 32], strides = [1, 1]} : vector<65x32xf32> to vector<1x32xf32>
    %c0_18 = arith.constant 0 : index
    %c352 = arith.constant 352 : index
    %38 = vector.load %arg10[%c0_18, %c352] : memref<2x800xf32, #tpu.memory_space<vmem>>, vector<1x32xf32>
    tpu.vector_store %arg10[%c0_18, %c352], %37 {strides = array<i32>} : memref<2x800xf32, #tpu.memory_space<vmem>>, vector<1x32xf32>,
    %39 = vector.extract_strided_slice %14 {offsets = [14, 0], sizes = [1, 32], strides = [1, 1]} : vector<65x32xf32> to vector<1x32xf32>
    %c0_19 = arith.constant 0 : index
    %c384 = arith.constant 384 : index
    %40 = vector.load %arg10[%c0_19, %c384] : memref<2x800xf32, #tpu.memory_space<vmem>>, vector<1x32xf32>
    tpu.vector_store %arg10[%c0_19, %c384], %39 {strides = array<i32>} : memref<2x800xf32, #tpu.memory_space<vmem>>, vector<1x32xf32>,
    %41 = vector.extract_strided_slice %14 {offsets = [15, 0], sizes = [1, 32], strides = [1, 1]} : vector<65x32xf32> to vector<1x32xf32>
    %c0_20 = arith.constant 0 : index
    %c416 = arith.constant 416 : index
    %42 = vector.load %arg10[%c0_20, %c416] : memref<2x800xf32, #tpu.memory_space<vmem>>, vector<1x32xf32>
    tpu.vector_store %arg10[%c0_20, %c416], %41 {strides = array<i32>} : memref<2x800xf32, #tpu.memory_space<vmem>>, vector<1x32xf32>,
    %43 = vector.extract_strided_slice %14 {offsets = [16, 0], sizes = [1, 32], strides = [1, 1]} : vector<65x32xf32> to vector<1x32xf32>
    %c0_21 = arith.constant 0 : index
    %c448 = arith.constant 448 : index
    %44 = vector.load %arg10[%c0_21, %c448] : memref<2x800xf32, #tpu.memory_space<vmem>>, vector<1x32xf32>
    tpu.vector_store %arg10[%c0_21, %c448], %43 {strides = array<i32>} : memref<2x800xf32, #tpu.memory_space<vmem>>, vector<1x32xf32>,
    %45 = vector.extract_strided_slice %14 {offsets = [18, 0], sizes = [1, 32], strides = [1, 1]} : vector<65x32xf32> to vector<1x32xf32>
    %c0_22 = arith.constant 0 : index
    %c480 = arith.constant 480 : index
    %46 = vector.load %arg10[%c0_22, %c480] : memref<2x800xf32, #tpu.memory_space<vmem>>, vector<1x32xf32>
    tpu.vector_store %arg10[%c0_22, %c480], %45 {strides = array<i32>} : memref<2x800xf32, #tpu.memory_space<vmem>>, vector<1x32xf32>,
    %47 = vector.extract_strided_slice %14 {offsets = [19, 0], sizes = [1, 32], strides = [1, 1]} : vector<65x32xf32> to vector<1x32xf32>
    %c0_23 = arith.constant 0 : index
    %c512 = arith.constant 512 : index
    %48 = vector.load %arg10[%c0_23, %c512] : memref<2x800xf32, #tpu.memory_space<vmem>>, vector<1x32xf32>
    tpu.vector_store %arg10[%c0_23, %c512], %47 {strides = array<i32>} : memref<2x800xf32, #tpu.memory_space<vmem>>, vector<1x32xf32>,
    %49 = vector.extract_strided_slice %14 {offsets = [20, 0], sizes = [1, 32], strides = [1, 1]} : vector<65x32xf32> to vector<1x32xf32>
    %c0_24 = arith.constant 0 : index
    %c544 = arith.constant 544 : index
    %50 = vector.load %arg10[%c0_24, %c544] : memref<2x800xf32, #tpu.memory_space<vmem>>, vector<1x32xf32>
    tpu.vector_store %arg10[%c0_24, %c544], %49 {strides = array<i32>} : memref<2x800xf32, #tpu.memory_space<vmem>>, vector<1x32xf32>,
    %51 = vector.extract_strided_slice %14 {offsets = [21, 0], sizes = [1, 32], strides = [1, 1]} : vector<65x32xf32> to vector<1x32xf32>
    %c0_25 = arith.constant 0 : index
    %c576 = arith.constant 576 : index
    %52 = vector.load %arg10[%c0_25, %c576] : memref<2x800xf32, #tpu.memory_space<vmem>>, vector<1x32xf32>
    tpu.vector_store %arg10[%c0_25, %c576], %51 {strides = array<i32>} : memref<2x800xf32, #tpu.memory_space<vmem>>, vector<1x32xf32>,
    %53 = vector.extract_strided_slice %14 {offsets = [22, 0], sizes = [1, 32], strides = [1, 1]} : vector<65x32xf32> to vector<1x32xf32>
    %c0_26 = arith.constant 0 : index
    %c608 = arith.constant 608 : index
    %54 = vector.load %arg10[%c0_26, %c608] : memref<2x800xf32, #tpu.memory_space<vmem>>, vector<1x32xf32>
    tpu.vector_store %arg10[%c0_26, %c608], %53 {strides = array<i32>} : memref<2x800xf32, #tpu.memory_space<vmem>>, vector<1x32xf32>,
    %55 = vector.extract_strided_slice %14 {offsets = [24, 0], sizes = [1, 32], strides = [1, 1]} : vector<65x32xf32> to vector<1x32xf32>
    %c0_27 = arith.constant 0 : index
    %c640 = arith.constant 640 : index
    %56 = vector.load %arg10[%c0_27, %c640] : memref<2x800xf32, #tpu.memory_space<vmem>>, vector<1x32xf32>
    tpu.vector_store %arg10[%c0_27, %c640], %55 {strides = array<i32>} : memref<2x800xf32, #tpu.memory_space<vmem>>, vector<1x32xf32>,
    %57 = vector.extract_strided_slice %14 {offsets = [25, 0], sizes = [1, 32], strides = [1, 1]} : vector<65x32xf32> to vector<1x32xf32>
    %c0_28 = arith.constant 0 : index
    %c672 = arith.constant 672 : index
    %58 = vector.load %arg10[%c0_28, %c672] : memref<2x800xf32, #tpu.memory_space<vmem>>, vector<1x32xf32>
    tpu.vector_store %arg10[%c0_28, %c672], %57 {strides = array<i32>} : memref<2x800xf32, #tpu.memory_space<vmem>>, vector<1x32xf32>,
    %59 = vector.extract_strided_slice %14 {offsets = [26, 0], sizes = [1, 32], strides = [1, 1]} : vector<65x32xf32> to vector<1x32xf32>
    %c0_29 = arith.constant 0 : index
    %c704 = arith.constant 704 : index
    %60 = vector.load %arg10[%c0_29, %c704] : memref<2x800xf32, #tpu.memory_space<vmem>>, vector<1x32xf32>
    tpu.vector_store %arg10[%c0_29, %c704], %59 {strides = array<i32>} : memref<2x800xf32, #tpu.memory_space<vmem>>, vector<1x32xf32>,
    %61 = vector.extract_strided_slice %14 {offsets = [27, 0], sizes = [1, 32], strides = [1, 1]} : vector<65x32xf32> to vector<1x32xf32>
    %c0_30 = arith.constant 0 : index
    %c736 = arith.constant 736 : index
    %62 = vector.load %arg10[%c0_30, %c736] : memref<2x800xf32, #tpu.memory_space<vmem>>, vector<1x32xf32>
    tpu.vector_store %arg10[%c0_30, %c736], %61 {strides = array<i32>} : memref<2x800xf32, #tpu.memory_space<vmem>>, vector<1x32xf32>,
    %63 = vector.extract_strided_slice %14 {offsets = [28, 0], sizes = [1, 32], strides = [1, 1]} : vector<65x32xf32> to vector<1x32xf32>
    %c0_31 = arith.constant 0 : index
    %c768 = arith.constant 768 : index
    %64 = vector.load %arg10[%c0_31, %c768] : memref<2x800xf32, #tpu.memory_space<vmem>>, vector<1x32xf32>
    tpu.vector_store %arg10[%c0_31, %c768], %63 {strides = array<i32>} : memref<2x800xf32, #tpu.memory_space<vmem>>, vector<1x32xf32>,
    %65 = vector.extract_strided_slice %14 {offsets = [36, 0], sizes = [1, 32], strides = [1, 1]} : vector<65x32xf32> to vector<1x32xf32>
    %c1 = arith.constant 1 : index
    %c0_32 = arith.constant 0 : index
    %66 = vector.load %arg10[%c1, %c0_32] : memref<2x800xf32, #tpu.memory_space<vmem>>, vector<1x32xf32>
    tpu.vector_store %arg10[%c1, %c0_32], %65 {strides = array<i32>} : memref<2x800xf32, #tpu.memory_space<vmem>>, vector<1x32xf32>,
    %67 = vector.extract_strided_slice %14 {offsets = [37, 0], sizes = [1, 32], strides = [1, 1]} : vector<65x32xf32> to vector<1x32xf32>
    %c1_33 = arith.constant 1 : index
    %c32_34 = arith.constant 32 : index
    %68 = vector.load %arg10[%c1_33, %c32_34] : memref<2x800xf32, #tpu.memory_space<vmem>>, vector<1x32xf32>
    tpu.vector_store %arg10[%c1_33, %c32_34], %67 {strides = array<i32>} : memref<2x800xf32, #tpu.memory_space<vmem>>, vector<1x32xf32>,
    %69 = vector.extract_strided_slice %14 {offsets = [38, 0], sizes = [1, 32], strides = [1, 1]} : vector<65x32xf32> to vector<1x32xf32>
    %c1_35 = arith.constant 1 : index
    %c64_36 = arith.constant 64 : index
    %70 = vector.load %arg10[%c1_35, %c64_36] : memref<2x800xf32, #tpu.memory_space<vmem>>, vector<1x32xf32>
    tpu.vector_store %arg10[%c1_35, %c64_36], %69 {strides = array<i32>} : memref<2x800xf32, #tpu.memory_space<vmem>>, vector<1x32xf32>,
    %71 = vector.extract_strided_slice %14 {offsets = [39, 0], sizes = [1, 32], strides = [1, 1]} : vector<65x32xf32> to vector<1x32xf32>
    %c1_37 = arith.constant 1 : index
    %c96_38 = arith.constant 96 : index
    %72 = vector.load %arg10[%c1_37, %c96_38] : memref<2x800xf32, #tpu.memory_space<vmem>>, vector<1x32xf32>
    tpu.vector_store %arg10[%c1_37, %c96_38], %71 {strides = array<i32>} : memref<2x800xf32, #tpu.memory_space<vmem>>, vector<1x32xf32>,
    %73 = vector.extract_strided_slice %14 {offsets = [40, 0], sizes = [1, 32], strides = [1, 1]} : vector<65x32xf32> to vector<1x32xf32>
    %c1_39 = arith.constant 1 : index
    %c128_40 = arith.constant 128 : index
    %74 = vector.load %arg10[%c1_39, %c128_40] : memref<2x800xf32, #tpu.memory_space<vmem>>, vector<1x32xf32>
    tpu.vector_store %arg10[%c1_39, %c128_40], %73 {strides = array<i32>} : memref<2x800xf32, #tpu.memory_space<vmem>>, vector<1x32xf32>,
    %75 = vector.extract_strided_slice %14 {offsets = [42, 0], sizes = [1, 32], strides = [1, 1]} : vector<65x32xf32> to vector<1x32xf32>
    %c1_41 = arith.constant 1 : index
    %c160_42 = arith.constant 160 : index
    %76 = vector.load %arg10[%c1_41, %c160_42] : memref<2x800xf32, #tpu.memory_space<vmem>>, vector<1x32xf32>
    tpu.vector_store %arg10[%c1_41, %c160_42], %75 {strides = array<i32>} : memref<2x800xf32, #tpu.memory_space<vmem>>, vector<1x32xf32>,
    %77 = vector.extract_strided_slice %14 {offsets = [43, 0], sizes = [1, 32], strides = [1, 1]} : vector<65x32xf32> to vector<1x32xf32>
    %c1_43 = arith.constant 1 : index
    %c192_44 = arith.constant 192 : index
    %78 = vector.load %arg10[%c1_43, %c192_44] : memref<2x800xf32, #tpu.memory_space<vmem>>, vector<1x32xf32>
    tpu.vector_store %arg10[%c1_43, %c192_44], %77 {strides = array<i32>} : memref<2x800xf32, #tpu.memory_space<vmem>>, vector<1x32xf32>,
    %79 = vector.extract_strided_slice %14 {offsets = [44, 0], sizes = [1, 32], strides = [1, 1]} : vector<65x32xf32> to vector<1x32xf32>
    %c1_45 = arith.constant 1 : index
    %c224_46 = arith.constant 224 : index
    %80 = vector.load %arg10[%c1_45, %c224_46] : memref<2x800xf32, #tpu.memory_space<vmem>>, vector<1x32xf32>
    tpu.vector_store %arg10[%c1_45, %c224_46], %79 {strides = array<i32>} : memref<2x800xf32, #tpu.memory_space<vmem>>, vector<1x32xf32>,
    %81 = vector.extract_strided_slice %14 {offsets = [45, 0], sizes = [1, 32], strides = [1, 1]} : vector<65x32xf32> to vector<1x32xf32>
    %c1_47 = arith.constant 1 : index
    %c256_48 = arith.constant 256 : index
    %82 = vector.load %arg10[%c1_47, %c256_48] : memref<2x800xf32, #tpu.memory_space<vmem>>, vector<1x32xf32>
    tpu.vector_store %arg10[%c1_47, %c256_48], %81 {strides = array<i32>} : memref<2x800xf32, #tpu.memory_space<vmem>>, vector<1x32xf32>,
    %83 = vector.extract_strided_slice %14 {offsets = [46, 0], sizes = [1, 32], strides = [1, 1]} : vector<65x32xf32> to vector<1x32xf32>
    %c1_49 = arith.constant 1 : index
    %c288_50 = arith.constant 288 : index
    %84 = vector.load %arg10[%c1_49, %c288_50] : memref<2x800xf32, #tpu.memory_space<vmem>>, vector<1x32xf32>
    tpu.vector_store %arg10[%c1_49, %c288_50], %83 {strides = array<i32>} : memref<2x800xf32, #tpu.memory_space<vmem>>, vector<1x32xf32>,
    %85 = vector.extract_strided_slice %14 {offsets = [48, 0], sizes = [1, 32], strides = [1, 1]} : vector<65x32xf32> to vector<1x32xf32>
    %c1_51 = arith.constant 1 : index
    %c320_52 = arith.constant 320 : index
    %86 = vector.load %arg10[%c1_51, %c320_52] : memref<2x800xf32, #tpu.memory_space<vmem>>, vector<1x32xf32>
    tpu.vector_store %arg10[%c1_51, %c320_52], %85 {strides = array<i32>} : memref<2x800xf32, #tpu.memory_space<vmem>>, vector<1x32xf32>,
    %87 = vector.extract_strided_slice %14 {offsets = [49, 0], sizes = [1, 32], strides = [1, 1]} : vector<65x32xf32> to vector<1x32xf32>
    %c1_53 = arith.constant 1 : index
    %c352_54 = arith.constant 352 : index
    %88 = vector.load %arg10[%c1_53, %c352_54] : memref<2x800xf32, #tpu.memory_space<vmem>>, vector<1x32xf32>
    tpu.vector_store %arg10[%c1_53, %c352_54], %87 {strides = array<i32>} : memref<2x800xf32, #tpu.memory_space<vmem>>, vector<1x32xf32>,
    %89 = vector.extract_strided_slice %14 {offsets = [50, 0], sizes = [1, 32], strides = [1, 1]} : vector<65x32xf32> to vector<1x32xf32>
    %c1_55 = arith.constant 1 : index
    %c384_56 = arith.constant 384 : index
    %90 = vector.load %arg10[%c1_55, %c384_56] : memref<2x800xf32, #tpu.memory_space<vmem>>, vector<1x32xf32>
    tpu.vector_store %arg10[%c1_55, %c384_56], %89 {strides = array<i32>} : memref<2x800xf32, #tpu.memory_space<vmem>>, vector<1x32xf32>,
    %91 = vector.extract_strided_slice %14 {offsets = [51, 0], sizes = [1, 32], strides = [1, 1]} : vector<65x32xf32> to vector<1x32xf32>
    %c1_57 = arith.constant 1 : index
    %c416_58 = arith.constant 416 : index
    %92 = vector.load %arg10[%c1_57, %c416_58] : memref<2x800xf32, #tpu.memory_space<vmem>>, vector<1x32xf32>
    tpu.vector_store %arg10[%c1_57, %c416_58], %91 {strides = array<i32>} : memref<2x800xf32, #tpu.memory_space<vmem>>, vector<1x32xf32>,
    %93 = vector.extract_strided_slice %14 {offsets = [52, 0], sizes = [1, 32], strides = [1, 1]} : vector<65x32xf32> to vector<1x32xf32>
    %c1_59 = arith.constant 1 : index
    %c448_60 = arith.constant 448 : index
    %94 = vector.load %arg10[%c1_59, %c448_60] : memref<2x800xf32, #tpu.memory_space<vmem>>, vector<1x32xf32>
    tpu.vector_store %arg10[%c1_59, %c448_60], %93 {strides = array<i32>} : memref<2x800xf32, #tpu.memory_space<vmem>>, vector<1x32xf32>,
    %95 = vector.extract_strided_slice %14 {offsets = [54, 0], sizes = [1, 32], strides = [1, 1]} : vector<65x32xf32> to vector<1x32xf32>
    %c1_61 = arith.constant 1 : index
    %c480_62 = arith.constant 480 : index
    %96 = vector.load %arg10[%c1_61, %c480_62] : memref<2x800xf32, #tpu.memory_space<vmem>>, vector<1x32xf32>
    tpu.vector_store %arg10[%c1_61, %c480_62], %95 {strides = array<i32>} : memref<2x800xf32, #tpu.memory_space<vmem>>, vector<1x32xf32>,
    %97 = vector.extract_strided_slice %14 {offsets = [55, 0], sizes = [1, 32], strides = [1, 1]} : vector<65x32xf32> to vector<1x32xf32>
    %c1_63 = arith.constant 1 : index
    %c512_64 = arith.constant 512 : index
    %98 = vector.load %arg10[%c1_63, %c512_64] : memref<2x800xf32, #tpu.memory_space<vmem>>, vector<1x32xf32>
    tpu.vector_store %arg10[%c1_63, %c512_64], %97 {strides = array<i32>} : memref<2x800xf32, #tpu.memory_space<vmem>>, vector<1x32xf32>,
    %99 = vector.extract_strided_slice %14 {offsets = [56, 0], sizes = [1, 32], strides = [1, 1]} : vector<65x32xf32> to vector<1x32xf32>
    %c1_65 = arith.constant 1 : index
    %c544_66 = arith.constant 544 : index
    %100 = vector.load %arg10[%c1_65, %c544_66] : memref<2x800xf32, #tpu.memory_space<vmem>>, vector<1x32xf32>
    tpu.vector_store %arg10[%c1_65, %c544_66], %99 {strides = array<i32>} : memref<2x800xf32, #tpu.memory_space<vmem>>, vector<1x32xf32>,
    %101 = vector.extract_strided_slice %14 {offsets = [57, 0], sizes = [1, 32], strides = [1, 1]} : vector<65x32xf32> to vector<1x32xf32>
    %c1_67 = arith.constant 1 : index
    %c576_68 = arith.constant 576 : index
    %102 = vector.load %arg10[%c1_67, %c576_68] : memref<2x800xf32, #tpu.memory_space<vmem>>, vector<1x32xf32>
    tpu.vector_store %arg10[%c1_67, %c576_68], %101 {strides = array<i32>} : memref<2x800xf32, #tpu.memory_space<vmem>>, vector<1x32xf32>,
    %103 = vector.extract_strided_slice %14 {offsets = [58, 0], sizes = [1, 32], strides = [1, 1]} : vector<65x32xf32> to vector<1x32xf32>
    %c1_69 = arith.constant 1 : index
    %c608_70 = arith.constant 608 : index
    %104 = vector.load %arg10[%c1_69, %c608_70] : memref<2x800xf32, #tpu.memory_space<vmem>>, vector<1x32xf32>
    tpu.vector_store %arg10[%c1_69, %c608_70], %103 {strides = array<i32>} : memref<2x800xf32, #tpu.memory_space<vmem>>, vector<1x32xf32>,
    %105 = vector.extract_strided_slice %14 {offsets = [60, 0], sizes = [1, 32], strides = [1, 1]} : vector<65x32xf32> to vector<1x32xf32>
    %c1_71 = arith.constant 1 : index
    %c640_72 = arith.constant 640 : index
    %106 = vector.load %arg10[%c1_71, %c640_72] : memref<2x800xf32, #tpu.memory_space<vmem>>, vector<1x32xf32>
    tpu.vector_store %arg10[%c1_71, %c640_72], %105 {strides = array<i32>} : memref<2x800xf32, #tpu.memory_space<vmem>>, vector<1x32xf32>,
    %107 = vector.extract_strided_slice %14 {offsets = [61, 0], sizes = [1, 32], strides = [1, 1]} : vector<65x32xf32> to vector<1x32xf32>
    %c1_73 = arith.constant 1 : index
    %c672_74 = arith.constant 672 : index
    %108 = vector.load %arg10[%c1_73, %c672_74] : memref<2x800xf32, #tpu.memory_space<vmem>>, vector<1x32xf32>
    tpu.vector_store %arg10[%c1_73, %c672_74], %107 {strides = array<i32>} : memref<2x800xf32, #tpu.memory_space<vmem>>, vector<1x32xf32>,
    %109 = vector.extract_strided_slice %14 {offsets = [62, 0], sizes = [1, 32], strides = [1, 1]} : vector<65x32xf32> to vector<1x32xf32>
    %c1_75 = arith.constant 1 : index
    %c704_76 = arith.constant 704 : index
    %110 = vector.load %arg10[%c1_75, %c704_76] : memref<2x800xf32, #tpu.memory_space<vmem>>, vector<1x32xf32>
    tpu.vector_store %arg10[%c1_75, %c704_76], %109 {strides = array<i32>} : memref<2x800xf32, #tpu.memory_space<vmem>>, vector<1x32xf32>,
    %111 = vector.extract_strided_slice %14 {offsets = [63, 0], sizes = [1, 32], strides = [1, 1]} : vector<65x32xf32> to vector<1x32xf32>
    %c1_77 = arith.constant 1 : index
    %c736_78 = arith.constant 736 : index
    %112 = vector.load %arg10[%c1_77, %c736_78] : memref<2x800xf32, #tpu.memory_space<vmem>>, vector<1x32xf32>
    tpu.vector_store %arg10[%c1_77, %c736_78], %111 {strides = array<i32>} : memref<2x800xf32, #tpu.memory_space<vmem>>, vector<1x32xf32>,
    %113 = vector.extract_strided_slice %14 {offsets = [64, 0], sizes = [1, 32], strides = [1, 1]} : vector<65x32xf32> to vector<1x32xf32>
    %c1_79 = arith.constant 1 : index
    %c768_80 = arith.constant 768 : index
    %114 = vector.load %arg10[%c1_79, %c768_80] : memref<2x800xf32, #tpu.memory_space<vmem>>, vector<1x32xf32>
    tpu.vector_store %arg10[%c1_79, %c768_80], %113 {strides = array<i32>} : memref<2x800xf32, #tpu.memory_space<vmem>>, vector<1x32xf32>,
    %c0_81 = arith.constant 0 : index
    %c0_82 = arith.constant 0 : index
    %115 = vector.load %arg10[%c0_81, %c0_82] : memref<2x800xf32, #tpu.memory_space<vmem>>, vector<2x800xf32>
    %c0_83 = arith.constant 0 : index
    %c0_84 = arith.constant 0 : index
    %116 = vector.load %arg1[%c0_83, %c0_84] : memref<2x6208xf32, #tpu.memory_space<vmem>>, vector<2x6208xf32>
    %c0_85 = arith.constant 0 : index
    %c0_86 = arith.constant 0 : index
    %117 = vector.load %arg4[%c0_85, %c0_86] : memref<6208x10xf32, #tpu.memory_space<vmem>>, vector<6208x10xf32>
    %cst_87 = arith.constant dense<0.000000e+00> : vector<2x10xf32>
    %118 = tpu.matmul %116, %117, %cst_87 {dimension_numbers = #tpu.dot_dimension_numbers<[1], [0], [0], [1], [0, 0, 1, 1], [], []>} : vector<2x6208xf32>, vector<6208x10xf32>, vector<2x10xf32> -> vector<2x10xf32>
    %c0_88 = arith.constant 0 : index
    %c0_89 = arith.constant 0 : index
    %119 = vector.load %arg5[%c0_88, %c0_89] : memref<800x42xf32, #tpu.memory_space<vmem>>, vector<800x42xf32>
    %cst_90 = arith.constant dense<0.000000e+00> : vector<2x42xf32>
    %120 = tpu.matmul %115, %119, %cst_90 {dimension_numbers = #tpu.dot_dimension_numbers<[1], [0], [0], [1], [0, 0, 1, 1], [], []>} : vector<2x800xf32>, vector<800x42xf32>, vector<2x42xf32> -> vector<2x42xf32>
    %121 = vector.extract_strided_slice %120 {offsets = [0, 0], sizes = [2, 32], strides = [1, 1]} : vector<2x42xf32> to vector<2x32xf32>
    %c0_91 = arith.constant 0 : index
    %c0_92 = arith.constant 0 : index
    %122 = vector.load %arg6[%c0_91, %c0_92] : memref<1x32xf32, #tpu.memory_space<vmem>>, vector<1x32xf32>
    %123 = vector.broadcast %122 : vector<1x32xf32> to vector<2x32xf32>
    %124 = arith.addf %121, %123 : vector<2x32xf32>
    %cst_93 = arith.constant 0.000000e+00 : f32
    %125 = vector.broadcast %cst_93 : f32 to vector<2x32xf32>
    %126 = arith.maximumf %124, %125 : vector<2x32xf32>
    %c0_94 = arith.constant 0 : index
    %c0_95 = arith.constant 0 : index
    %127 = vector.load %arg7[%c0_94, %c0_95] : memref<32x10xf32, #tpu.memory_space<vmem>>, vector<32x10xf32>
    %cst_96 = arith.constant dense<0.000000e+00> : vector<2x10xf32>
    %128 = tpu.matmul %126, %127, %cst_96 {dimension_numbers = #tpu.dot_dimension_numbers<[1], [0], [0], [1], [0, 0, 1, 1], [], []>} : vector<2x32xf32>, vector<32x10xf32>, vector<2x10xf32> -> vector<2x10xf32>
    %129 = vector.extract_strided_slice %120 {offsets = [0, 32], sizes = [2, 10], strides = [1, 1]} : vector<2x42xf32> to vector<2x10xf32>
    %130 = arith.addf %118, %129 : vector<2x10xf32>
    %131 = arith.addf %130, %128 : vector<2x10xf32>
    %c0_97 = arith.constant 0 : index
    %c0_98 = arith.constant 0 : index
    %132 = vector.load %arg8[%c0_97, %c0_98] : memref<1x10xf32, #tpu.memory_space<vmem>>, vector<1x10xf32>
    %133 = vector.broadcast %132 : vector<1x10xf32> to vector<2x10xf32>
    %134 = arith.addf %131, %133 : vector<2x10xf32>
    %c0_99 = arith.constant 0 : index
    %c0_100 = arith.constant 0 : index
    %135 = vector.load %arg9[%c0_99, %c0_100] : memref<2x10xf32, #tpu.memory_space<vmem>>, vector<2x10xf32>
    tpu.vector_store %arg9[%c0_99, %c0_100], %134 {strides = array<i32>} : memref<2x10xf32, #tpu.memory_space<vmem>>, vector<2x10xf32>,
    return
  }
}

</mosaic_0001>

<bundles_post_ra>
// kernel: forward_pallas.2
= control target key start
LH: loop header
LB: loop body
LE: loop exit
PB: predicated region body
PF: predicated region fallthrough
CT: control target
= control target key end

     0   :  { %vm156_vm0 = vcmask 523264   ;;  %vm816_vm1 = vcmask 1046528   ;;  %vm1106_vm2 = vcmask 1040384   ;;  %vm1328_vm3 = vcmask 130048   ;;  %s2793_s1 = inlined_call_operand.vmem [shape: f32[192,16], index: 1, kind: input, shape index: {}]   ;;  %s2794_s0 = inlined_call_operand.vmem [shape: f32[450,192], index: 0, kind: input, shape index: {}]   ;;  %s2795_s2 = inlined_call_operand.vmem [shape: f32[1,16], index: 2, kind: input, shape index: {}]   ;;  %s2796_s3 = inlined_call_operand.vmem [shape: f32[450,16], index: 3, kind: output, shape index: {}]  }
   0x1   :  { %v143_v0 = vld [vmem:[%s2793_s1 + $0x78] sm:$0xff]  ;;  %v142_v2 = vld [vmem:[%s2793_s1 + $0x70] sm:$0xff]  ;;  %v141_v4 = vld [vmem:[%s2793_s1 + $0x68] sm:$0xff]  ;;  %vm1383_vm4 = vcmask 123904  }
   0x2   :  { %v1526_v1 = vld [vmem:[%s2793_s1 + $0xb8] sm:$0xff]  ;;  %328 = vmatpush.msra.mxu0 %v143_v0  ;;  %1448 = vmatpush.msra.mxu2 %v143_v0  ;;  %v1534_v3 = vld [vmem:[%s2793_s1 + $0xb0] sm:$0xff]  ;;  %v1543_v5 = vld [vmem:[%s2793_s1 + $0xa8] sm:$0xff] }
   0x3   :  { %1449 = vmatpush.msra.mxu3 %v143_v0  ;;  %1480 = vmatpush.msra.mxu1 %v1526_v1  ;;  %v140_v6 = vld [vmem:[%s2793_s1 + $0x60] sm:$0xff]  ;;  %v139_v8 = vld [vmem:[%s2793_s1 + $0x58] sm:$0xff]  ;;  %v138_v10 = vld [vmem:[%s2793_s1 + $0x50] sm:$0xff] }
   0x4   :  { %329 = vmatpush.msra.mxu0 %v142_v2  ;;  %1450 = vmatpush.msra.mxu2 %v142_v2  ;;  %v1552_v7 = vld [vmem:[%s2793_s1 + $0xa0] sm:$0xff]  ;;  %v1561_v9 = vld [vmem:[%s2793_s1 + $0x98] sm:$0xff]  ;;  %v1570_v11 = vld [vmem:[%s2793_s1 + $0x90] sm:$0xff] }
   0x5   :  { %1451 = vmatpush.msra.mxu3 %v142_v2  ;;  %1482 = vmatpush.msra.mxu1 %v1534_v3  ;;  %v137_v12 = vld [vmem:[%s2793_s1 + $0x48] sm:$0xff]  ;;  %v136_v14 = vld [vmem:[%s2793_s1 + $0x40] sm:$0xff]  ;;  %v17_v16 = vld [vmem:[%s2794_s0 + $0x18] sm:$0xff] }
   0x6   :  { %330 = vmatpush.msra.mxu0 %v141_v4  ;;  %1452 = vmatpush.msra.mxu2 %v141_v4  ;;  %v1579_v13 = vld [vmem:[%s2793_s1 + $0x88] sm:$0xff]  ;;  %v1588_v15 = vld [vmem:[%s2793_s1 + $0x80] sm:$0xff]  ;;  %v135_v17 = vld [vmem:[%s2793_s1 + $0x38] sm:$0xff] }
   0x7   :  { %1453 = vmatpush.msra.mxu3 %v141_v4  ;;  %1484 = vmatpush.msra.mxu1 %v1543_v5  ;;  %v134_v18 = vld [vmem:[%s2793_s1 + $0x30] sm:$0xff]  ;;  %v133_v19 = vld [vmem:[%s2793_s1 + $0x28] sm:$0xff]  ;;  %v132_v20 = vld [vmem:[%s2793_s1 + $0x20] sm:$0xff] }
   0x8   :  { %331 = vmatpush.msra.mxu0 %v140_v6  ;;  %1454 = vmatpush.msra.mxu2 %v140_v6  ;;  %v19_v21 = vld [vmem:[%s2794_s0 + $0x28] sm:$0xff]  ;;  %v131_v22 = vld [vmem:[%s2793_s1 + $0x18] sm:$0xff]  ;;  %v130_v23 = vld [vmem:[%s2793_s1 + $0x10] sm:$0xff] }
   0x9   :  { %1455 = vmatpush.msra.mxu3 %v140_v6  ;;  %1486 = vmatpush.msra.mxu1 %v1552_v7  ;;  %v129_v24 = vld [vmem:[%s2793_s1 + $0x8] sm:$0xff]  ;;  %v128_v25 = vld [vmem:[%s2793_s1] sm:$0xff]  ;;  %v68_v27 = vld [vmem:[%s2794_s0 + $0x1b0] sm:$0xff] }
   0xa   :  { %332 = vmatpush.msra.mxu0 %v139_v8  ;;  %1456 = vmatpush.msra.mxu2 %v139_v8  ;;  %v14_v26 = vld [vmem:[%s2794_s0] sm:$0xff]  ;;  %v124_v28 = vld [vmem:[%s2794_s0 + $0x370] sm:$0xff]  ;;  %v21_v29 = vld [vmem:[%s2794_s0 + $0x38] sm:$0xff] }
   0xb   :  { %1457 = vmatpush.msra.mxu3 %v139_v8  ;;  %1488 = vmatpush.msra.mxu1 %v1561_v9  ;;  %v16_v30 = vld [vmem:[%s2794_s0 + $0x10] sm:$0xff]  ;;  %v70_v31 = vld [vmem:[%s2794_s0 + $0x1c0] sm:$0xff]  ;;  %v23_v33 = vld [vmem:[%s2794_s0 + $0x48] sm:$0xff] }
   0xc   :  { %333 = vmatpush.msra.mxu0 %v138_v10  ;;  %1458 = vmatpush.msra.mxu2 %v138_v10  ;;  %v126_v32 = vld [vmem:[%s2794_s0 + $0x380] sm:$0x3]  ;;  %v72_v35 = vld [vmem:[%s2794_s0 + $0x1d0] sm:$0xff]  ;;  %v77_v36 = vld [vmem:[%s2794_s0 + $0x1f8] sm:$0xff] }
   0xd   :  { %1459 = vmatpush.msra.mxu3 %v138_v10  ;;  %1490 = vmatpush.msra.mxu1 %v1570_v11  ;;  %v18_v34 = vld [vmem:[%s2794_s0 + $0x20] sm:$0xff]  ;;  %v25_v37 = vld [vmem:[%s2794_s0 + $0x58] sm:$0xff]  ;;  %v20_v38 = vld [vmem:[%s2794_s0 + $0x30] sm:$0xff] }
   0xe   :  { %334 = vmatpush.msra.mxu0 %v137_v12  ;;  %1460 = vmatpush.msra.mxu2 %v137_v12  ;;  %v74_v39 = vld [vmem:[%s2794_s0 + $0x1e0] sm:$0xff]  ;;  %v79_v40 = vld [vmem:[%s2794_s0 + $0x208] sm:$0xff]  ;;  %v76_v43 = vld [vmem:[%s2794_s0 + $0x1f0] sm:$0xff] }
   0xf   :  { %1461 = vmatpush.msra.mxu3 %v137_v12  ;;  %1492 = vmatpush.msra.mxu1 %v1579_v13  ;;  %v27_v41 = vld [vmem:[%s2794_s0 + $0x68] sm:$0xff]  ;;  %v22_v42 = vld [vmem:[%s2794_s0 + $0x40] sm:$0xff]  ;;  %v81_v44 = vld [vmem:[%s2794_s0 + $0x218] sm:$0xff] }
  0x10   :  { %335 = vmatpush.msra.mxu0 %v136_v14  ;;  %1462 = vmatpush.msra.mxu2 %v136_v14  ;;  %v29_v45 = vld [vmem:[%s2794_s0 + $0x78] sm:$0xff]  ;;  %v24_v46 = vld [vmem:[%s2794_s0 + $0x50] sm:$0xff]  ;;  %v78_v47 = vld [vmem:[%s2794_s0 + $0x200] sm:$0xff] }
  0x11   :  { %1463 = vmatpush.msra.mxu3 %v136_v14  ;;  %1494 = vmatpush.msra.mxu1 %v1588_v15  ;;  %v83_v48 = vld [vmem:[%s2794_s0 + $0x228] sm:$0xff]  ;;  %v26_v50 = vld [vmem:[%s2794_s0 + $0x60] sm:$0xff]  ;;  %v80_v51 = vld [vmem:[%s2794_s0 + $0x210] sm:$0xff] }
  0x12   :  { %1392 = vmatmul.msk.f32.vlgmr.msra.gmra.mxu1 %vm156_vm0, %v17_v16  ;;  %336 = vmatpush.msra.mxu0 %v135_v17  ;;  %v31_v49 = vld [vmem:[%s2794_s0 + $0x88] sm:$0xff]  ;;  %v85_v52 = vld [vmem:[%s2794_s0 + $0x238] sm:$0xff]  ;;  %v28_v54 = vld [vmem:[%s2794_s0 + $0x70] sm:$0xff] }
  0x13   :  { %1464 = vmatpush.msra.mxu2 %v135_v17  ;;  %1465 = vmatpush.msra.mxu3 %v135_v17  ;;  %v33_v53 = vld [vmem:[%s2794_s0 + $0x98] sm:$0xff]  ;;  %v82_v55 = vld [vmem:[%s2794_s0 + $0x220] sm:$0xff]  ;;  %v87_v56 = vld [vmem:[%s2794_s0 + $0x248] sm:$0xff] }
  0x14   :  { %337 = vmatpush.msra.mxu0 %v134_v18  ;;  %v35_v57 = vld [vmem:[%s2794_s0 + $0xa8] sm:$0xff]  ;;  %v30_v58 = vld [vmem:[%s2794_s0 + $0x80] sm:$0xff]  ;;  %v84_v59 = vld [vmem:[%s2794_s0 + $0x230] sm:$0xff] }
  0x15   :  { %1466 = vmatpush.msra.mxu2 %v134_v18  ;;  %1467 = vmatpush.msra.mxu3 %v134_v18  ;;  %v89_v60 = vld [vmem:[%s2794_s0 + $0x258] sm:$0xff]  ;;  %v32_v62 = vld [vmem:[%s2794_s0 + $0x90] sm:$0xff]  ;;  %v86_v63 = vld [vmem:[%s2794_s0 + $0x240] sm:$0xff] }
  0x16   :  { %338 = vmatpush.msra.mxu0 %v133_v19  ;;  %v37_v61 = vld [vmem:[%s2794_s0 + $0xb8] sm:$0xff]  ;;  %v91_v0 = vld [vmem:[%s2794_s0 + $0x268] sm:$0xff]  ;;  %v34_v2 = vld [vmem:[%s2794_s0 + $0xa0] sm:$0xff] }
  0x17   :  { %1468 = vmatpush.msra.mxu2 %v133_v19  ;;  %1469 = vmatpush.msra.mxu3 %v133_v19  ;;  %v93_v4 = vld [vmem:[%s2794_s0 + $0x278] sm:$0xff]  ;;  %v36_v6 = vld [vmem:[%s2794_s0 + $0xb0] sm:$0xff]  ;;  %v95_v8 = vld [vmem:[%s2794_s0 + $0x288] sm:$0xff] }
  0x18   :  { %339 = vmatpush.msra.mxu0 %v132_v20  ;;  %v38_v10 = vld [vmem:[%s2794_s0 + $0xc0] sm:$0xff]  ;;  %v97_v12 = vld [vmem:[%s2794_s0 + $0x298] sm:$0xff]  ;;  %v40_v14 = vld [vmem:[%s2794_s0 + $0xd0] sm:$0xff] }
  0x19   :  { %1470 = vmatpush.msra.mxu2 %v132_v20  ;;  %1471 = vmatpush.msra.mxu3 %v132_v20  ;;  %v99_v16 = vld [vmem:[%s2794_s0 + $0x2a8] sm:$0xff]  ;;  %v42_v19 = vld [vmem:[%s2794_s0 + $0xe0] sm:$0xff]  ;;  %v96_v20 = vld [vmem:[%s2794_s0 + $0x290] sm:$0xff] }
  0x1a   :  { %1393 = vmatmul.msk.f32.gmra.mxu1 %vm156_vm0, %v19_v21  ;;  %340 = vmatpush.msra.mxu0 %v131_v22  ;;  %v47_v17 = vld [vmem:[%s2794_s0 + $0x108] sm:$0xff]  ;;  %v101_v21 = vld [vmem:[%s2794_s0 + $0x2b8] sm:$0xff] }
  0x1b   :  { %1472 = vmatpush.msra.mxu2 %v131_v22  ;;  %1473 = vmatpush.msra.mxu3 %v131_v22  ;;  %v49_v22 = vld [vmem:[%s2794_s0 + $0x118] sm:$0xff] }
  0x1c   :  { %341 = vmatpush.msra.mxu0 %v130_v23 }
  0x1d   :  { %1474 = vmatpush.msra.mxu2 %v130_v23  ;;  %1475 = vmatpush.msra.mxu3 %v130_v23 }
  0x1e   :  { %342 = vmatpush.msra.mxu0 %v129_v24 }
  0x1f   :  { %1476 = vmatpush.msra.mxu2 %v129_v24  ;;  %1477 = vmatpush.msra.mxu3 %v129_v24  ;;  %v44_v24 = vld [vmem:[%s2794_s0 + $0xf0] sm:$0xff] }
  0x20   :  { %343 = vmatpush.msra.mxu0 %v128_v25 }
  0x21   :  { %1478 = vmatpush.msra.mxu2 %v128_v25  ;;  %1479 = vmatpush.msra.mxu3 %v128_v25  ;;  %v98_v25 = vld [vmem:[%s2794_s0 + $0x2a0] sm:$0xff] }
  0x22   :  { %344 = vmatmul.f32.vlgmr.msra.gmra.mxu0 %v14_v26  ;;  %425 = vmatmul.f32.vlgmr.msra.gmra.mxu2 %v68_v27  ;;  %v103_v26 = vld [vmem:[%s2794_s0 + $0x2c8] sm:$0xff] }
  0x23   :  { %509 = vmatmul.f32.vlgmr.msra.gmra.mxu3 %v124_v28  ;;  %1394 = vmatmul.msk.f32.gmra.mxu1 %vm156_vm0, %v21_v29  ;;  %v51_v27 = vld [vmem:[%s2794_s0 + $0x128] sm:$0xff]  ;;  %v46_v29 = vld [vmem:[%s2794_s0 + $0x100] sm:$0xff] }
  0x24   :  { %1481 = vmatpush.msrb.mxu3 %v1526_v1  ;;  %524 = vmatpush.msrb.mxu0 %v1526_v1  ;;  %v39_v1 = vld [vmem:[%s2794_s0 + $0xc8] sm:$0xff] }
  0x26   :  { %1483 = vmatpush.msrb.mxu3 %v1534_v3  ;;  %525 = vmatpush.msrb.mxu0 %v1534_v3  ;;  %v88_v3 = vld [vmem:[%s2794_s0 + $0x250] sm:$0xff] }
  0x28   :  { %1485 = vmatpush.msrb.mxu3 %v1543_v5  ;;  %526 = vmatpush.msrb.mxu0 %v1543_v5  ;;  %v41_v5 = vld [vmem:[%s2794_s0 + $0xd8] sm:$0xff] }
  0x2a   :  { %1487 = vmatpush.msrb.mxu3 %v1552_v7  ;;  %347 = vmatmul.f32.gmra.mxu0 %v16_v30 }
  0x2b   :  { %428 = vmatmul.f32.gmra.mxu2 %v70_v31  ;;  %512 = vmatmul.f32.gmra.mxu3 %v126_v32  ;;  %v100_v31 = vld [vmem:[%s2794_s0 + $0x2b0] sm:$0xff]  ;;  %v105_v32 = vld [vmem:[%s2794_s0 + $0x2d8] sm:$0xff] }
  0x2c   :  { %1395 = vmatmul.msk.f32.gmra.mxu1 %vm156_vm0, %v23_v33  ;;  %1489 = vmatpush.msrb.mxu3 %v1561_v9  ;;  %v53_v33 = vld [vmem:[%s2794_s0 + $0x138] sm:$0xff] }
  0x2d   :  { %527 = vmatpush.msrb.mxu0 %v1552_v7  ;;  %v90_v7 = vld [vmem:[%s2794_s0 + $0x260] sm:$0xff] }
  0x2e   :  { %1491 = vmatpush.msrb.mxu3 %v1570_v11 }
  0x2f   :  { %528 = vmatpush.msrb.mxu0 %v1561_v9  ;;  %v43_v9 = vld [vmem:[%s2794_s0 + $0xe8] sm:$0xff] }
  0x30   :  { %1493 = vmatpush.msrb.mxu3 %v1579_v13 }
  0x31   :  { %529 = vmatpush.msrb.mxu0 %v1570_v11  ;;  %v92_v11 = vld [vmem:[%s2794_s0 + $0x270] sm:$0xff] }
  0x32   :  { %1495 = vmatpush.msrb.mxu3 %v1588_v15  ;;  %350 = vmatmul.f32.gmra.mxu0 %v18_v34 }
  0x33   :  { %431 = vmatmul.f32.gmra.mxu2 %v72_v35  ;;  %1422 = vmatmul.msk.f32.vlgmr.msrb.gmra.mxu3 %vm156_vm0, %v77_v36 }
  0x34   :  { %1396 = vmatmul.msk.f32.gmra.mxu1 %vm156_vm0, %v25_v37  ;;  %530 = vmatpush.msrb.mxu0 %v1579_v13  ;;  %v45_v13 = vld [vmem:[%s2794_s0 + $0xf8] sm:$0xff]  ;;  %v48_v37 = vld [vmem:[%s2794_s0 + $0x110] sm:$0xff] }
  0x36   :  { %531 = vmatpush.msrb.mxu0 %v1588_v15  ;;  %v94_v15 = vld [vmem:[%s2794_s0 + $0x280] sm:$0xff] }
  0x3a   :  { %353 = vmatmul.f32.gmra.mxu0 %v20_v38  ;;  %v102_v38 = vld [vmem:[%s2794_s0 + $0x2c0] sm:$0xff] }
  0x3b   :  { %434 = vmatmul.f32.gmra.mxu2 %v74_v39  ;;  %1423 = vmatmul.msk.f32.gmra.mxu3 %vm156_vm0, %v79_v40  ;;  %v107_v39 = vld [vmem:[%s2794_s0 + $0x2e8] sm:$0xff] }
  0x3c   :  { %1397 = vmatmul.msk.f32.gmra.mxu1 %vm156_vm0, %v27_v41  ;;  %v55_v41 = vld [vmem:[%s2794_s0 + $0x148] sm:$0xff] }
  0x42   :  { %356 = vmatmul.f32.gmra.mxu0 %v22_v42  ;;  %v1898_v42 = vld [vmem:[%s2795_s2] ss:$0 sm:$0xff] }
  0x43   :  { %437 = vmatmul.f32.gmra.mxu2 %v76_v43  ;;  %1424 = vmatmul.msk.f32.gmra.mxu3 %vm156_vm0, %v81_v44 }
  0x44   :  { %1398 = vmatmul.msk.f32.gmra.mxu1 %vm156_vm0, %v29_v45 }
  0x4a   :  { %359 = vmatmul.f32.gmra.mxu0 %v24_v46 }
  0x4b   :  { %440 = vmatmul.f32.gmra.mxu2 %v78_v47  ;;  %1425 = vmatmul.msk.f32.gmra.mxu3 %vm156_vm0, %v83_v48  ;;  %v50_v47 = vld [vmem:[%s2794_s0 + $0x120] sm:$0xff] }
  0x4c   :  { %1399 = vmatmul.msk.f32.gmra.mxu1 %vm156_vm0, %v31_v49  ;;  %v104_v49 = vld [vmem:[%s2794_s0 + $0x2d0] sm:$0xff] }
  0x52   :  { %362 = vmatmul.f32.gmra.mxu0 %v26_v50  ;;  %v109_v50 = vld [vmem:[%s2794_s0 + $0x2f8] sm:$0xff] }
  0x53   :  { %443 = vmatmul.f32.gmra.mxu2 %v80_v51  ;;  %1426 = vmatmul.msk.f32.gmra.mxu3 %vm156_vm0, %v85_v52  ;;  %v57_v52 = vld [vmem:[%s2794_s0 + $0x158] sm:$0xff] }
  0x54   :  { %1400 = vmatmul.msk.f32.gmra.mxu1 %vm156_vm0, %v33_v53 }
  0x5a   :  { %365 = vmatmul.f32.gmra.mxu0 %v28_v54 }
  0x5b   :  { %446 = vmatmul.f32.gmra.mxu2 %v82_v55  ;;  %1427 = vmatmul.msk.f32.gmra.mxu3 %vm156_vm0, %v87_v56 }
  0x5c   :  { %1401 = vmatmul.msk.f32.gmra.mxu1 %vm156_vm0, %v35_v57 }
  0x62   :  { %368 = vmatmul.f32.gmra.mxu0 %v30_v58 }
  0x63   :  { %449 = vmatmul.f32.gmra.mxu2 %v84_v59  ;;  %1428 = vmatmul.msk.f32.gmra.mxu3 %vm156_vm0, %v89_v60 }
  0x64   :  { %1402 = vmatmul.msk.f32.gmra.mxu1 %vm156_vm0, %v37_v61  ;;  %v52_v61 = vld [vmem:[%s2794_s0 + $0x130] sm:$0xff] }
  0x6a   :  { %371 = vmatmul.f32.gmra.mxu0 %v32_v62 }
  0x6b   :  { %452 = vmatmul.f32.gmra.mxu2 %v86_v63  ;;  %1429 = vmatmul.msk.f32.gmra.mxu3 %vm156_vm0, %v91_v0  ;;  %v106_v0 = vld [vmem:[%s2794_s0 + $0x2e0] sm:$0xff] }
  0x6c   :  { %1403 = vmatmul.msk.f32.gmra.mxu1 %vm156_vm0, %v39_v1  ;;  %v111_v1 = vld [vmem:[%s2794_s0 + $0x308] sm:$0xff] }
  0x72   :  { %374 = vmatmul.f32.gmra.mxu0 %v34_v2 }
  0x73   :  { %455 = vmatmul.f32.gmra.mxu2 %v88_v3  ;;  %1430 = vmatmul.msk.f32.gmra.mxu3 %vm156_vm0, %v93_v4  ;;  %v59_v3 = vld [vmem:[%s2794_s0 + $0x168] sm:$0xff] }
  0x74   :  { %1404 = vmatmul.msk.f32.gmra.mxu1 %vm156_vm0, %v41_v5 }
  0x7a   :  { %377 = vmatmul.f32.gmra.mxu0 %v36_v6 }
  0x7b   :  { %458 = vmatmul.f32.gmra.mxu2 %v90_v7  ;;  %1431 = vmatmul.msk.f32.gmra.mxu3 %vm156_vm0, %v95_v8 }
  0x7c   :  { %1405 = vmatmul.msk.f32.gmra.mxu1 %vm156_vm0, %v43_v9 }
  0x82   :  { %380 = vmatmul.f32.gmra.mxu0 %v38_v10  ;;  %v54_v10 = vld [vmem:[%s2794_s0 + $0x140] sm:$0xff] }
  0x83   :  { %461 = vmatmul.f32.gmra.mxu2 %v92_v11  ;;  %1432 = vmatmul.msk.f32.gmra.mxu3 %vm156_vm0, %v97_v12 }
  0x84   :  { %1406 = vmatmul.msk.f32.gmra.mxu1 %vm156_vm0, %v45_v13  ;;  %v108_v13 = vld [vmem:[%s2794_s0 + $0x2f0] sm:$0xff] }
  0x8a   :  { %383 = vmatmul.f32.gmra.mxu0 %v40_v14  ;;  %v113_v14 = vld [vmem:[%s2794_s0 + $0x318] sm:$0xff] }
  0x8b   :  { %464 = vmatmul.f32.gmra.mxu2 %v94_v15  ;;  %1433 = vmatmul.msk.f32.gmra.mxu3 %vm156_vm0, %v99_v16 }
  0x8c   :  { %1407 = vmatmul.msk.f32.gmra.mxu1 %vm156_vm0, %v47_v17  ;;  %v61_v17 = vld [vmem:[%s2794_s0 + $0x178] sm:$0xff] }
  0x8f   :  { %v536_v18 = vpop.f32.mrf.mxu1 }
  0x92   :  { %386 = vmatmul.f32.gmra.mxu0 %v42_v19 }
  0x93   :  { %467 = vmatmul.f32.gmra.mxu2 %v96_v20  ;;  %1434 = vmatmul.msk.f32.gmra.mxu3 %vm156_vm0, %v101_v21 }
  0x94   :  { %1408 = vmatmul.msk.f32.gmra.mxu1 %vm156_vm0, %v49_v22 }
  0x97   :  { %v539_v23 = vpop.f32.mrf.mxu1 }
  0x9a   :  { %389 = vmatmul.f32.gmra.mxu0 %v44_v24 }
  0x9b   :  { %470 = vmatmul.f32.gmra.mxu2 %v98_v25  ;;  %1435 = vmatmul.msk.f32.gmra.mxu3 %vm156_vm0, %v103_v26 }
  0x9c   :  { %1409 = vmatmul.msk.f32.gmra.mxu1 %vm156_vm0, %v51_v27  ;;  %v56_v27 = vld [vmem:[%s2794_s0 + $0x150] sm:$0xff] }
  0x9f   :  { %v1862_v28 = vpop.f32.mrf.mxu0 }
  0xa0   :  { %v542_v30 = vpop.f32.mrf.mxu1 }
  0xa2   :  { %392 = vmatmul.f32.gmra.mxu0 %v46_v29 }
  0xa3   :  { %473 = vmatmul.f32.gmra.mxu2 %v100_v31  ;;  %1436 = vmatmul.msk.f32.gmra.mxu3 %vm156_vm0, %v105_v32  ;;  %v110_v32 = vld [vmem:[%s2794_s0 + $0x300] sm:$0xff] }
  0xa4   :  { %1410 = vmatmul.msk.f32.gmra.mxu1 %vm156_vm0, %v53_v33  ;;  %v115_v33 = vld [vmem:[%s2794_s0 + $0x328] sm:$0xff] }
  0xa5   :  { %v1878_v34 = vpop.f32.mrf.mxu2 }
  0xa6   :  { %v1880_v35 = vpop.f32.mrf.mxu3 }
  0xa7   :  { %v348_v36 = vpop.f32.mrf.mxu0 }
  0xa8   :  { %v349_v43 = vadd.f32 %v1898_v42, %v348_v36 }
  0xa9   :  { %v545_v40 = vpop.f32.mrf.mxu1 }
  0xaa   :  { %395 = vmatmul.f32.gmra.mxu0 %v48_v37  ;;  %v537_v53 = vadd.f32 %v536_v18, %v349_v43 }
  0xab   :  { %476 = vmatmul.f32.gmra.mxu2 %v102_v38  ;;  %1437 = vmatmul.msk.f32.gmra.mxu3 %vm156_vm0, %v107_v39  ;;  %v63_v38 = vld [vmem:[%s2794_s0 + $0x188] sm:$0xff] }
  0xac   :  { %1411 = vmatmul.msk.f32.gmra.mxu1 %vm156_vm0, %v55_v41  ;;  %v1923_v56 = vmax.f32 %v537_v53, 0.0 }
  0xae   :  { %v1902_v44 = vpop.f32.mrf.mxu2  ;;  %v1904_v45 = vpop.f32.mrf.mxu3  ;;  %v818_v29 = vrot.slane %v1923_v56, 1 }
  0xaf   :  { %v351_v46 = vpop.f32.mrf.mxu0 }
  0xb0   :  { %v352_v48 = vadd.f32 %v1898_v42, %v351_v46 }
  0xb1   :  { %v1916_v51 = vpop.f32.mrf.mxu1 }
  0xb2   :  { %v540_v54 = vadd.f32 %v539_v23, %v352_v48  ;;  %398 = vmatmul.f32.gmra.mxu0 %v50_v47 }
  0xb3   :  { %479 = vmatmul.f32.gmra.mxu2 %v104_v49  ;;  %1438 = vmatmul.msk.f32.gmra.mxu3 %vm156_vm0, %v109_v50 }
  0xb4   :  { %v706_v55 = vmax.f32 %v540_v54, 0.0  ;;  %1412 = vmatmul.msk.f32.gmra.mxu1 %vm156_vm0, %v57_v52 }
  0xb6   :  { %v820_v57 = vrot.slane %v706_v55, 1  ;;  %v1925_v58 = vpop.f32.mrf.mxu2  ;;  %v1927_v59 = vpop.f32.mrf.mxu3 }
  0xb7   :  { %v354_v60 = vpop.f32.mrf.mxu0 }
  0xb8   :  { %v1046_v62 = vmax.f32 %v1923_v56, %v820_v57  ;;  %v355_v63 = vadd.f32 %v1898_v42, %v354_v60  ;;  %v821_v39 = vsel %vm816_vm1, %v818_v29, %v820_v57 }
  0xb9   :  { %v1940_v2 = vpop.f32.mrf.mxu1  ;;  %v982_v46 = vmax.f32 %v1923_v56, %v821_v39 }
  0xba   :  { %v543_v4 = vadd.f32 %v542_v30, %v355_v63  ;;  %401 = vmatmul.f32.gmra.mxu0 %v52_v61  ;;  %v1107_v19 = vrot.slane %v1046_v62, 7  ;;  %v112_v61 = vld [vmem:[%s2794_s0 + $0x310] sm:$0xff]  ;;  %v117_v62 = vld [vmem:[%s2794_s0 + $0x338] sm:$0xff] }
  0xbb   :  { %482 = vmatmul.f32.gmra.mxu2 %v106_v0  ;;  %1439 = vmatmul.msk.f32.gmra.mxu3 %vm156_vm0, %v111_v1 }
  0xbc   :  { %v707_v5 = vmax.f32 %v543_v4, 0.0  ;;  %1413 = vmatmul.msk.f32.gmra.mxu1 %vm156_vm0, %v59_v3  ;;  %v65_v4 = vld [vmem:[%s2794_s0 + $0x198] sm:$0xff] }
  0xbe   :  { %v822_v6 = vrot.slane %v707_v5, 1  ;;  %v1947_v7 = vpop.f32.mrf.mxu2  ;;  %v629_v8 = vpop.f32.mrf.mxu3 }
  0xbf   :  { %v357_v9 = vpop.f32.mrf.mxu0 }
  0xc0   :  { %v823_v11 = vsel %vm816_vm1, %v820_v57, %v822_v6  ;;  %v358_v12 = vadd.f32 %v1898_v42, %v357_v9 }
  0xc1   :  { %v1960_v15 = vmax.f32 %v706_v55, %v823_v11  ;;  %v1962_v16 = vpop.f32.mrf.mxu1  ;;  %v58_v55 = vld [vmem:[%s2794_s0 + $0x160] sm:$0xff] }
  0xc2   :  { %v546_v18 = vadd.f32 %v545_v40, %v358_v12  ;;  %404 = vmatmul.f32.gmra.mxu0 %v54_v10 }
  0xc3   :  { %485 = vmatmul.f32.gmra.mxu2 %v108_v13  ;;  %1440 = vmatmul.msk.f32.gmra.mxu3 %vm156_vm0, %v113_v14  ;;  %v1108_v20 = vrot.slane %v1960_v15, 7 }
  0xc4   :  { %v708_v21 = vmax.f32 %v546_v18, 0.0  ;;  %1414 = vmatmul.msk.f32.gmra.mxu1 %vm156_vm0, %v61_v17 }
  0xc5   :  { %v1971_v22 = vsel %vm1106_vm2, %v1107_v19, %v1108_v20  ;;  %v60_v19 = vld [vmem:[%s2794_s0 + $0x170] sm:$0xff] }
  0xc6   :  { %v824_v23 = vrot.slane %v708_v21, 1  ;;  %v438_v24 = vpop.f32.mrf.mxu2  ;;  %v1973_v25 = vpop.f32.mrf.mxu3 }
  0xc7   :  { %v360_v26 = vpop.f32.mrf.mxu0  ;;  %v439_v47 = vadd.f32 %v1898_v42, %v438_v24 }
  0xc8   :  { %v825_v30 = vsel %vm816_vm1, %v822_v6, %v824_v23  ;;  %v361_v31 = vadd.f32 %v1898_v42, %v360_v26 }
  0xc9   :  { %v1987_v36 = vmax.f32 %v707_v5, %v825_v30  ;;  %v1989_v37 = vpop.f32.mrf.mxu1  ;;  %v627_v63 = vadd.f32 %v1927_v59, %v439_v47 }
  0xca   :  { %v549_v40 = vadd.f32 %v1916_v51, %v361_v31  ;;  %407 = vmatmul.f32.gmra.mxu0 %v56_v27  ;;  %v67_v31 = vld [vmem:[%s2794_s0 + $0x1a8] sm:$0xff] }
  0xcb   :  { %v1110_v41 = vrot.slane %v1987_v36, 7  ;;  %488 = vmatmul.f32.gmra.mxu2 %v110_v32  ;;  %1441 = vmatmul.msk.f32.gmra.mxu3 %vm156_vm0, %v115_v33  ;;  %v735_v59 = vmax.f32 %v627_v63, 0.0 }
  0xcc   :  { %v709_v43 = vmax.f32 %v549_v40, 0.0  ;;  %1415 = vmatmul.msk.f32.gmra.mxu1 %vm156_vm0, %v63_v38 }
  0xcd   :  { %v1111_v48 = vsel %vm1106_vm2, %v1108_v20, %v1110_v41  ;;  %v2054_v24 = vrot.slane %v735_v59, 1 }
  0xce   :  { %v826_v49 = vrot.slane %v709_v43, 1  ;;  %v441_v50 = vpop.f32.mrf.mxu2  ;;  %v2004_v52 = vpop.f32.mrf.mxu3  ;;  %v1274_v51 = vmax.f32 %v982_v46, %v1111_v48 }
  0xcf   :  { %v442_v53 = vadd.f32 %v1898_v42, %v441_v50  ;;  %v363_v54 = vpop.f32.mrf.mxu0 }
  0xd0   :  { %v827_v57 = vsel %vm816_vm1, %v824_v23, %v826_v49  ;;  %v364_v60 = vadd.f32 %v1898_v42, %v363_v54  ;;  %1330 = vst.msk [vmem:[%s2796_s3 + $0x8] sm:$0xff] %vm1328_vm3, %v1274_v51  ;;  %v119_v23 = vld [vmem:[%s2794_s0 + $0x348] sm:$0xff] }
  0xd1   :  { %v2023_v0 = vmax.f32 %v708_v21, %v827_v57  ;;  %v630_v1 = vadd.f32 %v629_v8, %v442_v53  ;;  %v2025_v3 = vpop.f32.mrf.mxu1  ;;  %v114_v21 = vld [vmem:[%s2794_s0 + $0x320] sm:$0xff]  ;;  %v116_v57 = vld [vmem:[%s2794_s0 + $0x330] sm:$0xff] }
  0xd2   :  { %v552_v5 = vadd.f32 %v1940_v2, %v364_v60  ;;  %410 = vmatmul.f32.gmra.mxu0 %v58_v55  ;;  %v62_v53 = vld [vmem:[%s2794_s0 + $0x180] sm:$0xff]  ;;  %v121_v60 = vld [vmem:[%s2794_s0 + $0x358] sm:$0xff] }
  0xd3   :  { %v1112_v6 = vrot.slane %v2023_v0, 7  ;;  %v736_v9 = vmax.f32 %v630_v1, 0.0  ;;  %491 = vmatmul.f32.gmra.mxu2 %v112_v61  ;;  %1442 = vmatmul.msk.f32.gmra.mxu3 %vm156_vm0, %v117_v62  ;;  %v69_v1 = vld [vmem:[%s2794_s0 + $0x1b8] sm:$0xff] }
  0xd4   :  { %v710_v10 = vmax.f32 %v552_v5, 0.0  ;;  %1416 = vmatmul.msk.f32.gmra.mxu1 %vm156_vm0, %v65_v4 }
  0xd5   :  { %v1113_v8 = vsel %vm1106_vm2, %v1110_v41, %v1112_v6  ;;  %v880_v2 = vrot.slane %v736_v9, 1 }
  0xd6   :  { %v1275_v11 = vmax.f32 %v1960_v15, %v1113_v8  ;;  %v828_v12 = vrot.slane %v710_v10, 1  ;;  %v444_v13 = vpop.f32.mrf.mxu2  ;;  %v2036_v14 = vpop.f32.mrf.mxu3 }
  0xd7   :  { %v445_v17 = vadd.f32 %v1898_v42, %v444_v13  ;;  %v366_v18 = vpop.f32.mrf.mxu0  ;;  %v881_v33 = vsel %vm816_vm1, %v2054_v24, %v880_v2 }
  0xd8   :  { %1331 = vst.msk [vmem:[%s2796_s3 + $0x10] sm:$0xff] %vm1328_vm3, %v1275_v11  ;;  %v829_v20 = vsel %vm816_vm1, %v826_v49, %v828_v12  ;;  %v367_v15 = vadd.f32 %v1898_v42, %v366_v18 }
  0xd9   :  { %v2056_v26 = vmax.f32 %v709_v43, %v829_v20  ;;  %v633_v27 = vadd.f32 %v1973_v25, %v445_v17  ;;  %v2059_v30 = vpop.f32.mrf.mxu1  ;;  %v2071_v43 = vmax.f32 %v735_v59, %v881_v33  ;;  %v64_v20 = vld [vmem:[%s2794_s0 + $0x190] sm:$0xff] }
  0xda   :  { %v555_v32 = vadd.f32 %v1962_v16, %v367_v15  ;;  %413 = vmatmul.f32.gmra.mxu0 %v60_v19 }
  0xdb   :  { %v1114_v38 = vrot.slane %v2056_v26, 7  ;;  %v737_v39 = vmax.f32 %v633_v27, 0.0  ;;  %494 = vmatmul.f32.gmra.mxu2 %v114_v21  ;;  %1443 = vmatmul.msk.f32.gmra.mxu3 %vm156_vm0, %v119_v23  ;;  %v1166_v5 = vrot.slane %v2071_v43, 7  ;;  %v118_v23 = vld [vmem:[%s2794_s0 + $0x340] sm:$0xff]  ;;  %v123_v27 = vld [vmem:[%s2794_s0 + $0x368] sm:$0xff] }
  0xdc   :  { %v711_v40 = vmax.f32 %v555_v32, 0.0  ;;  %1417 = vmatmul.msk.f32.gmra.mxu1 %vm156_vm0, %v67_v31 }
  0xdd   :  { %v1115_v25 = vsel %vm1106_vm2, %v1112_v6, %v1114_v38  ;;  %v882_v41 = vrot.slane %v737_v39, 1 }
  0xde   :  { %v1276_v16 = vmax.f32 %v1987_v36, %v1115_v25  ;;  %v830_v46 = vrot.slane %v711_v40, 1  ;;  %v447_v47 = vpop.f32.mrf.mxu2  ;;  %v2074_v48 = vpop.f32.mrf.mxu3 }
  0xdf   :  { %v883_v49 = vsel %vm816_vm1, %v880_v2, %v882_v41  ;;  %v448_v50 = vadd.f32 %v1898_v42, %v447_v47  ;;  %v369_v51 = vpop.f32.mrf.mxu0 }
  0xe0   :  { %1332 = vst.msk [vmem:[%s2796_s3 + $0x18] sm:$0xff] %vm1328_vm3, %v1276_v16  ;;  %v2085_v54 = vmax.f32 %v736_v9, %v883_v49  ;;  %v831_v36 = vsel %vm816_vm1, %v828_v12, %v830_v46  ;;  %v370_v55 = vadd.f32 %v1898_v42, %v369_v51 }
  0xe1   :  { %v2095_v61 = vmax.f32 %v710_v10, %v831_v36  ;;  %v636_v62 = vadd.f32 %v2004_v52, %v448_v50  ;;  %v2098_v63 = vpop.f32.mrf.mxu1 }
  0xe2   :  { %v558_v4 = vadd.f32 %v1989_v37, %v370_v55  ;;  %416 = vmatmul.f32.gmra.mxu0 %v62_v53  ;;  %v1168_v6 = vrot.slane %v2085_v54, 7 }
  0xe3   :  { %v1116_v9 = vrot.slane %v2095_v61, 7  ;;  %v738_v59 = vmax.f32 %v636_v62, 0.0  ;;  %497 = vmatmul.f32.gmra.mxu2 %v116_v57  ;;  %1444 = vmatmul.msk.f32.gmra.mxu3 %vm156_vm0, %v121_v60  ;;  %v66_v60 = vld [vmem:[%s2794_s0 + $0x1a0] sm:$0xff] }
  0xe4   :  { %v712_v52 = vmax.f32 %v558_v4, 0.0  ;;  %1418 = vmatmul.msk.f32.gmra.mxu1 %vm156_vm0, %v69_v1  ;;  %v2112_v10 = vsel %vm1106_vm2, %v1166_v5, %v1168_v6  ;;  %v120_v4 = vld [vmem:[%s2794_s0 + $0x350] sm:$0xff] }
  0xe5   :  { %v1117_v37 = vsel %vm1106_vm2, %v1114_v38, %v1116_v9  ;;  %v884_v8 = vrot.slane %v738_v59, 1  ;;  %v71_v38 = vld [vmem:[%s2794_s0 + $0x1c8] sm:$0xff] }
  0xe6   :  { %v1277_v11 = vmax.f32 %v2023_v0, %v1117_v37  ;;  %v832_v12 = vrot.slane %v712_v52, 1  ;;  %v450_v13 = vpop.f32.mrf.mxu2  ;;  %v2116_v2 = vpop.f32.mrf.mxu3 }
  0xe7   :  { %v885_v17 = vsel %vm816_vm1, %v882_v41, %v884_v8  ;;  %v451_v18 = vadd.f32 %v1898_v42, %v450_v13  ;;  %v372_v19 = vpop.f32.mrf.mxu0 }
  0xe8   :  { %1333 = vst.msk [vmem:[%s2796_s3 + $0x20] sm:$0xff] %vm1328_vm3, %v1277_v11  ;;  %v2127_v15 = vmax.f32 %v737_v39, %v885_v17  ;;  %v833_v0 = vsel %vm816_vm1, %v830_v46, %v832_v12  ;;  %v373_v21 = vadd.f32 %v1898_v42, %v372_v19 }
  0xe9   :  { %v2137_v31 = vmax.f32 %v711_v40, %v833_v0  ;;  %v639_v32 = vadd.f32 %v2036_v14, %v451_v18  ;;  %v2140_v33 = vpop.f32.mrf.mxu1 }
  0xea   :  { %v1170_v39 = vrot.slane %v2127_v15, 7  ;;  %v561_v25 = vadd.f32 %v2025_v3, %v373_v21  ;;  %419 = vmatmul.f32.gmra.mxu0 %v64_v20 }
  0xeb   :  { %v1118_v41 = vrot.slane %v2137_v31, 7  ;;  %v739_v16 = vmax.f32 %v639_v32, 0.0  ;;  %500 = vmatmul.f32.gmra.mxu2 %v118_v23  ;;  %1445 = vmatmul.msk.f32.gmra.mxu3 %vm156_vm0, %v123_v27 }
  0xec   :  { %v713_v40 = vmax.f32 %v561_v25, 0.0  ;;  %1419 = vmatmul.msk.f32.gmra.mxu1 %vm156_vm0, %v71_v38  ;;  %v1171_v14 = vsel %vm1106_vm2, %v1168_v6, %v1170_v39  ;;  %v125_v6 = vld [vmem:[%s2794_s0 + $0x378] sm:$0xff] }
  0xed   :  { %v1119_v46 = vsel %vm1106_vm2, %v1116_v9, %v1118_v41  ;;  %v886_v47 = vrot.slane %v739_v16, 1  ;;  %v1304_v49 = vmax.f32 %v2071_v43, %v1171_v14  ;;  %v127_v14 = vld [vmem:[%s2794_s0 + $0x388] sm:$0x3] }
  0xee   :  { %v1278_v50 = vmax.f32 %v2056_v26, %v1119_v46  ;;  %v834_v3 = vrot.slane %v713_v40, 1  ;;  %v453_v51 = vpop.f32.mrf.mxu2  ;;  %v2154_v53 = vpop.f32.mrf.mxu3 }
  0xef   :  { %v887_v36 = vsel %vm816_vm1, %v884_v8, %v886_v47  ;;  %v454_v55 = vadd.f32 %v1898_v42, %v453_v51  ;;  %v375_v57 = vpop.f32.mrf.mxu0  ;;  %1360 = vst.msk [vmem:[%s2796_s3 + $0xf8] sm:$0xff] %vm1328_vm3, %v1304_v49 }
  0xf0   :  { %1334 = vst.msk [vmem:[%s2796_s3 + $0x28] sm:$0xff] %vm1328_vm3, %v1278_v50  ;;  %v2169_v26 = vmax.f32 %v738_v59, %v887_v36  ;;  %v835_v62 = vsel %vm816_vm1, %v832_v12, %v834_v3  ;;  %v376_v1 = vadd.f32 %v1898_v42, %v375_v57  ;;  %v73_v59 = vld [vmem:[%s2794_s0 + $0x1d8] sm:$0xff] }
  0xf1   :  { %v2179_v9 = vmax.f32 %v712_v52, %v835_v62  ;;  %v642_v37 = vadd.f32 %v2074_v48, %v454_v55  ;;  %v2182_v8 = vpop.f32.mrf.mxu1 }
  0xf2   :  { %v1172_v11 = vrot.slane %v2169_v26, 7  ;;  %v564_v12 = vadd.f32 %v2059_v30, %v376_v1  ;;  %422 = vmatmul.f32.gmra.mxu0 %v66_v60 }
  0xf3   :  { %v1120_v13 = vrot.slane %v2179_v9, 7  ;;  %v740_v17 = vmax.f32 %v642_v37, 0.0  ;;  %503 = vmatmul.f32.gmra.mxu2 %v120_v4  ;;  %1446 = vmatmul.msk.f32.gmra.mxu3 %vm156_vm0, %v125_v6 }
  0xf4   :  { %v1173_v52 = vsel %vm1106_vm2, %v1170_v39, %v1172_v11  ;;  %v714_v48 = vmax.f32 %v564_v12, 0.0  ;;  %1420 = vmatmul.msk.f32.gmra.mxu1 %vm156_vm0, %v73_v59 }
  0xf5   :  { %v1305_v18 = vmax.f32 %v2085_v54, %v1173_v52  ;;  %v1121_v19 = vsel %vm1106_vm2, %v1118_v41, %v1120_v13  ;;  %v888_v20 = vrot.slane %v740_v17, 1  ;;  %v15_v54 = vld [vmem:[%s2794_s0 + $0x8] sm:$0xff]  ;;  %v122_v41 = vld [vmem:[%s2794_s0 + $0x360] sm:$0xff] }
  0xf6   :  { %v1279_v0 = vmax.f32 %v2095_v61, %v1121_v19  ;;  %v836_v30 = vrot.slane %v714_v48, 1  ;;  %v456_v21 = vpop.f32.mrf.mxu2  ;;  %v2196_v23 = vpop.f32.mrf.mxu3 }
  0xf7   :  { %1361 = vst.msk [vmem:[%s2796_s3 + $0x100] sm:$0xff] %vm1328_vm3, %v1305_v18  ;;  %v889_v27 = vsel %vm816_vm1, %v886_v47, %v888_v20  ;;  %v457_v32 = vadd.f32 %v1898_v42, %v456_v21  ;;  %v378_v38 = vpop.f32.mrf.mxu0 }
  0xf8   :  { %1335 = vst.msk [vmem:[%s2796_s3 + $0x30] sm:$0xff] %vm1328_vm3, %v1279_v0  ;;  %v2211_v61 = vmax.f32 %v739_v16, %v889_v27  ;;  %v837_v39 = vsel %vm816_vm1, %v834_v3, %v836_v30  ;;  %v379_v25 = vadd.f32 %v1898_v42, %v378_v38  ;;  %v75_v16 = vld [vmem:[%s2794_s0 + $0x1e8] sm:$0xff] }
  0xf9   :  { %v2221_v46 = vmax.f32 %v713_v40, %v837_v39  ;;  %v645_v47 = vadd.f32 %v2116_v2, %v457_v32  ;;  %v2224_v49 = vpop.f32.mrf.mxu1 }
  0xfa   :  { %v1174_v50 = vrot.slane %v2211_v61, 7  ;;  %v567_v3 = vadd.f32 %v2098_v63, %v379_v25  ;;  %1391 = vmatmul.msk.f32.vlgmr.msrb.gmra.mxu0 %vm156_vm0, %v15_v54 }
  0xfb   :  { %v1122_v51 = vrot.slane %v2221_v46, 7  ;;  %v741_v36 = vmax.f32 %v645_v47, 0.0  ;;  %506 = vmatmul.f32.gmra.mxu2 %v122_v41  ;;  %1447 = vmatmul.msk.f32.gmra.mxu3 %vm156_vm0, %v127_v14 }
  0xfc   :  { %v1175_v2 = vsel %vm1106_vm2, %v1172_v11, %v1174_v50  ;;  %v715_v40 = vmax.f32 %v567_v3, 0.0  ;;  %1421 = vmatmul.msk.f32.gmra.mxu1 %vm156_vm0, %v75_v16 }
  0xfd   :  { %v1306_v55 = vmax.f32 %v2127_v15, %v1175_v2  ;;  %v1123_v57 = vsel %vm1106_vm2, %v1120_v13, %v1122_v51  ;;  %v890_v60 = vrot.slane %v741_v36, 1 }
  0xfe   :  { %v1280_v63 = vmax.f32 %v2137_v31, %v1123_v57  ;;  %v838_v62 = vrot.slane %v715_v40, 1  ;;  %v459_v1 = vpop.f32.mrf.mxu2  ;;  %v653_v4 = vpop.f32.mrf.mxu3 }
  0xff   :  { %1362 = vst.msk [vmem:[%s2796_s3 + $0x108] sm:$0xff] %vm1328_vm3, %v1306_v55  ;;  %v891_v6 = vsel %vm816_vm1, %v888_v20, %v890_v60  ;;  %v460_v37 = vadd.f32 %v1898_v42, %v459_v1  ;;  %v381_v59 = vpop.f32.mrf.mxu0 }
 0x100   :  { %1336 = vst.msk [vmem:[%s2796_s3 + $0x38] sm:$0xff] %vm1328_vm3, %v1280_v63  ;;  %v2249_v15 = vmax.f32 %v740_v17, %v891_v6  ;;  %v839_v31 = vsel %vm816_vm1, %v836_v30, %v838_v62  ;;  %v382_v11 = vadd.f32 %v1898_v42, %v381_v59 }
 0x101   :  { %v2253_v12 = vmax.f32 %v714_v48, %v839_v31  ;;  %v648_v13 = vadd.f32 %v2154_v53, %v460_v37  ;;  %v2256_v52 = vpop.f32.mrf.mxu1 }
 0x102   :  { %v1176_v18 = vrot.slane %v2249_v15, 7  ;;  %v570_v19 = vadd.f32 %v2140_v33, %v382_v11 }
 0x103   :  { %v1124_v20 = vrot.slane %v2253_v12, 7  ;;  %v742_v0 = vmax.f32 %v648_v13, 0.0 }
 0x104   :  { %v1177_v17 = vsel %vm1106_vm2, %v1174_v50, %v1176_v18  ;;  %v716_v21 = vmax.f32 %v570_v19, 0.0 }
 0x105   :  { %v1307_v30 = vmax.f32 %v2169_v26, %v1177_v17  ;;  %v1125_v27 = vsel %vm1106_vm2, %v1122_v51, %v1124_v20  ;;  %v892_v48 = vrot.slane %v742_v0, 1 }
 0x106   :  { %v1281_v32 = vmax.f32 %v2179_v9, %v1125_v27  ;;  %v840_v53 = vrot.slane %v716_v21, 1  ;;  %v462_v38 = vpop.f32.mrf.mxu2  ;;  %v656_v54 = vpop.f32.mrf.mxu3 }
 0x107   :  { %1363 = vst.msk [vmem:[%s2796_s3 + $0x110] sm:$0xff] %vm1328_vm3, %v1307_v30  ;;  %v893_v33 = vsel %vm816_vm1, %v890_v60, %v892_v48  ;;  %v463_v39 = vadd.f32 %v1898_v42, %v462_v38  ;;  %v384_v25 = vpop.f32.mrf.mxu0 }
 0x108   :  { %1337 = vst.msk [vmem:[%s2796_s3 + $0x40] sm:$0xff] %vm1328_vm3, %v1281_v32  ;;  %v2275_v26 = vmax.f32 %v741_v36, %v893_v33  ;;  %v841_v9 = vsel %vm816_vm1, %v838_v62, %v840_v53  ;;  %v385_v41 = vadd.f32 %v1898_v42, %v384_v25 }
 0x109   :  { %v2279_v14 = vmax.f32 %v715_v40, %v841_v9  ;;  %v651_v47 = vadd.f32 %v2196_v23, %v463_v39  ;;  %v2282_v16 = vpop.f32.mrf.mxu1 }
 0x10a   :  { %v1178_v50 = vrot.slane %v2275_v26, 7  ;;  %v573_v3 = vadd.f32 %v2182_v8, %v385_v41 }
 0x10b   :  { %v1126_v51 = vrot.slane %v2279_v14, 7  ;;  %v743_v2 = vmax.f32 %v651_v47, 0.0 }
 0x10c   :  { %v1179_v36 = vsel %vm1106_vm2, %v1176_v18, %v1178_v50  ;;  %v717_v55 = vmax.f32 %v573_v3, 0.0 }
 0x10d   :  { %v1308_v57 = vmax.f32 %v2211_v61, %v1179_v36  ;;  %v1127_v60 = vsel %vm1106_vm2, %v1124_v20, %v1126_v51  ;;  %v894_v40 = vrot.slane %v743_v2, 1 }
 0x10e   :  { %v1282_v63 = vmax.f32 %v2221_v46, %v1127_v60  ;;  %v842_v23 = vrot.slane %v717_v55, 1  ;;  %v465_v62 = vpop.f32.mrf.mxu2  ;;  %v659_v1 = vpop.f32.mrf.mxu3 }
 0x10f   :  { %1364 = vst.msk [vmem:[%s2796_s3 + $0x118] sm:$0xff] %vm1328_vm3, %v1308_v57  ;;  %v895_v8 = vsel %vm816_vm1, %v892_v48, %v894_v40  ;;  %v466_v6 = vadd.f32 %v1898_v42, %v465_v62  ;;  %v387_v37 = vpop.f32.mrf.mxu0 }
 0x110   :  { %1338 = vst.msk [vmem:[%s2796_s3 + $0x48] sm:$0xff] %vm1328_vm3, %v1282_v63  ;;  %v2301_v61 = vmax.f32 %v742_v0, %v895_v8  ;;  %v843_v46 = vsel %vm816_vm1, %v840_v53, %v842_v23  ;;  %v388_v59 = vadd.f32 %v1898_v42, %v387_v37 }
 0x111   :  { %v2305_v31 = vmax.f32 %v716_v21, %v843_v46  ;;  %v654_v11 = vadd.f32 %v653_v4, %v466_v6  ;;  %v2307_v13 = vpop.f32.mrf.mxu1 }
 0x112   :  { %v1180_v18 = vrot.slane %v2301_v61, 7  ;;  %v576_v19 = vadd.f32 %v2224_v49, %v388_v59 }
 0x113   :  { %v1128_v20 = vrot.slane %v2305_v31, 7  ;;  %v744_v17 = vmax.f32 %v654_v11, 0.0 }
 0x114   :  { %v1181_v30 = vsel %vm1106_vm2, %v1178_v50, %v1180_v18  ;;  %v718_v0 = vmax.f32 %v576_v19, 0.0 }
 0x115   :  { %v1309_v27 = vmax.f32 %v2249_v15, %v1181_v30  ;;  %v1129_v48 = vsel %vm1106_vm2, %v1126_v51, %v1128_v20  ;;  %v896_v32 = vrot.slane %v744_v17, 1 }
 0x116   :  { %v1283_v21 = vmax.f32 %v2253_v12, %v1129_v48  ;;  %v844_v4 = vrot.slane %v718_v0, 1  ;;  %v468_v53 = vpop.f32.mrf.mxu2  ;;  %v662_v38 = vpop.f32.mrf.mxu3 }
 0x117   :  { %1365 = vst.msk [vmem:[%s2796_s3 + $0x120] sm:$0xff] %vm1328_vm3, %v1309_v27  ;;  %v897_v49 = vsel %vm816_vm1, %v894_v40, %v896_v32  ;;  %v469_v33 = vadd.f32 %v1898_v42, %v468_v53  ;;  %v390_v39 = vpop.f32.mrf.mxu0 }
 0x118   :  { %1339 = vst.msk [vmem:[%s2796_s3 + $0x50] sm:$0xff] %vm1328_vm3, %v1283_v21  ;;  %v2326_v15 = vmax.f32 %v743_v2, %v897_v49  ;;  %v845_v12 = vsel %vm816_vm1, %v842_v23, %v844_v4  ;;  %v391_v25 = vadd.f32 %v1898_v42, %v390_v39 }
 0x119   :  { %v2330_v9 = vmax.f32 %v717_v55, %v845_v12  ;;  %v657_v41 = vadd.f32 %v656_v54, %v469_v33  ;;  %v2332_v47 = vpop.f32.mrf.mxu1 }
 0x11a   :  { %v1182_v50 = vrot.slane %v2326_v15, 7  ;;  %v579_v3 = vadd.f32 %v2256_v52, %v391_v25 }
 0x11b   :  { %v1130_v51 = vrot.slane %v2330_v9, 7  ;;  %v745_v36 = vmax.f32 %v657_v41, 0.0 }
 0x11c   :  { %v1183_v57 = vsel %vm1106_vm2, %v1180_v18, %v1182_v50  ;;  %v719_v2 = vmax.f32 %v579_v3, 0.0 }
 0x11d   :  { %v1310_v60 = vmax.f32 %v2275_v26, %v1183_v57  ;;  %v1131_v40 = vsel %vm1106_vm2, %v1128_v20, %v1130_v51  ;;  %v898_v63 = vrot.slane %v745_v36, 1 }
 0x11e   :  { %v1284_v55 = vmax.f32 %v2279_v14, %v1131_v40  ;;  %v846_v54 = vrot.slane %v719_v2, 1  ;;  %v471_v23 = vpop.f32.mrf.mxu2  ;;  %v665_v62 = vpop.f32.mrf.mxu3 }
 0x11f   :  { %1366 = vst.msk [vmem:[%s2796_s3 + $0x128] sm:$0xff] %vm1328_vm3, %v1310_v60  ;;  %v899_v52 = vsel %vm816_vm1, %v896_v32, %v898_v63  ;;  %v472_v8 = vadd.f32 %v1898_v42, %v471_v23  ;;  %v393_v6 = vpop.f32.mrf.mxu0 }
 0x120   :  { %1340 = vst.msk [vmem:[%s2796_s3 + $0x58] sm:$0xff] %vm1328_vm3, %v1284_v55  ;;  %v2351_v26 = vmax.f32 %v744_v17, %v899_v52  ;;  %v847_v14 = vsel %vm816_vm1, %v844_v4, %v846_v54  ;;  %v394_v37 = vadd.f32 %v1898_v42, %v393_v6 }
 0x121   :  { %v2355_v46 = vmax.f32 %v718_v0, %v847_v14  ;;  %v660_v59 = vadd.f32 %v659_v1, %v472_v8  ;;  %v2357_v11 = vpop.f32.mrf.mxu1 }
 0x122   :  { %v1184_v18 = vrot.slane %v2351_v26, 7  ;;  %v582_v19 = vadd.f32 %v2282_v16, %v394_v37 }
 0x123   :  { %v1132_v20 = vrot.slane %v2355_v46, 7  ;;  %v746_v30 = vmax.f32 %v660_v59, 0.0 }
 0x124   :  { %v1185_v27 = vsel %vm1106_vm2, %v1182_v50, %v1184_v18  ;;  %v720_v17 = vmax.f32 %v582_v19, 0.0 }
 0x125   :  { %v1311_v48 = vmax.f32 %v2301_v61, %v1185_v27  ;;  %v1133_v32 = vsel %vm1106_vm2, %v1130_v51, %v1132_v20  ;;  %v900_v21 = vrot.slane %v746_v30, 1 }
 0x126   :  { %v1285_v0 = vmax.f32 %v2305_v31, %v1133_v32  ;;  %v848_v1 = vrot.slane %v720_v17, 1  ;;  %v474_v4 = vpop.f32.mrf.mxu2  ;;  %v668_v53 = vpop.f32.mrf.mxu3 }
 0x127   :  { %1367 = vst.msk [vmem:[%s2796_s3 + $0x130] sm:$0xff] %vm1328_vm3, %v1311_v48  ;;  %v901_v16 = vsel %vm816_vm1, %v898_v63, %v900_v21  ;;  %v475_v49 = vadd.f32 %v1898_v42, %v474_v4  ;;  %v396_v33 = vpop.f32.mrf.mxu0 }
 0x128   :  { %1341 = vst.msk [vmem:[%s2796_s3 + $0x60] sm:$0xff] %vm1328_vm3, %v1285_v0  ;;  %v2376_v61 = vmax.f32 %v745_v36, %v901_v16  ;;  %v849_v31 = vsel %vm816_vm1, %v846_v54, %v848_v1  ;;  %v397_v39 = vadd.f32 %v1898_v42, %v396_v33 }
 0x129   :  { %v2380_v12 = vmax.f32 %v719_v2, %v849_v31  ;;  %v663_v25 = vadd.f32 %v662_v38, %v475_v49  ;;  %v2382_v41 = vpop.f32.mrf.mxu1 }
 0x12a   :  { %v1186_v50 = vrot.slane %v2376_v61, 7  ;;  %v585_v3 = vadd.f32 %v2307_v13, %v397_v39 }
 0x12b   :  { %v1134_v51 = vrot.slane %v2380_v12, 7  ;;  %v747_v57 = vmax.f32 %v663_v25, 0.0 }
 0x12c   :  { %v1187_v60 = vsel %vm1106_vm2, %v1184_v18, %v1186_v50  ;;  %v721_v36 = vmax.f32 %v585_v3, 0.0 }
 0x12d   :  { %v1312_v40 = vmax.f32 %v2326_v15, %v1187_v60  ;;  %v1135_v63 = vsel %vm1106_vm2, %v1132_v20, %v1134_v51  ;;  %v902_v55 = vrot.slane %v747_v57, 1 }
 0x12e   :  { %v1286_v2 = vmax.f32 %v2330_v9, %v1135_v63  ;;  %v850_v38 = vrot.slane %v721_v36, 1  ;;  %v477_v54 = vpop.f32.mrf.mxu2  ;;  %v671_v23 = vpop.f32.mrf.mxu3 }
 0x12f   :  { %1368 = vst.msk [vmem:[%s2796_s3 + $0x138] sm:$0xff] %vm1328_vm3, %v1312_v40  ;;  %v903_v13 = vsel %vm816_vm1, %v900_v21, %v902_v55  ;;  %v478_v52 = vadd.f32 %v1898_v42, %v477_v54  ;;  %v399_v8 = vpop.f32.mrf.mxu0 }
 0x130   :  { %1342 = vst.msk [vmem:[%s2796_s3 + $0x68] sm:$0xff] %vm1328_vm3, %v1286_v2  ;;  %v2401_v15 = vmax.f32 %v746_v30, %v903_v13  ;;  %v851_v9 = vsel %vm816_vm1, %v848_v1, %v850_v38  ;;  %v400_v6 = vadd.f32 %v1898_v42, %v399_v8 }
 0x131   :  { %v2405_v14 = vmax.f32 %v720_v17, %v851_v9  ;;  %v666_v37 = vadd.f32 %v665_v62, %v478_v52  ;;  %v2407_v59 = vpop.f32.mrf.mxu1 }
 0x132   :  { %v1188_v18 = vrot.slane %v2401_v15, 7  ;;  %v588_v19 = vadd.f32 %v2332_v47, %v400_v6 }
 0x133   :  { %v1136_v20 = vrot.slane %v2405_v14, 7  ;;  %v748_v27 = vmax.f32 %v666_v37, 0.0 }
 0x134   :  { %v1189_v48 = vsel %vm1106_vm2, %v1186_v50, %v1188_v18  ;;  %v722_v30 = vmax.f32 %v588_v19, 0.0 }
 0x135   :  { %v1313_v32 = vmax.f32 %v2351_v26, %v1189_v48  ;;  %v1137_v21 = vsel %vm1106_vm2, %v1134_v51, %v1136_v20  ;;  %v904_v0 = vrot.slane %v748_v27, 1 }
 0x136   :  { %v1287_v17 = vmax.f32 %v2355_v46, %v1137_v21  ;;  %v852_v62 = vrot.slane %v722_v30, 1  ;;  %v480_v1 = vpop.f32.mrf.mxu2  ;;  %v674_v4 = vpop.f32.mrf.mxu3 }
 0x137   :  { %1369 = vst.msk [vmem:[%s2796_s3 + $0x140] sm:$0xff] %vm1328_vm3, %v1313_v32  ;;  %v905_v47 = vsel %vm816_vm1, %v902_v55, %v904_v0  ;;  %v481_v16 = vadd.f32 %v1898_v42, %v480_v1  ;;  %v402_v49 = vpop.f32.mrf.mxu0 }
 0x138   :  { %1343 = vst.msk [vmem:[%s2796_s3 + $0x70] sm:$0xff] %vm1328_vm3, %v1287_v17  ;;  %v2426_v26 = vmax.f32 %v747_v57, %v905_v47  ;;  %v853_v46 = vsel %vm816_vm1, %v850_v38, %v852_v62  ;;  %v403_v33 = vadd.f32 %v1898_v42, %v402_v49 }
 0x139   :  { %v2430_v31 = vmax.f32 %v721_v36, %v853_v46  ;;  %v669_v39 = vadd.f32 %v668_v53, %v481_v16  ;;  %v2432_v25 = vpop.f32.mrf.mxu1 }
 0x13a   :  { %v1190_v50 = vrot.slane %v2426_v26, 7  ;;  %v591_v3 = vadd.f32 %v2357_v11, %v403_v33 }
 0x13b   :  { %v1138_v51 = vrot.slane %v2430_v31, 7  ;;  %v749_v60 = vmax.f32 %v669_v39, 0.0 }
 0x13c   :  { %v1191_v40 = vsel %vm1106_vm2, %v1188_v18, %v1190_v50  ;;  %v723_v57 = vmax.f32 %v591_v3, 0.0 }
 0x13d   :  { %v1314_v63 = vmax.f32 %v2376_v61, %v1191_v40  ;;  %v1139_v55 = vsel %vm1106_vm2, %v1136_v20, %v1138_v51  ;;  %v906_v2 = vrot.slane %v749_v60, 1 }
 0x13e   :  { %v1288_v36 = vmax.f32 %v2380_v12, %v1139_v55  ;;  %v854_v53 = vrot.slane %v723_v57, 1  ;;  %v483_v38 = vpop.f32.mrf.mxu2  ;;  %v677_v54 = vpop.f32.mrf.mxu3 }
 0x13f   :  { %1370 = vst.msk [vmem:[%s2796_s3 + $0x148] sm:$0xff] %vm1328_vm3, %v1314_v63  ;;  %v907_v11 = vsel %vm816_vm1, %v904_v0, %v906_v2  ;;  %v484_v13 = vadd.f32 %v1898_v42, %v483_v38  ;;  %v405_v52 = vpop.f32.mrf.mxu0  ;;  %v2499_v38 = vld [vmem:[%s2795_s2] ss:$0 sm:$0xff] }
 0x140   :  { %1344 = vst.msk [vmem:[%s2796_s3 + $0x78] sm:$0xff] %vm1328_vm3, %v1288_v36  ;;  %v2451_v61 = vmax.f32 %v748_v27, %v907_v11  ;;  %v855_v12 = vsel %vm816_vm1, %v852_v62, %v854_v53  ;;  %v406_v8 = vadd.f32 %v1898_v42, %v405_v52 }
 0x141   :  { %v2455_v9 = vmax.f32 %v722_v30, %v855_v12  ;;  %v672_v6 = vadd.f32 %v671_v23, %v484_v13  ;;  %v2457_v37 = vpop.f32.mrf.mxu1 }
 0x142   :  { %v1192_v18 = vrot.slane %v2451_v61, 7  ;;  %v594_v19 = vadd.f32 %v2382_v41, %v406_v8 }
 0x143   :  { %v1140_v20 = vrot.slane %v2455_v9, 7  ;;  %v750_v48 = vmax.f32 %v672_v6, 0.0 }
 0x144   :  { %v1193_v32 = vsel %vm1106_vm2, %v1190_v50, %v1192_v18  ;;  %v724_v27 = vmax.f32 %v594_v19, 0.0 }
 0x145   :  { %v1315_v21 = vmax.f32 %v2401_v15, %v1193_v32  ;;  %v1141_v0 = vsel %vm1106_vm2, %v1138_v51, %v1140_v20  ;;  %v908_v17 = vrot.slane %v750_v48, 1 }
 0x146   :  { %v1289_v30 = vmax.f32 %v2405_v14, %v1141_v0  ;;  %v856_v23 = vrot.slane %v724_v27, 1  ;;  %v486_v62 = vpop.f32.mrf.mxu2  ;;  %v680_v1 = vpop.f32.mrf.mxu3 }
 0x147   :  { %1371 = vst.msk [vmem:[%s2796_s3 + $0x150] sm:$0xff] %vm1328_vm3, %v1315_v21  ;;  %v909_v41 = vsel %vm816_vm1, %v906_v2, %v908_v17  ;;  %v487_v47 = vadd.f32 %v1898_v42, %v486_v62  ;;  %v408_v16 = vpop.f32.mrf.mxu0 }
 0x148   :  { %1345 = vst.msk [vmem:[%s2796_s3 + $0x80] sm:$0xff] %vm1328_vm3, %v1289_v30  ;;  %v2476_v15 = vmax.f32 %v749_v60, %v909_v41  ;;  %v857_v14 = vsel %vm816_vm1, %v854_v53, %v856_v23  ;;  %v409_v49 = vadd.f32 %v1898_v42, %v408_v16 }
 0x149   :  { %v2480_v46 = vmax.f32 %v723_v57, %v857_v14  ;;  %v675_v33 = vadd.f32 %v674_v4, %v487_v47  ;;  %v2482_v39 = vpop.f32.mrf.mxu1 }
 0x14a   :  { %v1194_v50 = vrot.slane %v2476_v15, 7  ;;  %v597_v3 = vadd.f32 %v2407_v59, %v409_v49 }
 0x14b   :  { %v1142_v51 = vrot.slane %v2480_v46, 7  ;;  %v751_v40 = vmax.f32 %v675_v33, 0.0 }
 0x14c   :  { %v1195_v63 = vsel %vm1106_vm2, %v1192_v18, %v1194_v50  ;;  %v725_v60 = vmax.f32 %v597_v3, 0.0 }
 0x14d   :  { %v1316_v55 = vmax.f32 %v2426_v26, %v1195_v63  ;;  %v1143_v2 = vsel %vm1106_vm2, %v1140_v20, %v1142_v51  ;;  %v910_v42 = vrot.slane %v751_v40, 1 }
 0x14e   :  { %v1290_v57 = vmax.f32 %v2430_v31, %v1143_v2  ;;  %v858_v4 = vrot.slane %v725_v60, 1  ;;  %v489_v36 = vpop.f32.mrf.mxu2  ;;  %v683_v53 = vpop.f32.mrf.mxu3 }
 0x14f   :  { %1372 = vst.msk [vmem:[%s2796_s3 + $0x158] sm:$0xff] %vm1328_vm3, %v1316_v55  ;;  %v911_v59 = vsel %vm816_vm1, %v908_v17, %v910_v42  ;;  %v490_v26 = vadd.f32 %v2499_v38, %v489_v36  ;;  %v411_v11 = vpop.f32.mrf.mxu0 }
 0x150   :  { %1346 = vst.msk [vmem:[%s2796_s3 + $0x88] sm:$0xff] %vm1328_vm3, %v1290_v57  ;;  %v2506_v31 = vmax.f32 %v750_v48, %v911_v59  ;;  %v859_v13 = vsel %vm816_vm1, %v856_v23, %v858_v4  ;;  %v412_v52 = vadd.f32 %v2499_v38, %v411_v11 }
 0x151   :  { %v2510_v12 = vmax.f32 %v724_v27, %v859_v13  ;;  %v678_v8 = vadd.f32 %v677_v54, %v490_v26  ;;  %v2512_v6 = vpop.f32.mrf.mxu1 }
 0x152   :  { %v1196_v18 = vrot.slane %v2506_v31, 7  ;;  %v600_v19 = vadd.f32 %v2432_v25, %v412_v52 }
 0x153   :  { %v1144_v20 = vrot.slane %v2510_v12, 7  ;;  %v752_v32 = vmax.f32 %v678_v8, 0.0 }
 0x154   :  { %v1197_v21 = vsel %vm1106_vm2, %v1194_v50, %v1196_v18  ;;  %v726_v48 = vmax.f32 %v600_v19, 0.0 }
 0x155   :  { %v1317_v0 = vmax.f32 %v2451_v61, %v1197_v21  ;;  %v1145_v17 = vsel %vm1106_vm2, %v1142_v51, %v1144_v20  ;;  %v912_v30 = vrot.slane %v752_v32, 1 }
 0x156   :  { %v1291_v27 = vmax.f32 %v2455_v9, %v1145_v17  ;;  %v860_v54 = vrot.slane %v726_v48, 1  ;;  %v492_v23 = vpop.f32.mrf.mxu2  ;;  %v686_v62 = vpop.f32.mrf.mxu3 }
 0x157   :  { %1373 = vst.msk [vmem:[%s2796_s3 + $0x160] sm:$0xff] %vm1328_vm3, %v1317_v0  ;;  %v913_v25 = vsel %vm816_vm1, %v910_v42, %v912_v30  ;;  %v493_v41 = vadd.f32 %v2499_v38, %v492_v23  ;;  %v414_v47 = vpop.f32.mrf.mxu0  ;;  %v427_v0 = vadd.f32 %v2499_v38, %v1878_v34 }
 0x158   :  { %1347 = vst.msk [vmem:[%s2796_s3 + $0x90] sm:$0xff] %vm1328_vm3, %v1291_v27  ;;  %v2531_v61 = vmax.f32 %v751_v40, %v913_v25  ;;  %v861_v9 = vsel %vm816_vm1, %v858_v4, %v860_v54  ;;  %v415_v16 = vadd.f32 %v2499_v38, %v414_v47  ;;  %v430_v47 = vadd.f32 %v2499_v38, %v1902_v44 }
 0x159   :  { %v2535_v14 = vmax.f32 %v725_v60, %v861_v9  ;;  %v681_v49 = vadd.f32 %v680_v1, %v493_v41  ;;  %v2537_v33 = vpop.f32.mrf.mxu1 }
 0x15a   :  { %v1198_v50 = vrot.slane %v2531_v61, 7  ;;  %v603_v3 = vadd.f32 %v2457_v37, %v415_v16 }
 0x15b   :  { %v1146_v51 = vrot.slane %v2535_v14, 7  ;;  %v753_v63 = vmax.f32 %v681_v49, 0.0 }
 0x15c   :  { %v1199_v55 = vsel %vm1106_vm2, %v1196_v18, %v1198_v50  ;;  %v727_v40 = vmax.f32 %v603_v3, 0.0 }
 0x15d   :  { %v1318_v2 = vmax.f32 %v2476_v15, %v1199_v55  ;;  %v1147_v42 = vsel %vm1106_vm2, %v1144_v20, %v1146_v51  ;;  %v914_v57 = vrot.slane %v753_v63, 1 }
 0x15e   :  { %v1292_v60 = vmax.f32 %v2480_v46, %v1147_v42  ;;  %v862_v1 = vrot.slane %v727_v40, 1  ;;  %v495_v4 = vpop.f32.mrf.mxu2  ;;  %v2546_v36 = vpop.f32.mrf.mxu3 }
 0x15f   :  { %1374 = vst.msk [vmem:[%s2796_s3 + $0x168] sm:$0xff] %vm1328_vm3, %v1318_v2  ;;  %v915_v37 = vsel %vm816_vm1, %v912_v30, %v914_v57  ;;  %v496_v59 = vadd.f32 %v2499_v38, %v495_v4  ;;  %v417_v26 = vpop.f32.mrf.mxu0 }
 0x160   :  { %1348 = vst.msk [vmem:[%s2796_s3 + $0x98] sm:$0xff] %vm1328_vm3, %v1292_v60  ;;  %v2558_v15 = vmax.f32 %v752_v32, %v915_v37  ;;  %v863_v46 = vsel %vm816_vm1, %v860_v54, %v862_v1  ;;  %v418_v11 = vadd.f32 %v2499_v38, %v417_v26 }
 0x161   :  { %v2562_v13 = vmax.f32 %v726_v48, %v863_v46  ;;  %v684_v52 = vadd.f32 %v683_v53, %v496_v59  ;;  %v614_v8 = vpop.f32.mrf.mxu1 }
 0x162   :  { %v1200_v18 = vrot.slane %v2558_v15, 7  ;;  %v606_v19 = vadd.f32 %v2482_v39, %v418_v11  ;;  %v615_v23 = vadd.f32 %v614_v8, %v427_v0 }
 0x163   :  { %v1148_v20 = vrot.slane %v2562_v13, 7  ;;  %v754_v21 = vmax.f32 %v684_v52, 0.0  ;;  %v433_v52 = vadd.f32 %v2499_v38, %v1925_v58 }
 0x164   :  { %v1201_v32 = vsel %vm1106_vm2, %v1198_v50, %v1200_v18  ;;  %v728_v17 = vmax.f32 %v606_v19, 0.0  ;;  %v731_v55 = vmax.f32 %v615_v23, 0.0 }
 0x165   :  { %v1319_v30 = vmax.f32 %v2506_v31, %v1201_v32  ;;  %v1149_v48 = vsel %vm1106_vm2, %v1146_v51, %v1148_v20  ;;  %v916_v27 = vrot.slane %v754_v21, 1 }
 0x166   :  { %v1293_v53 = vmax.f32 %v2510_v12, %v1149_v48  ;;  %v864_v54 = vrot.slane %v728_v17, 1  ;;  %v498_v25 = vpop.f32.mrf.mxu2  ;;  %v2573_v39 = vpop.f32.mrf.mxu3  ;;  %v870_v37 = vrot.slane %v731_v55, 1 }
 0x167   :  { %1375 = vst.msk [vmem:[%s2796_s3 + $0x170] sm:$0xff] %vm1328_vm3, %v1319_v30  ;;  %v917_v34 = vsel %vm816_vm1, %v914_v57, %v916_v27  ;;  %v499_v41 = vadd.f32 %v2499_v38, %v498_v25  ;;  %v420_v31 = vpop.f32.mrf.mxu0 }
 0x168   :  { %1349 = vst.msk [vmem:[%s2796_s3 + $0xa0] sm:$0xff] %vm1328_vm3, %v1293_v53  ;;  %v2587_v12 = vmax.f32 %v753_v63, %v917_v34  ;;  %v865_v9 = vsel %vm816_vm1, %v862_v1, %v864_v54  ;;  %v421_v16 = vadd.f32 %v2499_v38, %v420_v31 }
 0x169   :  { %v2591_v49 = vmax.f32 %v727_v40, %v865_v9  ;;  %v2593_v50 = vadd.f32 %v686_v62, %v499_v41  ;;  %v617_v3 = vpop.f32.mrf.mxu1  ;;  %v1499_v41 = vmov 0.0   ;;  %v511_v9 = vadd.f32 %v2499_v38, %v1880_v35 }
 0x16a   :  { %v1202_v51 = vrot.slane %v2587_v12, 7  ;;  %v2597_v44 = vadd.f32 %v2512_v6, %v421_v16  ;;  %v2599_v2 = vadd.f32 %v617_v3, %v430_v47  ;;  %1385 = vst.msk [vmem:[%s2796_s3 + $0x1b2] sm:$0xff] %vm1328_vm3, %v1499_v41 }
 0x16b   :  { %v1150_v63 = vrot.slane %v2591_v49, 7  ;;  %v755_v42 = vmax.f32 %v2593_v50, 0.0  ;;  %1386 = vst.msk [vmem:[%s2796_s3 + $0x1ba] sm:$0xff] %vm1328_vm3, %v1499_v41 }
 0x16c   :  { %v1203_v57 = vsel %vm1106_vm2, %v1200_v18, %v1202_v51  ;;  %v729_v40 = vmax.f32 %v2597_v44, 0.0  ;;  %v732_v62 = vmax.f32 %v2599_v2, 0.0 }
 0x16d   :  { %v1320_v60 = vmax.f32 %v2531_v61, %v1203_v57  ;;  %v1151_v1 = vsel %vm1106_vm2, %v1148_v20, %v1150_v63  ;;  %v918_v4 = vrot.slane %v755_v42, 1 }
 0x16e   :  { %v1294_v6 = vmax.f32 %v2535_v14, %v1151_v1  ;;  %v866_v59 = vrot.slane %v729_v40, 1  ;;  %v872_v26 = vrot.slane %v732_v62, 1  ;;  %v501_v46 = vpop.f32.mrf.mxu2  ;;  %v2609_v11 = vpop.f32.mrf.mxu3 }
 0x16f   :  { %1376 = vst.msk [vmem:[%s2796_s3 + $0x178] sm:$0xff] %vm1328_vm3, %v1320_v60  ;;  %v919_v61 = vsel %vm816_vm1, %v916_v27, %v918_v4  ;;  %v502_v8 = vadd.f32 %v2499_v38, %v501_v46  ;;  %v423_v18 = vpop.f32.mrf.mxu0 }
 0x170   :  { %1350 = vst.msk [vmem:[%s2796_s3 + $0xa8] sm:$0xff] %vm1328_vm3, %v1294_v6  ;;  %v2623_v14 = vmax.f32 %v754_v21, %v919_v61  ;;  %v867_v19 = vsel %vm816_vm1, %v864_v54, %v866_v59  ;;  %v873_v58 = vsel %vm816_vm1, %v870_v37, %v872_v26  ;;  %v424_v20 = vadd.f32 %v2499_v38, %v423_v18 }
 0x171   :  { %v2628_v0 = vmax.f32 %v728_v17, %v867_v19  ;;  %v2630_v32 = vmax.f32 %v731_v55, %v873_v58  ;;  %v2633_v30 = vadd.f32 %v2546_v36, %v502_v8  ;;  %v620_v48 = vpop.f32.mrf.mxu1  ;;  %v436_v55 = vadd.f32 %v2499_v38, %v1947_v7 }
 0x172   :  { %v1204_v27 = vrot.slane %v2623_v14, 7  ;;  %v612_v53 = vadd.f32 %v2537_v33, %v424_v20  ;;  %v2637_v21 = vadd.f32 %v620_v48, %v433_v52  ;;  %v346_v33 = vadd.f32 %v2499_v38, %v1862_v28 }
 0x173   :  { %v1152_v54 = vrot.slane %v2628_v0, 7  ;;  %v756_v23 = vmax.f32 %v2633_v30, 0.0  ;;  %v1158_v46 = vrot.slane %v2630_v32, 7 }
 0x174   :  { %v1205_v25 = vsel %vm1106_vm2, %v1202_v51, %v1204_v27  ;;  %v730_v17 = vmax.f32 %v612_v53, 0.0  ;;  %v733_v34 = vmax.f32 %v2637_v21, 0.0  ;;  %v514_v51 = vadd.f32 %v2499_v38, %v1904_v45 }
 0x175   :  { %v1321_v36 = vmax.f32 %v2558_v15, %v1205_v25  ;;  %v1153_v31 = vsel %vm1106_vm2, %v1150_v63, %v1152_v54  ;;  %v920_v47 = vrot.slane %v756_v23, 1 }
 0x176   :  { %v1295_v16 = vmax.f32 %v2562_v13, %v1153_v31  ;;  %v868_v50 = vrot.slane %v730_v17, 1  ;;  %v874_v28 = vrot.slane %v733_v34, 1  ;;  %v504_v15 = vpop.f32.mrf.mxu2  ;;  %v698_v3 = vpop.f32.mrf.mxu3 }
 0x177   :  { %1377 = vst.msk [vmem:[%s2796_s3 + $0x180] sm:$0xff] %vm1328_vm3, %v1321_v36  ;;  %v921_v35 = vsel %vm816_vm1, %v918_v4, %v920_v47  ;;  %v505_v13 = vadd.f32 %v2499_v38, %v504_v15  ;;  %v533_v44 = vpop.f32.mrf.mxu0 }
 0x178   :  { %1351 = vst.msk [vmem:[%s2796_s3 + $0xb0] sm:$0xff] %vm1328_vm3, %v1295_v16  ;;  %v2676_v2 = vmax.f32 %v755_v42, %v921_v35  ;;  %v869_v45 = vsel %vm816_vm1, %v866_v59, %v868_v50  ;;  %v871_v7 = vsel %vm816_vm1, %v868_v50, %v870_v37  ;;  %v875_v63 = vsel %vm816_vm1, %v872_v26, %v874_v28 }
 0x179   :  { %v1006_v57 = vmax.f32 %v729_v40, %v869_v45  ;;  %v1007_v60 = vmax.f32 %v730_v17, %v871_v7  ;;  %v2681_v1 = vmax.f32 %v732_v62, %v875_v63  ;;  %v2684_v4 = vadd.f32 %v2573_v39, %v505_v13  ;;  %v623_v6 = vpop.f32.mrf.mxu1 }
 0x17a   :  { %v1206_v52 = vrot.slane %v2676_v2, 7  ;;  %v534_v42 = vadd.f32 %v533_v44, %v346_v33  ;;  %v624_v61 = vadd.f32 %v623_v6, %v436_v55  ;;  %v699_v62 = vadd.f32 %v698_v3, %v511_v9 }
 0x17b   :  { %v1154_v8 = vrot.slane %v1006_v57, 7  ;;  %v1156_v59 = vrot.slane %v1007_v60, 7  ;;  %v1160_v37 = vrot.slane %v2681_v1, 7  ;;  %v757_v26 = vmax.f32 %v2684_v4, 0.0 }
 0x17c   :  { %v1207_v40 = vsel %vm1106_vm2, %v1204_v27, %v1206_v52  ;;  %v704_v18 = vmax.f32 %v534_v42, 0.0  ;;  %v734_v19 = vmax.f32 %v624_v61, 0.0 }
 0x17d   :  { %v1322_v39 = vmax.f32 %v2587_v12, %v1207_v40  ;;  %v1155_v58 = vsel %vm1106_vm2, %v1152_v54, %v1154_v8  ;;  %v1157_v20 = vsel %vm1106_vm2, %v1154_v8, %v1156_v59  ;;  %v1159_v48 = vsel %vm1106_vm2, %v1156_v59, %v1158_v46 }
 0x17e   :  { %v1296_v53 = vmax.f32 %v2591_v49, %v1155_v58  ;;  %v1297_v25 = vmax.f32 %v2628_v0, %v1157_v20  ;;  %v1298_v17 = vmax.f32 %v1006_v57, %v1159_v48  ;;  %v1161_v41 = vsel %vm1106_vm2, %v1158_v46, %v1160_v37  ;;  %v507_v33 = vpop.f32.mrf.mxu2  ;;  %v701_v27 = vpop.f32.mrf.mxu3 }
 0x17f   :  { %1378 = vst.msk [vmem:[%s2796_s3 + $0x188] sm:$0xff] %vm1328_vm3, %v1322_v39  ;;  %v1299_v12 = vmax.f32 %v1007_v60, %v1161_v41  ;;  %v922_v54 = vrot.slane %v757_v26, 1  ;;  %v817_v36 = vrot.slane %v704_v18, 1  ;;  %v876_v31 = vrot.slane %v734_v19, 1 }
 0x180   :  { %1352 = vst.msk [vmem:[%s2796_s3 + $0xb8] sm:$0xff] %vm1328_vm3, %v1296_v53  ;;  %v759_v49 = vmax.f32 %v699_v62, 0.0  ;;  %v508_v0 = vadd.f32 %v2499_v38, %v507_v33  ;;  %v702_v9 = vadd.f32 %v701_v27, %v514_v51 }
 0x181   :  { %1353 = vst.msk [vmem:[%s2796_s3 + $0xc0] sm:$0xff] %vm1328_vm3, %v1297_v25  ;;  %v923_v16 = vsel %vm816_vm1, %v920_v47, %v922_v54  ;;  %v819_v50 = vsel %vm816_vm1, %v817_v36, %v818_v29  ;;  %v877_v15 = vsel %vm816_vm1, %v874_v28, %v876_v31  ;;  %v879_v3 = vsel %vm816_vm1, %v876_v31, %v2054_v24 }
 0x182   :  { %1354 = vst.msk [vmem:[%s2796_s3 + $0xc8] sm:$0xff] %vm1328_vm3, %v1298_v17  ;;  %v1033_v38 = vmax.f32 %v756_v23, %v923_v16  ;;  %v981_v51 = vmax.f32 %v704_v18, %v819_v50  ;;  %v1010_v47 = vmax.f32 %v733_v34, %v877_v15  ;;  %v1011_v56 = vmax.f32 %v734_v19, %v879_v3 }
 0x183   :  { %1355 = vst.msk [vmem:[%s2796_s3 + $0xd0] sm:$0xff] %vm1328_vm3, %v1299_v12  ;;  %v696_v29 = vadd.f32 %v2609_v11, %v508_v0  ;;  %v760_v24 = vmax.f32 %v702_v9, 0.0  ;;  %v1038_v30 = vrot.slane %v759_v49, 1 }
 0x184   :  { %v1208_v28 = vrot.slane %v1033_v38, 7  ;;  %v1273_v55 = vmax.f32 %v981_v51, %v1971_v22  ;;  %v1162_v35 = vrot.slane %v1010_v47, 7  ;;  %v1164_v13 = vrot.slane %v1011_v56, 7 }
 0x185   :  { %v1303_v23 = vmax.f32 %v1011_v56, %v2112_v10  ;;  %v758_v44 = vmax.f32 %v696_v29, 0.0  ;;  %v1040_v21 = vrot.slane %v760_v24, 1 }
 0x186   :  { %v1209_v34 = vsel %vm1106_vm2, %v1206_v52, %v1208_v28  ;;  %1329 = vst.msk [vmem:[%s2796_s3] sm:$0xff] %vm1328_vm3, %v1273_v55  ;;  %v1163_v11 = vsel %vm1106_vm2, %v1160_v37, %v1162_v35  ;;  %v1165_v45 = vsel %vm1106_vm2, %v1162_v35, %v1164_v13  ;;  %v1167_v22 = vsel %vm1106_vm2, %v1164_v13, %v1166_v5 }
 0x187   :  { %v1323_v7 = vmax.f32 %v2623_v14, %v1209_v34  ;;  %v1300_v10 = vmax.f32 %v2630_v32, %v1163_v11  ;;  %v1301_v63 = vmax.f32 %v2681_v1, %v1165_v45  ;;  %v1302_v57 = vmax.f32 %v1010_v47, %v1167_v22  ;;  %1359 = vst.msk [vmem:[%s2796_s3 + $0xf0] sm:$0xff] %vm1328_vm3, %v1303_v23 }
 0x188   :  { %v924_v60 = vrot.slane %v758_v44, 1  ;;  %v1041_v6 = vsel %vm816_vm1, %v1038_v30, %v1040_v21  ;;  %v1049_v46 = vmax.f32 %v760_v24, %v1040_v21 }
 0x189   :  { %1379 = vst.msk [vmem:[%s2796_s3 + $0x190] sm:$0xff] %vm1328_vm3, %v1323_v7  ;;  %v1048_v43 = vmax.f32 %v759_v49, %v1041_v6 }
 0x18a   :  { %1356 = vst.msk [vmem:[%s2796_s3 + $0xd8] sm:$0xff] %vm1328_vm3, %v1300_v10  ;;  %v925_v5 = vsel %vm816_vm1, %v922_v54, %v924_v60  ;;  %v1039_v14 = vsel %vm816_vm1, %v924_v60, %v1038_v30  ;;  %v1216_v32 = vrot.slane %v1049_v46, 7  ;;  %v1035_v61 = vmax.f32 %v758_v44, %v924_v60 }
 0x18b   :  { %1357 = vst.msk [vmem:[%s2796_s3 + $0xe0] sm:$0xff] %vm1328_vm3, %v1301_v63  ;;  %v1034_v1 = vmax.f32 %v757_v26, %v925_v5  ;;  %v1047_v52 = vmax.f32 %v758_v44, %v1039_v14  ;;  %v1214_v42 = vrot.slane %v1048_v43, 7 }
 0x18c   :  { %1358 = vst.msk [vmem:[%s2796_s3 + $0xe8] sm:$0xff] %vm1328_vm3, %v1302_v57 }
 0x18d   :  { %v1210_v8 = vrot.slane %v1034_v1, 7  ;;  %v1212_v59 = vrot.slane %v1047_v52, 7  ;;  %v1217_v37 = vsel %vm1106_vm2, %v1214_v42, %v1216_v32 }
 0x18e   :  { %v1327_v40 = vmax.f32 %v1035_v61, %v1217_v37 }
 0x18f   :  { %v1211_v62 = vsel %vm1106_vm2, %v1208_v28, %v1210_v8  ;;  %v1213_v18 = vsel %vm1106_vm2, %v1210_v8, %v1212_v59  ;;  %v1215_v4 = vsel %vm1106_vm2, %v1212_v59, %v1214_v42 }
 0x190   :  { %v1324_v26 = vmax.f32 %v2676_v2, %v1211_v62  ;;  %v1325_v19 = vmax.f32 %v1033_v38, %v1213_v18  ;;  %v1326_v39 = vmax.f32 %v1034_v1, %v1215_v4  ;;  %1384 = vst.msk [vmem:[%s2796_s3 + $0x1b0] sm:$0x3] %vm1383_vm4, %v1327_v40 }
 0x192   :  { %1380 = vst.msk [vmem:[%s2796_s3 + $0x198] sm:$0xff] %vm1328_vm3, %v1324_v26 }
 0x193   :  { %1381 = vst.msk [vmem:[%s2796_s3 + $0x1a0] sm:$0xff] %vm1328_vm3, %v1325_v19 }
 0x194   :  { %1382 = vst.msk [vmem:[%s2796_s3 + $0x1a8] sm:$0xff] %vm1328_vm3, %v1326_v39 }

// kernel: forward_pallas.3
= control target key start
LH: loop header
LB: loop body
LE: loop exit
PB: predicated region body
PF: predicated region fallthrough
CT: control target
= control target key end

     0   :  { %s6089_s0 = inlined_call_operand.vmem [shape: f32[72,256], index: 0, kind: input, shape index: {}]   ;;  %s6090_s1 = inlined_call_operand.vmem [shape: f32[2,6208], index: 1, kind: input, shape index: {}]   ;;  %s6091_s2 = inlined_call_operand.vmem [shape: f32[256,32], index: 2, kind: input, shape index: {}]   ;;  %s6092_s3 = inlined_call_operand.vmem [shape: f32[1,32], index: 3, kind: input, shape index: {}]   ;;  %s6093_s4 = inlined_call_operand.vmem [shape: f32[6208,10], index: 4, kind: input, shape index: {}]   ;;  %s6094_s5 = inlined_call_operand.vmem [shape: f32[800,42], index: 5, kind: input, shape index: {}]   ;;  %s6095_s6 = inlined_call_operand.vmem [shape: f32[1,32], index: 6, kind: input, shape index: {}]   ;;  %s6096_s7 = inlined_call_operand.vmem [shape: f32[32,10], index: 7, kind: input, shape index: {}]   ;;  %s6097_s8 = inlined_call_operand.vmem [shape: f32[1,10], index: 8, kind: input, shape index: {}]   ;;  %s6098_s9 = inlined_call_operand.hbm [shape: f32[2,10], index: 9, kind: output, shape index: {}]  }
   0x1   :  { %v66_v0 = vld [vmem:[%s6091_s2 + $0x78] sm:$0xff]  ;;  %v65_v1 = vld [vmem:[%s6091_s2 + $0x70] sm:$0xff]  ;;  %v64_v4 = vld [vmem:[%s6091_s2 + $0x68] sm:$0xff] }
   0x2   :  { %v82_v2 = vld [vmem:[%s6091_s2 + $0xf8] sm:$0xff]  ;;  %87 = vmatpush.msra.mxu0 %v66_v0  ;;  %v81_v3 = vld [vmem:[%s6091_s2 + $0xf0] sm:$0xff]  ;;  %v80_v5 = vld [vmem:[%s6091_s2 + $0xe8] sm:$0xff] }
   0x3   :  { %131 = vmatpush.msra.mxu1 %v82_v2  ;;  %v63_v6 = vld [vmem:[%s6091_s2 + $0x60] sm:$0xff]  ;;  %v62_v8 = vld [vmem:[%s6091_s2 + $0x58] sm:$0xff]  ;;  %v61_v10 = vld [vmem:[%s6091_s2 + $0x50] sm:$0xff] }
   0x4   :  { %88 = vmatpush.msra.mxu0 %v65_v1  ;;  %v79_v7 = vld [vmem:[%s6091_s2 + $0xe0] sm:$0xff]  ;;  %v78_v9 = vld [vmem:[%s6091_s2 + $0xd8] sm:$0xff]  ;;  %v77_v11 = vld [vmem:[%s6091_s2 + $0xd0] sm:$0xff] }
   0x5   :  { %132 = vmatpush.msra.mxu1 %v81_v3  ;;  %v60_v12 = vld [vmem:[%s6091_s2 + $0x48] sm:$0xff]  ;;  %v59_v14 = vld [vmem:[%s6091_s2 + $0x40] sm:$0xff] }
   0x6   :  { %89 = vmatpush.msra.mxu0 %v64_v4  ;;  %v76_v13 = vld [vmem:[%s6091_s2 + $0xc8] sm:$0xff]  ;;  %v75_v15 = vld [vmem:[%s6091_s2 + $0xc0] sm:$0xff] }
   0x7   :  { %133 = vmatpush.msra.mxu1 %v80_v5 }
   0x8   :  { %90 = vmatpush.msra.mxu0 %v63_v6 }
   0x9   :  { %134 = vmatpush.msra.mxu1 %v79_v7 }
   0xa   :  { %91 = vmatpush.msra.mxu0 %v62_v8 }
   0xb   :  { %135 = vmatpush.msra.mxu1 %v78_v9 }
   0xc   :  { %92 = vmatpush.msra.mxu0 %v61_v10 }
   0xd   :  { %136 = vmatpush.msra.mxu1 %v77_v11 }
   0xe   :  { %93 = vmatpush.msra.mxu0 %v60_v12 }
   0xf   :  { %137 = vmatpush.msra.mxu1 %v76_v13 }
  0x10   :  { %14 = vsyncpa [#allocation4], 0  ;;  %v58_v16 = vld [vmem:[%s6091_s2 + $0x38] sm:$0xff]  ;;  %94 = vmatpush.msra.mxu0 %v59_v14  ;;  %v57_v18 = vld [vmem:[%s6091_s2 + $0x30] sm:$0xff]  ;;  %vm193_vm0 = vcmask 1046528   ;;  %vm238_vm1 = vcmask 1041408  }
  0x11   :  { %v74_v17 = vld [vmem:[%s6091_s2 + $0xb8] sm:$0xff]  ;;  %138 = vmatpush.msra.mxu1 %v75_v15  ;;  %v73_v19 = vld [vmem:[%s6091_s2 + $0xb0] sm:$0xff]  ;;  %v56_v20 = vld [vmem:[%s6091_s2 + $0x28] sm:$0xff]  ;;  %vm274_vm2 = vcmask 253952   ;;  %s2883_s25 = smov 96   ;;  %vm282_vm3 = vcmask 516352  }
  0x12   :  { %95 = vmatpush.msra.mxu0 %v58_v16  ;;  %v72_v21 = vld [vmem:[%s6091_s2 + $0xa8] sm:$0xff]  ;;  %v55_v22 = vld [vmem:[%s6091_s2 + $0x20] sm:$0xff]  ;;  %v54_v24 = vld [vmem:[%s6091_s2 + $0x18] sm:$0xff]  ;;  %vm290_vm4 = vcmask 778752   ;;  %vm300_vm5 = vcmask 1041152   ;;  %vm1514_vm6 = vcmask 261120  }
  0x13   :  { %139 = vmatpush.msra.mxu1 %v74_v17  ;;  %v71_v23 = vld [vmem:[%s6091_s2 + $0xa0] sm:$0xff]  ;;  %v70_v25 = vld [vmem:[%s6091_s2 + $0x98] sm:$0xff]  ;;  %v53_v26 = vld [vmem:[%s6091_s2 + $0x10] sm:$0xff]  ;;  %vm1818_vm7 = vcmask 523264   ;;  %s2884_s13 = smov [#allocation3]   ;;  %s2816_s16 = sshll.u32 %s6098_s9, 4  ;;  %s2817_s16 = int_to_ptr.hbm [resolvable:$true] %s2816_s16 }
  0x14   :  { %96 = vmatpush.msra.mxu0 %v57_v18  ;;  %v69_v27 = vld [vmem:[%s6091_s2 + $0x90] sm:$0xff]  ;;  %v52_v28 = vld [vmem:[%s6091_s2 + $0x8] sm:$0xff]  ;;  %v51_v30 = vld [vmem:[%s6091_s2] sm:$0xff]  ;;  %s2814_s14 = sshll.u32 %s2884_s13, 4  ;;  %vm2807_vm8 = vcmask 74752   ;;  %s2815_s14 = int_to_ptr.vmem [resolvable:$true] %s2814_s14 }
  0x15   :  { %140 = vmatpush.msra.mxu1 %v73_v19  ;;  %v68_v29 = vld [vmem:[%s6091_s2 + $0x88] sm:$0xff]  ;;  %v67_v31 = vld [vmem:[%s6091_s2 + $0x80] sm:$0xff]  ;;  %v35_v34 = vld [vmem:[%s6089_s0 + $0x10] sm:$0xff] }
  0x16   :  { %97 = vmatpush.msra.mxu0 %v56_v20  ;;  %v33_v32 = vld [vmem:[%s6089_s0] sm:$0xff]  ;;  %v34_v33 = vld [vmem:[%s6089_s0 + $0x8] sm:$0xff]  ;;  %v36_v35 = vld [vmem:[%s6089_s0 + $0x18] sm:$0xff] }
  0x17   :  { %141 = vmatpush.msra.mxu1 %v72_v21  ;;  %v37_v36 = vld [vmem:[%s6089_s0 + $0x20] sm:$0xff]  ;;  %v38_v37 = vld [vmem:[%s6089_s0 + $0x28] sm:$0xff]  ;;  %v39_v38 = vld [vmem:[%s6089_s0 + $0x30] sm:$0xff] }
  0x18   :  { %98 = vmatpush.msra.mxu0 %v55_v22  ;;  %v40_v39 = vld [vmem:[%s6089_s0 + $0x38] sm:$0xff]  ;;  %v41_v40 = vld [vmem:[%s6089_s0 + $0x40] sm:$0xff]  ;;  %v42_v41 = vld [vmem:[%s6089_s0 + $0x48] sm:$0xff] }
  0x19   :  { %142 = vmatpush.msra.mxu1 %v71_v23  ;;  %v43_v42 = vld [vmem:[%s6089_s0 + $0x50] sm:$0xff]  ;;  %v44_v43 = vld [vmem:[%s6089_s0 + $0x58] sm:$0xff]  ;;  %v45_v44 = vld [vmem:[%s6089_s0 + $0x60] sm:$0xff] }
  0x1a   :  { %99 = vmatpush.msra.mxu0 %v54_v24  ;;  %v46_v45 = vld [vmem:[%s6089_s0 + $0x68] sm:$0xff]  ;;  %v47_v46 = vld [vmem:[%s6089_s0 + $0x70] sm:$0xff]  ;;  %v48_v47 = vld [vmem:[%s6089_s0 + $0x78] sm:$0xff] }
  0x1b   :  { %143 = vmatpush.msra.mxu1 %v70_v25  ;;  %v49_v48 = vld [vmem:[%s6089_s0 + $0x80] sm:$0xff]  ;;  %v50_v49 = vld [vmem:[%s6089_s0 + $0x88] sm:$0xff]  ;;  %s2881_s0 = smov 32  }
  0x1c   :  { %100 = vmatpush.msra.mxu0 %v53_v26  ;;  %v3088_v52 = vld [vmem:[%s6092_s3] ss:$0 sm:$0xff]  ;;  %s2882_s3 = smov 64  }
  0x1d   :  { %144 = vmatpush.msra.mxu1 %v69_v27 }
  0x1e   :  { %101 = vmatpush.msra.mxu0 %v52_v28 }
  0x1f   :  { %145 = vmatpush.msra.mxu1 %v68_v29 }
  0x20   :  { %102 = vmatpush.msra.mxu0 %v51_v30 }
  0x21   :  { %146 = vmatpush.msra.mxu1 %v67_v31  ;;  %103 = vmatmul.f32.vlgmr.msra.gmra.mxu0 %v33_v32 }
  0x22   :  { %147 = vmatmul.f32.vlgmr.msra.gmra.mxu1 %v34_v33 }
  0x29   :  { %106 = vmatmul.f32.gmra.mxu0 %v35_v34 }
  0x2a   :  { %150 = vmatmul.f32.gmra.mxu1 %v36_v35 }
  0x31   :  { %109 = vmatmul.f32.gmra.mxu0 %v37_v36 }
  0x32   :  { %153 = vmatmul.f32.gmra.mxu1 %v38_v37 }
  0x39   :  { %112 = vmatmul.f32.gmra.mxu0 %v39_v38 }
  0x3a   :  { %156 = vmatmul.f32.gmra.mxu1 %v40_v39 }
  0x41   :  { %115 = vmatmul.f32.gmra.mxu0 %v41_v40 }
  0x42   :  { %159 = vmatmul.f32.gmra.mxu1 %v42_v41 }
  0x49   :  { %118 = vmatmul.f32.gmra.mxu0 %v43_v42 }
  0x4a   :  { %162 = vmatmul.f32.gmra.mxu1 %v44_v43 }
  0x51   :  { %121 = vmatmul.f32.gmra.mxu0 %v45_v44 }
  0x52   :  { %165 = vmatmul.f32.gmra.mxu1 %v46_v45 }
  0x59   :  { %124 = vmatmul.f32.gmra.mxu0 %v47_v46 }
  0x5a   :  { %168 = vmatmul.f32.gmra.mxu1 %v48_v47 }
  0x61   :  { %127 = vmatmul.f32.gmra.mxu0 %v49_v48 }
  0x62   :  { %171 = vmatmul.f32.gmra.mxu1 %v50_v49 }
  0x9e   :  { %v104_v50 = vpop.f32.mrf.mxu0 }
  0x9f   :  { %v148_v51 = vpop.f32.mrf.mxu1  ;;  %v105_v53 = vadd.f32 %v3088_v52, %v104_v50 }
  0xa1   :  { %v149_v57 = vadd.f32 %v148_v51, %v105_v53 }
  0xa3   :  { %v175_v60 = vmax.f32 %v149_v57, 0.0 }
  0xa5   :  { %v194_v1 = vrot.slane %v175_v60, 1 }
  0xa6   :  { %v107_v54 = vpop.f32.mrf.mxu0 }
  0xa7   :  { %v151_v55 = vpop.f32.mrf.mxu1  ;;  %v108_v56 = vadd.f32 %v3088_v52, %v107_v54 }
  0xa9   :  { %v152_v58 = vadd.f32 %v151_v55, %v108_v56 }
  0xab   :  { %v176_v59 = vmax.f32 %v152_v58, 0.0 }
  0xad   :  { %v195_v63 = vrot.slane %v176_v59, 1 }
  0xae   :  { %v110_v61 = vpop.f32.mrf.mxu0 }
  0xaf   :  { %v154_v62 = vpop.f32.mrf.mxu1  ;;  %v111_v0 = vadd.f32 %v3088_v52, %v110_v61  ;;  %v196_v3 = vsel %vm193_vm0, %v194_v1, %v195_v63 }
  0xb0   :  { %v220_v6 = vmax.f32 %v175_v60, %v196_v3 }
  0xb1   :  { %v155_v2 = vadd.f32 %v154_v62, %v111_v0 }
  0xb2   :  { %v239_v13 = vrot.slane %v220_v6, 6 }
  0xb3   :  { %v177_v4 = vmax.f32 %v155_v2, 0.0 }
  0xb5   :  { %v197_v5 = vrot.slane %v177_v4, 1 }
  0xb6   :  { %v113_v7 = vpop.f32.mrf.mxu0 }
  0xb7   :  { %v157_v8 = vpop.f32.mrf.mxu1  ;;  %v198_v9 = vsel %vm193_vm0, %v195_v63, %v197_v5  ;;  %v114_v10 = vadd.f32 %v3088_v52, %v113_v7 }
  0xb8   :  { %v221_v11 = vmax.f32 %v176_v59, %v198_v9 }
  0xb9   :  { %v158_v12 = vadd.f32 %v157_v8, %v114_v10 }
  0xba   :  { %v240_v14 = vrot.slane %v221_v11, 6 }
  0xbb   :  { %v178_v15 = vmax.f32 %v158_v12, 0.0 }
  0xbc   :  { %v241_v16 = vsel %vm238_vm1, %v239_v13, %v240_v14 }
  0xbd   :  { %v265_v17 = vmax.f32 %v220_v6, %v241_v16  ;;  %v199_v18 = vrot.slane %v178_v15, 1 }
  0xbe   :  { %v116_v19 = vpop.f32.mrf.mxu0 }
  0xbf   :  { %v160_v20 = vpop.f32.mrf.mxu1  ;;  %284 = vst.sshfl [vmem:[#allocation1] sm:$0xff pattern:$0x73625140] %v265_v17  ;;  %v200_v21 = vsel %vm193_vm0, %v197_v5, %v199_v18  ;;  %v117_v22 = vadd.f32 %v3088_v52, %v116_v19  ;;  %v2825_v23 = vrot.slane %v265_v17, 9 }
  0xc0   :  { %v222_v24 = vmax.f32 %v177_v4, %v200_v21  ;;  %275 = vst.msk [vmem:[#allocation2] sm:$0x1] %vm274_vm2, %v265_v17 }
  0xc1   :  { %v161_v25 = vadd.f32 %v160_v20, %v117_v22  ;;  %279 = vrot.lane.b32.xlu0 %v2825_v23, %s2881_s0 }
  0xc2   :  { %v242_v26 = vrot.slane %v222_v24, 6 }
  0xc3   :  { %v179_v27 = vmax.f32 %v161_v25, 0.0 }
  0xc4   :  { %v243_v28 = vsel %vm238_vm1, %v240_v14, %v242_v26 }
  0xc5   :  { %v3102_v29 = vmax.f32 %v221_v11, %v243_v28  ;;  %v201_v30 = vrot.slane %v179_v27, 1 }
  0xc6   :  { %v286_v31 = vld [vmem:[#allocation1 + $0x1] ss:$4 sm:$0xff]  ;;  %v119_v32 = vpop.f32.mrf.mxu0 }
  0xc7   :  { %v163_v33 = vpop.f32.mrf.mxu1  ;;  %292 = vst.sshfl [vmem:[#allocation1] sm:$0xff pattern:$0x73625140] %v265_v17  ;;  %v202_v34 = vsel %vm193_vm0, %v199_v18, %v201_v30  ;;  %287 = vrot.lane.b32.xlu2 %v286_v31, %s2882_s3  ;;  %v120_v35 = vadd.f32 %v3088_v52, %v119_v32  ;;  %v2828_v36 = vrot.slane %v3102_v29, 9 }
  0xc8   :  { %v223_v38 = vmax.f32 %v178_v15, %v202_v34 }
  0xc9   :  { %v164_v37 = vadd.f32 %v163_v33, %v120_v35  ;;  %331 = vst.msk [vmem:[#allocation2 + $0x4] sm:$0x1] %vm274_vm2, %v2828_v36 }
  0xca   :  { %v244_v42 = vrot.slane %v223_v38, 6 }
  0xcb   :  { %v180_v39 = vmax.f32 %v164_v37, 0.0 }
  0xcc   :  { %v245_v46 = vsel %vm238_vm1, %v242_v26, %v244_v42 }
  0xcd   :  { %v203_v40 = vrot.slane %v180_v39, 1  ;;  %v3115_v49 = vmax.f32 %v222_v24, %v245_v46 }
  0xce   :  { %v294_v41 = vld [vmem:[#allocation1 + $0x1] ss:$4 sm:$0xff]  ;;  %v122_v53 = vpop.f32.mrf.mxu0 }
  0xcf   :  { %302 = vst.sshfl [vmem:[#allocation1] sm:$0xff pattern:$0x73625140] %v265_v17  ;;  %324 = vrot.lane.b32.xlu2 %v3102_v29, %s2883_s25  ;;  %v2826_v43 = vrot.slane %v294_v41, 9  ;;  %v204_v44 = vsel %vm193_vm0, %v201_v30, %v203_v40  ;;  %v123_v54 = vadd.f32 %v3088_v52, %v122_v53  ;;  %v166_v55 = vpop.f32.mrf.mxu1 }
  0xd0   :  { %v224_v45 = vmax.f32 %v179_v27, %v204_v44 }
  0xd1   :  { %297 = vrot.lane.b32.xlu1 %v2826_v43, %s2883_s25  ;;  %v167_v56 = vadd.f32 %v166_v55, %v123_v54 }
  0xd2   :  { %v246_v47 = vrot.slane %v224_v45, 6 }
  0xd3   :  { %v181_v57 = vmax.f32 %v167_v56, 0.0 }
  0xd4   :  { %v247_v48 = vsel %vm238_vm1, %v244_v42, %v246_v47 }
  0xd5   :  { %v3117_v50 = vmax.f32 %v223_v38, %v247_v48  ;;  %v205_v59 = vrot.slane %v181_v57, 1 }
  0xd6   :  { %v304_v51 = vld [vmem:[#allocation1 + $0x2] ss:$4 sm:$0xff]  ;;  %v125_v7 = vpop.f32.mrf.mxu0 }
  0xd7   :  { %307 = vst.sshfl [vmem:[#allocation1] sm:$0xff pattern:$0x73625140] %v265_v17  ;;  %370 = vrot.lane.b32.xlu2 %v3115_v49, %s2882_s3  ;;  %v206_v60 = vsel %vm193_vm0, %v203_v40, %v205_v59  ;;  %v126_v8 = vadd.f32 %v3088_v52, %v125_v7  ;;  %v169_v9 = vpop.f32.mrf.mxu1 }
  0xd8   :  { %306 = vst.msk [vmem:[#allocation2 + $0x2] sm:$0x1] %vm274_vm2, %v304_v51  ;;  %v225_v61 = vmax.f32 %v180_v39, %v206_v60 }
  0xd9   :  { %411 = vst.msk [vmem:[#allocation2 + $0xa] sm:$0x1] %vm274_vm2, %v3117_v50  ;;  %v170_v10 = vadd.f32 %v169_v9, %v126_v8 }
  0xda   :  { %v248_v62 = vrot.slane %v225_v61, 6 }
  0xdb   :  { %v182_v11 = vmax.f32 %v170_v10, 0.0 }
  0xdc   :  { %v249_v0 = vsel %vm238_vm1, %v246_v47, %v248_v62 }
  0xdd   :  { %v3129_v2 = vmax.f32 %v224_v45, %v249_v0  ;;  %v207_v13 = vrot.slane %v182_v11, 1 }
  0xde   :  { %v309_v58 = vld [vmem:[#allocation1 + $0x3] ss:$4 sm:$0xff]  ;;  %v128_v22 = vpop.f32.mrf.mxu0 }
  0xdf   :  { %314 = vst.sshfl [vmem:[#allocation1] sm:$0xff pattern:$0x73625140] %v265_v17  ;;  %310 = vrot.lane.b32.xlu0 %v309_v58, %s2881_s0  ;;  %v208_v14 = vsel %vm193_vm0, %v205_v59, %v207_v13  ;;  %v129_v23 = vadd.f32 %v3088_v52, %v128_v22  ;;  %v172_v24 = vpop.f32.mrf.mxu1 }
  0xe0   :  { %v226_v15 = vmax.f32 %v181_v57, %v208_v14 }
  0xe1   :  { %v173_v25 = vadd.f32 %v172_v24, %v129_v23  ;;  %v1411_v24 = vld [vmem:[%s6094_s5 + $0x78] sm:$0xff] }
  0xe2   :  { %v250_v16 = vrot.slane %v226_v15, 6  ;;  %1517 = vmatpush.msra.mxu2 %v1411_v24  ;;  %v1430_v24 = vld [vmem:[%s6094_s5 + $0x110] sm:$0xff] }
  0xe3   :  { %v183_v27 = vmax.f32 %v173_v25, 0.0  ;;  %v1410_v25 = vld [vmem:[%s6094_s5 + $0x70] sm:$0xff] }
  0xe4   :  { %v251_v18 = vsel %vm238_vm1, %v248_v62, %v250_v16  ;;  %1518 = vmatpush.msra.mxu2 %v1410_v25  ;;  %v1450_v25 = vld [vmem:[%s6094_s5 + $0x1b0] sm:$0xff] }
  0xe5   :  { %v3144_v20 = vmax.f32 %v225_v61, %v251_v18 }
  0xe6   :  { %v316_v63 = vld [vmem:[#allocation1 + $0x3] ss:$4 sm:$0xff] }
  0xe7   :  { %332 = vst.sshfl [vmem:[#allocation1] sm:$0xff pattern:$0x73625140] %v3102_v29  ;;  %v2827_v1 = vrot.slane %v316_v63, 9 }
  0xe8   :  { %471 = vst.msk [vmem:[#allocation2 + $0x3] sm:$0x1] %vm274_vm2, %v3144_v20 }
  0xe9   :  { %319 = vrot.lane.b32.xlu0 %v2827_v1, %s2882_s3 }
  0xee   :  { %v334_v3 = vld [vmem:[#allocation1 + $0x1] ss:$4 sm:$0xff] }
  0xef   :  { %339 = vst.sshfl [vmem:[#allocation1] sm:$0xff pattern:$0x73625140] %v3102_v29  ;;  %335 = vrot.lane.b32.xlu1 %v334_v3, %s2881_s0 }
  0xf6   :  { %v341_v4 = vld [vmem:[#allocation1 + $0x2] ss:$4 sm:$0xff] }
  0xf7   :  { %346 = vst.sshfl [vmem:[#allocation1] sm:$0xff pattern:$0x73625140] %v3102_v29  ;;  %342 = vrot.lane.b32.xlu1 %v341_v4, %s2882_s3 }
  0xfe   :  { %v348_v5 = vld [vmem:[#allocation1 + $0x2] ss:$4 sm:$0xff] }
  0xff   :  { %355 = vst.sshfl [vmem:[#allocation1] sm:$0xff pattern:$0x73625140] %v3102_v29  ;;  %v2829_v6 = vrot.slane %v348_v5, 9 }
 0x101   :  { %351 = vrot.lane.b32.xlu0 %v2829_v6, %s2883_s25 }
 0x106   :  { %v357_v12 = vld [vmem:[#allocation1 + $0x3] ss:$4 sm:$0xff] }
 0x107   :  { %360 = vst.sshfl [vmem:[#allocation1] sm:$0xff pattern:$0x73625140] %v3102_v29  ;;  %v209_v29 = vrot.slane %v183_v27, 1 }
 0x108   :  { %359 = vst.msk [vmem:[#allocation2 + $0x6] sm:$0x1] %vm274_vm2, %v357_v12 }
 0x109   :  { %v210_v30 = vsel %vm193_vm0, %v207_v13, %v209_v29  ;;  %v228_v36 = vmax.f32 %v183_v27, %v209_v29  ;;  %v1409_v29 = vld [vmem:[%s6094_s5 + $0x68] sm:$0xff] }
 0x10a   :  { %v227_v31 = vmax.f32 %v182_v11, %v210_v30  ;;  %v1408_v30 = vld [vmem:[%s6094_s5 + $0x60] sm:$0xff]  ;;  %1519 = vmatpush.msra.mxu2 %v1409_v29 }
 0x10b   :  { %v254_v37 = vrot.slane %v228_v36, 6  ;;  %v1428_v29 = vld [vmem:[%s6094_s5 + $0x100] sm:$0xff] }
 0x10c   :  { %v252_v32 = vrot.slane %v227_v31, 6  ;;  %1520 = vmatpush.msra.mxu2 %v1408_v30  ;;  %v1448_v30 = vld [vmem:[%s6094_s5 + $0x1a0] sm:$0xff] }
 0x10d   :  { %v273_v41 = vmax.f32 %v228_v36, %v254_v37 }
 0x10e   :  { %v362_v17 = vld [vmem:[#allocation1 + $0x3] ss:$4 sm:$0xff]  ;;  %v253_v52 = vsel %vm238_vm1, %v250_v16, %v252_v32  ;;  %v255_v40 = vsel %vm238_vm1, %v252_v32, %v254_v37 }
 0x10f   :  { %374 = vst.sshfl [vmem:[#allocation1] sm:$0xff pattern:$0x73625140] %v3115_v49  ;;  %v2830_v19 = vrot.slane %v362_v17, 9  ;;  %v3159_v34 = vmax.f32 %v226_v15, %v253_v52  ;;  %v3168_v42 = vmax.f32 %v227_v31, %v255_v40  ;;  %v2833_v15 = vrot.slane %v3117_v50, 9  ;;  %v1427_v31 = vld [vmem:[%s6094_s5 + $0xf8] sm:$0xff] }
 0x110   :  { %604 = vst.msk [vmem:[#allocation2 + $0xd] sm:$0x1] %vm274_vm2, %v273_v41  ;;  %v1426_v32 = vld [vmem:[%s6094_s5 + $0xf0] sm:$0xff]  ;;  %1537 = vmatpush.msra.mxu3 %v1427_v31  ;;  %v1425_v52 = vld [vmem:[%s6094_s5 + $0xe8] sm:$0xff]  ;;  %v1404_v40 = vld [vmem:[%s6094_s5 + $0x40] sm:$0xff] }
 0x111   :  { %365 = vrot.lane.b32.xlu1 %v2830_v19, %s2881_s0  ;;  %511 = vrot.lane.b32.xlu2 %v3159_v34, %s2882_s3  ;;  %v2839_v12 = vrot.slane %v3159_v34, 9  ;;  %v2842_v17 = vrot.slane %v3168_v42, 9  ;;  %v1405_v37 = vld [vmem:[%s6094_s5 + $0x48] sm:$0xff]  ;;  %v1422_v41 = vld [vmem:[%s6094_s5 + $0xd0] sm:$0xff] }
 0x112   :  { %1538 = vmatpush.msra.mxu3 %v1426_v32  ;;  %v1447_v31 = vld [vmem:[%s6094_s5 + $0x198] sm:$0xff]  ;;  %v1446_v32 = vld [vmem:[%s6094_s5 + $0x190] sm:$0xff] }
 0x114   :  { %1539 = vmatpush.msra.mxu3 %v1425_v52  ;;  %v1445_v52 = vld [vmem:[%s6094_s5 + $0x188] sm:$0xff] }
 0x116   :  { %v376_v21 = vld [vmem:[#allocation1 + $0x1] ss:$4 sm:$0xff] }
 0x117   :  { %381 = vst.sshfl [vmem:[#allocation1] sm:$0xff pattern:$0x73625140] %v3115_v49 }
 0x119   :  { %377 = vrot.lane.b32.xlu1 %v376_v21, %s2883_s25 }
 0x11e   :  { %v383_v26 = vld [vmem:[#allocation1 + $0x1] ss:$4 sm:$0xff] }
 0x11f   :  { %388 = vst.sshfl [vmem:[#allocation1] sm:$0xff pattern:$0x73625140] %v3115_v49  ;;  %v2831_v28 = vrot.slane %v383_v26, 9 }
 0x121   :  { %387 = vst.msk [vmem:[#allocation2 + $0x8] sm:$0x1] %vm274_vm2, %v2831_v28  ;;  %v288_v39 = vpop.permute.xlu2 %287 }
 0x126   :  { %v3155_v33 = vld [vmem:[#allocation1 + $0x2] ss:$4 sm:$0xff] }
 0x127   :  { %395 = vst.sshfl [vmem:[#allocation1] sm:$0xff pattern:$0x73625140] %v3115_v49 }
 0x129   :  { %v325_v53 = vpop.permute.xlu2 %324 }
 0x12e   :  { %v3163_v35 = vld [vmem:[#allocation1 + $0x2] ss:$4 sm:$0xff] }
 0x12f   :  { %404 = vst.sshfl [vmem:[#allocation1] sm:$0xff pattern:$0x73625140] %v3115_v49  ;;  %v2832_v19 = vrot.slane %v3163_v35, 9  ;;  %v1424_v35 = vld [vmem:[%s6094_s5 + $0xe0] sm:$0xff] }
 0x130   :  { %1540 = vmatpush.msra.mxu3 %v1424_v35  ;;  %v1444_v35 = vld [vmem:[%s6094_s5 + $0x180] sm:$0xff] }
 0x133   :  { %v280_v38 = vpop.permute.xlu0 %279 }
 0x134   :  { %283 = vst.msk [vmem:[#allocation2] sm:$0x1] %vm282_vm3, %v280_v38 }
 0x135   :  { %291 = vst.msk [vmem:[#allocation2] sm:$0x1] %vm290_vm4, %v288_v39  ;;  %v1423_v39 = vld [vmem:[%s6094_s5 + $0xd8] sm:$0xff] }
 0x136   :  { %v3171_v43 = vld [vmem:[#allocation1 + $0x3] ss:$4 sm:$0xff]  ;;  %1541 = vmatpush.msra.mxu3 %v1423_v39 }
 0x137   :  { %419 = vst.sshfl [vmem:[#allocation1] sm:$0xff pattern:$0x73625140] %v3117_v50 }
 0x138   :  { %1542 = vmatpush.msra.mxu3 %v1422_v41 }
 0x13e   :  { %v3175_v44 = vld [vmem:[#allocation1 + $0x1] ss:$4 sm:$0xff] }
 0x13f   :  { %426 = vst.sshfl [vmem:[#allocation1] sm:$0xff pattern:$0x73625140] %v3117_v50 }
 0x143   :  { %v298_v45 = vpop.permute.xlu1 %297 }
 0x144   :  { %301 = vst.msk [vmem:[#allocation2] sm:$0x1] %vm300_vm5, %v298_v45 }
 0x146   :  { %v3179_v46 = vld [vmem:[#allocation1 + $0x1] ss:$4 sm:$0xff] }
 0x147   :  { %435 = vst.sshfl [vmem:[#allocation1] sm:$0xff pattern:$0x73625140] %v3117_v50  ;;  %v2834_v38 = vrot.slane %v3179_v46, 9  ;;  %v1401_v46 = vld [vmem:[%s6094_s5 + $0x28] sm:$0xff] }
 0x14e   :  { %v437_v47 = vld [vmem:[#allocation1 + $0x2] ss:$4 sm:$0xff] }
 0x14f   :  { %441 = vst.sshfl [vmem:[#allocation1] sm:$0xff pattern:$0x73625140] %v3129_v2 }
 0x150   :  { %439 = vst.msk [vmem:[#allocation2 + $0xc] sm:$0x1] %vm274_vm2, %v437_v47  ;;  %v1421_v47 = vld [vmem:[%s6094_s5 + $0xc8] sm:$0xff] }
 0x151   :  { %v311_v48 = vpop.permute.xlu0 %310  ;;  %1543 = vmatpush.msra.mxu3 %v1421_v47 }
 0x152   :  { %313 = vst.msk [vmem:[#allocation2 + $0x2] sm:$0x1] %vm282_vm3, %v311_v48  ;;  %v1400_v48 = vld [vmem:[%s6094_s5 + $0x20] sm:$0xff] }
 0x156   :  { %v443_v49 = vld [vmem:[#allocation1 + $0x2] ss:$4 sm:$0xff] }
 0x157   :  { %446 = vst.sshfl [vmem:[#allocation1] sm:$0xff pattern:$0x73625140] %v3129_v2 }
 0x158   :  { %445 = vst.msk [vmem:[#allocation2 + $0x1] sm:$0x1] %vm274_vm2, %v443_v49  ;;  %v1420_v49 = vld [vmem:[%s6094_s5 + $0xc0] sm:$0xff] }
 0x159   :  { %1544 = vmatpush.msra.mxu3 %v1420_v49 }
 0x15b   :  { %v320_v51 = vpop.permute.xlu0 %319 }
 0x15c   :  { %322 = vst.msk [vmem:[#allocation2 + $0x2] sm:$0x1] %vm290_vm4, %v320_v51  ;;  %v1399_v51 = vld [vmem:[%s6094_s5 + $0x18] sm:$0xff] }
 0x15d   :  { %327 = vst.msk [vmem:[#allocation2 + $0x2] sm:$0x1] %vm300_vm5, %v325_v53  ;;  %v1419_v53 = vld [vmem:[%s6094_s5 + $0xb8] sm:$0xff] }
 0x15e   :  { %v448_v54 = vld [vmem:[#allocation1 + $0x2] ss:$4 sm:$0xff]  ;;  %1545 = vmatpush.msra.mxu3 %v1419_v53 }
 0x15f   :  { %v2835_v55 = vrot.slane %v448_v54, 9  ;;  %455 = vst.sshfl [vmem:[#allocation1] sm:$0xff pattern:$0x73625140] %v3129_v2  ;;  %v1398_v54 = vld [vmem:[%s6094_s5 + $0x10] sm:$0xff] }
 0x161   :  { %451 = vrot.lane.b32.xlu2 %v2835_v55, %s2881_s0  ;;  %v336_v56 = vpop.permute.xlu1 %335  ;;  %v1418_v55 = vld [vmem:[%s6094_s5 + $0xb0] sm:$0xff] }
 0x162   :  { %338 = vst.msk [vmem:[#allocation2 + $0x4] sm:$0x1] %vm282_vm3, %v336_v56  ;;  %1546 = vmatpush.msra.mxu3 %v1418_v55  ;;  %v1397_v56 = vld [vmem:[%s6094_s5 + $0x8] sm:$0xff] }
 0x166   :  { %v457_v57 = vld [vmem:[#allocation1 + $0x3] ss:$4 sm:$0xff] }
 0x167   :  { %458 = vrot.lane.b32.xlu0 %v457_v57, %s2882_s3  ;;  %462 = vst.sshfl [vmem:[#allocation1] sm:$0xff pattern:$0x73625140] %v3129_v2  ;;  %v371_v2 = vpop.permute.xlu2 %370  ;;  %v1417_v57 = vld [vmem:[%s6094_s5 + $0xa8] sm:$0xff] }
 0x168   :  { %1547 = vmatpush.msra.mxu3 %v1417_v57  ;;  %v1489_v57 = vld [vmem:[%s6094_s5 + $0x2e8] sm:$0xff] }
 0x169   :  { %v343_v58 = vpop.permute.xlu1 %342 }
 0x16a   :  { %345 = vst.msk [vmem:[#allocation2 + $0x4] sm:$0x1] %vm290_vm4, %v343_v58 }
 0x16e   :  { %v464_v59 = vld [vmem:[#allocation1 + $0x3] ss:$4 sm:$0xff] }
 0x16f   :  { %v2836_v60 = vrot.slane %v464_v59, 9  ;;  %473 = vst.sshfl [vmem:[#allocation1] sm:$0xff pattern:$0x73625140] %v3144_v20  ;;  %v3219_v13 = vpop.permute.xlu2 %511  ;;  %v1396_v59 = vld [vmem:[%s6094_s5] sm:$0xff] }
 0x171   :  { %467 = vrot.lane.b32.xlu2 %v2836_v60, %s2883_s25  ;;  %v1416_v60 = vld [vmem:[%s6094_s5 + $0xa0] sm:$0xff] }
 0x172   :  { %1548 = vmatpush.msra.mxu3 %v1416_v60  ;;  %v1471_v60 = vld [vmem:[%s6094_s5 + $0x258] sm:$0xff] }
 0x173   :  { %v352_v61 = vpop.permute.xlu0 %351 }
 0x174   :  { %354 = vst.msk [vmem:[#allocation2 + $0x4] sm:$0x1] %vm300_vm5, %v352_v61  ;;  %v1443_v61 = vld [vmem:[%s6094_s5 + $0x178] sm:$0xff] }
 0x176   :  { %v475_v62 = vld [vmem:[#allocation1 + $0x1] ss:$4 sm:$0xff] }
 0x177   :  { %480 = vst.sshfl [vmem:[#allocation1] sm:$0xff pattern:$0x73625140] %v3144_v20 }
 0x179   :  { %476 = vrot.lane.b32.xlu2 %v475_v62, %s2881_s0  ;;  %v1415_v62 = vld [vmem:[%s6094_s5 + $0x98] sm:$0xff] }
 0x17a   :  { %1549 = vmatpush.msra.mxu3 %v1415_v62  ;;  %v1470_v62 = vld [vmem:[%s6094_s5 + $0x250] sm:$0xff] }
 0x17e   :  { %v482_v63 = vld [vmem:[#allocation1 + $0x1] ss:$4 sm:$0xff] }
 0x17f   :  { %v2837_v0 = vrot.slane %v482_v63, 9  ;;  %489 = vst.sshfl [vmem:[#allocation1] sm:$0xff pattern:$0x73625140] %v3144_v20  ;;  %v1442_v63 = vld [vmem:[%s6094_s5 + $0x170] sm:$0xff] }
 0x181   :  { %485 = vrot.lane.b32.xlu1 %v2837_v0, %s2882_s3  ;;  %v1414_v0 = vld [vmem:[%s6094_s5 + $0x90] sm:$0xff] }
 0x182   :  { %1550 = vmatpush.msra.mxu3 %v1414_v0  ;;  %v609_v0 = vld [vmem:[%s6090_s1 + $0x10] sm:$0xff] }
 0x183   :  { %v366_v1 = vpop.permute.xlu1 %365 }
 0x184   :  { %368 = vst.msk [vmem:[#allocation2 + $0x6] sm:$0x1] %vm282_vm3, %v366_v1  ;;  %v1441_v1 = vld [vmem:[%s6094_s5 + $0x168] sm:$0xff] }
 0x185   :  { %373 = vst.msk [vmem:[#allocation2 + $0x6] sm:$0x1] %vm290_vm4, %v371_v2 }
 0x186   :  { %v491_v3 = vld [vmem:[#allocation1 + $0x2] ss:$4 sm:$0xff] }
 0x187   :  { %496 = vst.sshfl [vmem:[#allocation1] sm:$0xff pattern:$0x73625140] %v3144_v20  ;;  %492 = vrot.lane.b32.xlu0 %v491_v3, %s2883_s25  ;;  %v1413_v3 = vld [vmem:[%s6094_s5 + $0x88] sm:$0xff] }
 0x188   :  { %1551 = vmatpush.msra.mxu3 %v1413_v3  ;;  %v1469_v3 = vld [vmem:[%s6094_s5 + $0x248] sm:$0xff] }
 0x18b   :  { %v378_v4 = vpop.permute.xlu1 %377 }
 0x18c   :  { %380 = vst.msk [vmem:[#allocation2 + $0x6] sm:$0x1] %vm300_vm5, %v378_v4  ;;  %v1440_v4 = vld [vmem:[%s6094_s5 + $0x160] sm:$0xff] }
 0x18e   :  { %v498_v5 = vld [vmem:[#allocation1 + $0x2] ss:$4 sm:$0xff] }
 0x18f   :  { %503 = vst.sshfl [vmem:[#allocation1] sm:$0xff pattern:$0x73625140] %v3144_v20  ;;  %v2838_v6 = vrot.slane %v498_v5, 9  ;;  %v1412_v5 = vld [vmem:[%s6094_s5 + $0x80] sm:$0xff] }
 0x190   :  { %1552 = vmatpush.msra.mxu3 %v1412_v5 }
 0x191   :  { %502 = vst.msk [vmem:[#allocation2 + $0x5] sm:$0x1] %vm274_vm2, %v2838_v6  ;;  %v1439_v6 = vld [vmem:[%s6094_s5 + $0x158] sm:$0xff] }
 0x196   :  { %v505_v7 = vld [vmem:[#allocation1 + $0x3] ss:$4 sm:$0xff] }
 0x197   :  { %521 = vst.sshfl [vmem:[#allocation1] sm:$0xff pattern:$0x73625140] %v3159_v34  ;;  %506 = vrot.lane.b32.xlu0 %v505_v7, %s2881_s0  ;;  %v1459_v7 = vld [vmem:[%s6094_s5 + $0x1f8] sm:$0xff] }
 0x198   :  { %1577 = vmatpush.msrb.mxu3 %v1459_v7  ;;  %v1468_v7 = vld [vmem:[%s6094_s5 + $0x240] sm:$0xff] }
 0x19e   :  { %v523_v8 = vld [vmem:[#allocation1 + $0x1] ss:$4 sm:$0xff] }
 0x19f   :  { %525 = vst.msk [vmem:[#allocation2 + $0x7] sm:$0x1] %vm274_vm2, %v523_v8  ;;  %v1438_v8 = vld [vmem:[%s6094_s5 + $0x150] sm:$0xff] }
 0x1a0   :  { %526 = vst.sshfl [vmem:[#allocation1] sm:$0xff pattern:$0x73625140] %v3159_v34 }
 0x1a7   :  { %v528_v9 = vld [vmem:[#allocation1 + $0x1] ss:$4 sm:$0xff] }
 0x1a8   :  { %v2840_v10 = vrot.slane %v528_v9, 9  ;;  %535 = vst.sshfl [vmem:[#allocation1] sm:$0xff pattern:$0x73625140] %v3159_v34  ;;  %v1458_v9 = vld [vmem:[%s6094_s5 + $0x1f0] sm:$0xff] }
 0x1a9   :  { %1578 = vmatpush.msrb.mxu3 %v1458_v9  ;;  %v1467_v9 = vld [vmem:[%s6094_s5 + $0x238] sm:$0xff] }
 0x1aa   :  { %531 = vrot.lane.b32.xlu1 %v2840_v10, %s2881_s0  ;;  %v1437_v10 = vld [vmem:[%s6094_s5 + $0x148] sm:$0xff] }
 0x1af   :  { %v537_v11 = vld [vmem:[#allocation1 + $0x2] ss:$4 sm:$0xff] }
 0x1b0   :  { %538 = vrot.lane.b32.xlu0 %v537_v11, %s2882_s3  ;;  %542 = vst.sshfl [vmem:[#allocation1] sm:$0xff pattern:$0x73625140] %v3159_v34  ;;  %v1457_v11 = vld [vmem:[%s6094_s5 + $0x1e8] sm:$0xff] }
 0x1b1   :  { %1579 = vmatpush.msrb.mxu3 %v1457_v11  ;;  %v1495_v11 = vld [vmem:[%s6094_s5 + $0x318] sm:$0xff] }
 0x1b2   :  { %517 = vrot.lane.b32.xlu1 %v2839_v12, %s2883_s25  ;;  %v1436_v12 = vld [vmem:[%s6094_s5 + $0x140] sm:$0xff]  ;;  %1649 = vmatpush.msrb.mxu0 %v1495_v11 }
 0x1b7   :  { %v544_v14 = vld [vmem:[#allocation1 + $0x3] ss:$4 sm:$0xff] }
 0x1b8   :  { %549 = vst.sshfl [vmem:[#allocation1] sm:$0xff pattern:$0x73625140] %v3159_v34  ;;  %545 = vrot.lane.b32.xlu2 %v544_v14, %s2883_s25  ;;  %391 = vrot.lane.b32.xlu0 %v3155_v33, %s2881_s0  ;;  %v1407_v33 = vld [vmem:[%s6094_s5 + $0x58] sm:$0xff]  ;;  %v1406_v34 = vld [vmem:[%s6094_s5 + $0x50] sm:$0xff] }
 0x1b9   :  { %1521 = vmatpush.msra.mxu2 %v1407_v33  ;;  %v1456_v14 = vld [vmem:[%s6094_s5 + $0x1e0] sm:$0xff] }
 0x1ba   :  { %415 = vrot.lane.b32.xlu1 %v2833_v15, %s2881_s0  ;;  %1580 = vmatpush.msrb.mxu3 %v1456_v14  ;;  %v1435_v15 = vld [vmem:[%s6094_s5 + $0x138] sm:$0xff]  ;;  %v1482_v14 = vld [vmem:[%s6094_s5 + $0x2b0] sm:$0xff] }
 0x1bb   :  { %v452_v16 = vpop.permute.xlu2 %451  ;;  %1522 = vmatpush.msra.mxu2 %v1406_v34 }
 0x1bc   :  { %454 = vst.msk [vmem:[#allocation2 + $0x1] sm:$0x1] %vm282_vm3, %v452_v16  ;;  %v1455_v16 = vld [vmem:[%s6094_s5 + $0x1d8] sm:$0xff] }
 0x1bd   :  { %1523 = vmatpush.msra.mxu2 %v1405_v37  ;;  %1581 = vmatpush.msrb.mxu3 %v1455_v16  ;;  %v1465_v16 = vld [vmem:[%s6094_s5 + $0x228] sm:$0xff] }
 0x1bf   :  { %v551_v18 = vld [vmem:[#allocation1 + $0x3] ss:$4 sm:$0xff]  ;;  %1524 = vmatpush.msra.mxu2 %v1404_v40 }
 0x1c0   :  { %567 = vst.sshfl [vmem:[#allocation1] sm:$0xff pattern:$0x73625140] %v3168_v42  ;;  %557 = vrot.lane.b32.xlu2 %v3168_v42, %s2881_s0  ;;  %563 = vrot.lane.b32.xlu0 %v2842_v17, %s2882_s3  ;;  %v2841_v20 = vrot.slane %v551_v18, 9  ;;  %v1434_v17 = vld [vmem:[%s6094_s5 + $0x130] sm:$0xff] }
 0x1c1   :  { %v1454_v18 = vld [vmem:[%s6094_s5 + $0x1d0] sm:$0xff] }
 0x1c2   :  { %400 = vrot.lane.b32.xlu1 %v2832_v19, %s2882_s3  ;;  %555 = vst.msk [vmem:[#allocation2 + $0x9] sm:$0x1] %vm274_vm2, %v2841_v20  ;;  %1582 = vmatpush.msrb.mxu3 %v1454_v18  ;;  %v1433_v20 = vld [vmem:[%s6094_s5 + $0x128] sm:$0xff] }
 0x1c3   :  { %v1493_v18 = vld [vmem:[%s6094_s5 + $0x308] sm:$0xff] }
 0x1c7   :  { %v569_v50 = vld [vmem:[#allocation1 + $0x1] ss:$4 sm:$0xff] }
 0x1c8   :  { %574 = vst.sshfl [vmem:[#allocation1] sm:$0xff pattern:$0x73625140] %v3168_v42  ;;  %422 = vrot.lane.b32.xlu2 %v3175_v44, %s2882_s3 }
 0x1cb   :  { %v468_v21 = vpop.permute.xlu2 %467 }
 0x1cf   :  { %v576_v22 = vld [vmem:[#allocation1 + $0x2] ss:$4 sm:$0xff] }
 0x1d0   :  { %578 = vst.msk [vmem:[#allocation2 + $0xb] sm:$0x1] %vm274_vm2, %v576_v22  ;;  %407 = vrot.lane.b32.xlu2 %v3171_v43, %s2883_s25  ;;  %v1402_v43 = vld [vmem:[%s6094_s5 + $0x30] sm:$0xff]  ;;  %v1452_v22 = vld [vmem:[%s6094_s5 + $0x1c0] sm:$0xff] }
 0x1d1   :  { %579 = vst.sshfl [vmem:[#allocation1] sm:$0xff pattern:$0x73625140] %v3168_v42 }
 0x1d3   :  { %v477_v23 = vpop.permute.xlu2 %476 }
 0x1d4   :  { %479 = vst.msk [vmem:[#allocation2 + $0x3] sm:$0x1] %vm282_vm3, %v477_v23  ;;  %v1431_v23 = vld [vmem:[%s6094_s5 + $0x118] sm:$0xff] }
 0x1d8   :  { %v581_v26 = vld [vmem:[#allocation1 + $0x2] ss:$4 sm:$0xff] }
 0x1d9   :  { %v2843_v27 = vrot.slane %v581_v26, 9  ;;  %588 = vst.sshfl [vmem:[#allocation1] sm:$0xff pattern:$0x73625140] %v3168_v42  ;;  %v459_v28 = vpop.permute.xlu0 %458  ;;  %v1429_v26 = vld [vmem:[%s6094_s5 + $0x108] sm:$0xff] }
 0x1da   :  { %461 = vst.msk [vmem:[#allocation2 + $0x1] sm:$0x1] %vm290_vm4, %v459_v28 }
 0x1db   :  { %584 = vrot.lane.b32.xlu0 %v2843_v27, %s2881_s0  ;;  %470 = vst.msk [vmem:[#allocation2 + $0x1] sm:$0x1] %vm300_vm5, %v468_v21  ;;  %v1432_v21 = vld [vmem:[%s6094_s5 + $0x120] sm:$0xff]  ;;  %v1449_v27 = vld [vmem:[%s6094_s5 + $0x1a8] sm:$0xff] }
 0x1e0   :  { %v590_v36 = vld [vmem:[#allocation1 + $0x3] ss:$4 sm:$0xff] }
 0x1e1   :  { %591 = vrot.lane.b32.xlu1 %v590_v36, %s2882_s3  ;;  %595 = vst.sshfl [vmem:[#allocation1] sm:$0xff pattern:$0x73625140] %v3168_v42  ;;  %v1403_v42 = vld [vmem:[%s6094_s5 + $0x38] sm:$0xff] }
 0x1e2   :  { %1525 = vmatpush.msra.mxu2 %v1403_v42 }
 0x1e3   :  { %431 = vrot.lane.b32.xlu0 %v2834_v38, %s2883_s25 }
 0x1e4   :  { %1526 = vmatpush.msra.mxu2 %v1402_v43  ;;  %v1475_v43 = vld [vmem:[%s6094_s5 + $0x278] sm:$0xff] }
 0x1e6   :  { %1527 = vmatpush.msra.mxu2 %v1401_v46  ;;  %v1491_v46 = vld [vmem:[%s6094_s5 + $0x2f8] sm:$0xff] }
 0x1e8   :  { %v597_v44 = vld [vmem:[#allocation1 + $0x3] ss:$4 sm:$0xff]  ;;  %1528 = vmatpush.msra.mxu2 %v1400_v48 }
 0x1e9   :  { %570 = vrot.lane.b32.xlu1 %v569_v50, %s2883_s25  ;;  %v2844_v45 = vrot.slane %v597_v44, 9  ;;  %v1453_v50 = vld [vmem:[%s6094_s5 + $0x1c8] sm:$0xff]  ;;  %v1474_v44 = vld [vmem:[%s6094_s5 + $0x270] sm:$0xff] }
 0x1ea   :  { %1529 = vmatpush.msra.mxu2 %v1399_v51  ;;  %1583 = vmatpush.msrb.mxu3 %v1453_v50 }
 0x1eb   :  { %600 = vrot.lane.b32.xlu2 %v2844_v45, %s2883_s25  ;;  %v607_v45 = vld [vmem:[%s6090_s1] sm:$0xff] }
 0x1ec   :  { %1530 = vmatpush.msra.mxu2 %v1398_v54  ;;  %1584 = vmatpush.msrb.mxu3 %v1452_v22  ;;  %v1490_v54 = vld [vmem:[%s6094_s5 + $0x2f0] sm:$0xff]  ;;  %v1480_v22 = vld [vmem:[%s6094_s5 + $0x2a0] sm:$0xff] }
 0x1ee   :  { %1531 = vmatpush.msra.mxu2 %v1397_v56  ;;  %v1473_v56 = vld [vmem:[%s6094_s5 + $0x268] sm:$0xff] }
 0x1f0   :  { %1532 = vmatpush.msra.mxu2 %v1396_v59  ;;  %v1488_v59 = vld [vmem:[%s6094_s5 + $0x2e0] sm:$0xff] }
 0x1f2   :  { %1557 = vmatpush.msrb.mxu2 %v1443_v61  ;;  %v1487_v61 = vld [vmem:[%s6094_s5 + $0x2d8] sm:$0xff] }
 0x1f3   :  { %v486_v58 = vpop.permute.xlu1 %485 }
 0x1f4   :  { %488 = vst.msk [vmem:[#allocation2 + $0x3] sm:$0x1] %vm290_vm4, %v486_v58  ;;  %1558 = vmatpush.msrb.mxu2 %v1442_v63  ;;  %v1472_v58 = vld [vmem:[%s6094_s5 + $0x260] sm:$0xff]  ;;  %v1486_v63 = vld [vmem:[%s6094_s5 + $0x2d0] sm:$0xff] }
 0x1f6   :  { %1559 = vmatpush.msrb.mxu2 %v1441_v1 }
 0x1f8   :  { %1560 = vmatpush.msrb.mxu2 %v1440_v4  ;;  %v1485_v4 = vld [vmem:[%s6094_s5 + $0x2c8] sm:$0xff] }
 0x1f9   :  { %v493_v2 = vpop.permute.xlu0 %492 }
 0x1fa   :  { %495 = vst.msk [vmem:[#allocation2 + $0x3] sm:$0x1] %vm300_vm5, %v493_v2  ;;  %1561 = vmatpush.msrb.mxu2 %v1439_v6 }
 0x1fc   :  { %1562 = vmatpush.msrb.mxu2 %v1438_v8  ;;  %v1484_v8 = vld [vmem:[%s6094_s5 + $0x2c0] sm:$0xff] }
 0x1fe   :  { %1563 = vmatpush.msrb.mxu2 %v1437_v10  ;;  %v1483_v10 = vld [vmem:[%s6094_s5 + $0x2b8] sm:$0xff] }
 0x200   :  { %1564 = vmatpush.msrb.mxu2 %v1436_v12  ;;  %v1466_v12 = vld [vmem:[%s6094_s5 + $0x230] sm:$0xff] }
 0x202   :  { %1565 = vmatpush.msrb.mxu2 %v1435_v15  ;;  %v1494_v15 = vld [vmem:[%s6094_s5 + $0x310] sm:$0xff] }
 0x203   :  { %1650 = vmatpush.msrb.mxu0 %v1494_v15  ;;  %v620_v15 = vld [vmem:[%s6093_s4] sm:$0xff] }
 0x204   :  { %1566 = vmatpush.msrb.mxu2 %v1434_v17  ;;  %v1481_v17 = vld [vmem:[%s6094_s5 + $0x2a8] sm:$0xff] }
 0x205   :  { %1651 = vmatpush.msrb.mxu0 %v1493_v18  ;;  %v619_v18 = vld [vmem:[%s6090_s1 + $0x60] sm:$0x3] }
 0x206   :  { %1567 = vmatpush.msrb.mxu2 %v1433_v20 }
 0x208   :  { %1568 = vmatpush.msrb.mxu2 %v1432_v21  ;;  %v1464_v21 = vld [vmem:[%s6094_s5 + $0x220] sm:$0xff] }
 0x209   :  { %v507_v19 = vpop.permute.xlu0 %506 }
 0x20a   :  { %509 = vst.msk [vmem:[#allocation2 + $0x5] sm:$0x1] %vm282_vm3, %v507_v19  ;;  %1569 = vmatpush.msrb.mxu2 %v1431_v23  ;;  %v611_v19 = vld [vmem:[%s6090_s1 + $0x20] sm:$0xff] }
 0x20b   :  { %514 = vst.msk [vmem:[#allocation2 + $0x5] sm:$0x1] %vm290_vm4, %v3219_v13  ;;  %v1451_v13 = vld [vmem:[%s6094_s5 + $0x1b8] sm:$0xff]  ;;  %v1492_v23 = vld [vmem:[%s6094_s5 + $0x300] sm:$0xff] }
 0x20c   :  { %1585 = vmatpush.msrb.mxu3 %v1451_v13  ;;  %1570 = vmatpush.msrb.mxu2 %v1430_v24 }
 0x20d   :  { %1652 = vmatpush.msrb.mxu0 %v1492_v23 }
 0x20e   :  { %1586 = vmatpush.msrb.mxu3 %v1450_v25  ;;  %1571 = vmatpush.msrb.mxu2 %v1429_v26  ;;  %v1463_v25 = vld [vmem:[%s6094_s5 + $0x218] sm:$0xff] }
 0x20f   :  { %v1479_v26 = vld [vmem:[%s6094_s5 + $0x298] sm:$0xff] }
 0x210   :  { %1587 = vmatpush.msrb.mxu3 %v1449_v27  ;;  %1572 = vmatpush.msrb.mxu2 %v1428_v29  ;;  %v1478_v29 = vld [vmem:[%s6094_s5 + $0x290] sm:$0xff] }
 0x212   :  { %v546_v28 = vpop.permute.xlu2 %545  ;;  %1588 = vmatpush.msrb.mxu3 %v1448_v30  ;;  %v1461_v30 = vld [vmem:[%s6094_s5 + $0x208] sm:$0xff] }
 0x214   :  { %1589 = vmatpush.msrb.mxu3 %v1447_v31  ;;  %v1477_v31 = vld [vmem:[%s6094_s5 + $0x288] sm:$0xff] }
 0x216   :  { %1590 = vmatpush.msrb.mxu3 %v1446_v32  ;;  %v1460_v32 = vld [vmem:[%s6094_s5 + $0x200] sm:$0xff] }
 0x218   :  { %1591 = vmatpush.msrb.mxu3 %v1445_v52  ;;  %v635_v52 = vld [vmem:[%s6093_s4 + $0x78] sm:$0xff] }
 0x21a   :  { %v558_v33 = vpop.permute.xlu2 %557  ;;  %1592 = vmatpush.msrb.mxu3 %v1444_v35  ;;  %v613_v35 = vld [vmem:[%s6090_s1 + $0x30] sm:$0xff] }
 0x21b   :  { %560 = vst.msk [vmem:[#allocation2 + $0x9] sm:$0x1] %vm282_vm3, %v558_v33  ;;  %v1476_v33 = vld [vmem:[%s6094_s5 + $0x280] sm:$0xff] }
 0x21c   :  { %v532_v34 = vpop.permute.xlu1 %531 }
 0x21d   :  { %534 = vst.msk [vmem:[#allocation2 + $0x7] sm:$0x1] %vm282_vm3, %v532_v34 }
 0x222   :  { %v539_v36 = vpop.permute.xlu0 %538  ;;  %v423_v39 = vpop.permute.xlu2 %422 }
 0x223   :  { %541 = vst.msk [vmem:[#allocation2 + $0x7] sm:$0x1] %vm290_vm4, %v539_v36 }
 0x224   :  { %548 = vst.msk [vmem:[#allocation2 + $0x7] sm:$0x1] %vm300_vm5, %v546_v28  ;;  %v518_v37 = vpop.permute.xlu1 %517  ;;  %v1462_v28 = vld [vmem:[%s6094_s5 + $0x210] sm:$0xff] }
 0x225   :  { %520 = vst.msk [vmem:[#allocation2 + $0x5] sm:$0x1] %vm300_vm5, %v518_v37 }
 0x22a   :  { %v392_v38 = vpop.permute.xlu0 %391  ;;  %v408_v51 = vpop.permute.xlu2 %407 }
 0x22b   :  { %394 = vst.msk [vmem:[#allocation2 + $0x8] sm:$0x1] %vm282_vm3, %v392_v38 }
 0x22c   :  { %v605_v40 = vld [vmem:[#allocation2] sm:$0xff]  ;;  %v416_v41 = vpop.permute.xlu1 %415 }
 0x22d   :  { %1498 = vst [vmem:[#allocation1] ss:$4 sm:$0xff] %v605_v40  ;;  %v634_v40 = vld [vmem:[%s6093_s4 + $0x70] sm:$0xff] }
 0x22e   :  { %418 = vst.msk [vmem:[#allocation2 + $0xa] sm:$0x1] %vm282_vm3, %v416_v41 }
 0x22f   :  { %425 = vst.msk [vmem:[#allocation2 + $0xa] sm:$0x1] %vm290_vm4, %v423_v39 }
 0x232   :  { %v564_v42 = vpop.permute.xlu0 %563 }
 0x233   :  { %566 = vst.msk [vmem:[#allocation2 + $0x9] sm:$0x1] %vm290_vm4, %v564_v42 }
 0x234   :  { %v401_v47 = vpop.permute.xlu1 %400  ;;  %v1501_v48 = vld.sshfl [vmem:[#allocation1] sm:$0xff pattern:$0x73625140]  ;;  %v1502_v49 = vld.sshfl [vmem:[#allocation1 + $0x8] sm:$0xff pattern:$0x73625140] }
 0x235   :  { %403 = vst.msk [vmem:[#allocation2 + $0x8] sm:$0x1] %vm290_vm4, %v401_v47  ;;  %1533 = vmatmul.f32.vlgmr.msra.gmra.mxu2 %v1501_v48  ;;  %1553 = vmatmul.f32.vlgmr.msra.gmra.mxu3 %v1502_v49  ;;  %v1503_v53 = vld.sshfl [vmem:[#allocation1 + $0x10] sm:$0xff pattern:$0x73625140]  ;;  %v629_v48 = vld [vmem:[%s6093_s4 + $0x48] sm:$0xff] }
 0x236   :  { %410 = vst.msk [vmem:[#allocation2 + $0x8] sm:$0x1] %vm300_vm5, %v408_v51  ;;  %1597 = vmatpush.msra.mxu2 %v1475_v43  ;;  %v1504_v55 = vld.sshfl [vmem:[#allocation1 + $0x18] sm:$0xff pattern:$0x73625140]  ;;  %1617 = vmatpush.msra.mxu3 %v1491_v46  ;;  %v633_v43 = vld [vmem:[%s6093_s4 + $0x68] sm:$0xff] }
 0x237   :  { %1703 = vst [vmem:[#allocation1] ss:$4 sm:$0xff] %v607_v45  ;;  %v631_v45 = vld [vmem:[%s6093_s4 + $0x58] sm:$0xff]  ;;  %v630_v47 = vld [vmem:[%s6093_s4 + $0x50] sm:$0xff]  ;;  %v615_v49 = vld [vmem:[%s6090_s1 + $0x40] sm:$0xff] }
 0x238   :  { %1598 = vmatpush.msra.mxu2 %v1474_v44  ;;  %1618 = vmatpush.msra.mxu3 %v1490_v54  ;;  %v632_v44 = vld [vmem:[%s6093_s4 + $0x60] sm:$0xff] }
 0x23a   :  { %1599 = vmatpush.msra.mxu2 %v1473_v56  ;;  %1619 = vmatpush.msra.mxu3 %v1489_v57  ;;  %v627_v57 = vld [vmem:[%s6093_s4 + $0x38] sm:$0xff] }
 0x23c   :  { %1600 = vmatpush.msra.mxu2 %v1472_v58  ;;  %1620 = vmatpush.msra.mxu3 %v1488_v59  ;;  %v626_v59 = vld [vmem:[%s6093_s4 + $0x30] sm:$0xff] }
 0x23d   :  { %1573 = vmatmul.f32.vlgmr.msrb.gmra.mxu2 %v1503_v53  ;;  %1593 = vmatmul.f32.vlgmr.msrb.gmra.mxu3 %v1504_v55  ;;  %v628_v55 = vld [vmem:[%s6093_s4 + $0x40] sm:$0xff] }
 0x23e   :  { %1601 = vmatpush.msra.mxu2 %v1471_v60  ;;  %1621 = vmatpush.msra.mxu3 %v1487_v61  ;;  %v3504_v1 = vld.sshfl [vmem:[#allocation1] sm:$0xff pattern:$0x73625140]  ;;  %v3506_v2 = vld.sshfl [vmem:[#allocation1 + $0x8] sm:$0xff pattern:$0x73625140] }
 0x23f   :  { %v3514_v5 = vld.sshfl [vmem:[#allocation1 + $0x10] sm:$0xff pattern:$0x73625140]  ;;  %v3516_v6 = vld.sshfl [vmem:[#allocation1 + $0x18] sm:$0xff pattern:$0x73625140] }
 0x240   :  { %1602 = vmatpush.msra.mxu2 %v1470_v62  ;;  %1622 = vmatpush.msra.mxu3 %v1486_v63  ;;  %1714 = vst [vmem:[#allocation1] ss:$4 sm:$0xff] %v609_v0  ;;  %v625_v60 = vld [vmem:[%s6093_s4 + $0x28] sm:$0xff]  ;;  %v624_v61 = vld [vmem:[%s6093_s4 + $0x20] sm:$0xff]  ;;  %v617_v63 = vld [vmem:[%s6090_s1 + $0x50] sm:$0xff] }
 0x242   :  { %1603 = vmatpush.msra.mxu2 %v1469_v3  ;;  %1623 = vmatpush.msra.mxu3 %v1485_v4  ;;  %v608_v4 = vld [vmem:[%s6090_s1 + $0x8] sm:$0xff] }
 0x244   :  { %1604 = vmatpush.msra.mxu2 %v1468_v7  ;;  %1624 = vmatpush.msra.mxu3 %v1484_v8  ;;  %v623_v7 = vld [vmem:[%s6093_s4 + $0x18] sm:$0xff] }
 0x245   :  { %v601_v39 = vpop.permute.xlu2 %600 }
 0x246   :  { %1605 = vmatpush.msra.mxu2 %v1467_v9  ;;  %1625 = vmatpush.msra.mxu3 %v1483_v10 }
 0x247   :  { %v3554_v20 = vld.sshfl [vmem:[#allocation1 + $0x8] sm:$0xff pattern:$0x73625140]  ;;  %v3556_v50 = vld.sshfl [vmem:[#allocation1 + $0x10] sm:$0xff pattern:$0x73625140] }
 0x248   :  { %1606 = vmatpush.msra.mxu2 %v1466_v12  ;;  %1626 = vmatpush.msra.mxu3 %v1482_v14  ;;  %v3567_v13 = vld.sshfl [vmem:[#allocation1 + $0x18] sm:$0xff pattern:$0x73625140]  ;;  %v3569_v24 = vld.sshfl [vmem:[#allocation1] sm:$0xff pattern:$0x73625140] }
 0x249   :  { %1724 = vst [vmem:[#allocation1] ss:$4 sm:$0xff] %v611_v19  ;;  %v622_v12 = vld [vmem:[%s6093_s4 + $0x10] sm:$0xff]  ;;  %v621_v14 = vld [vmem:[%s6093_s4 + $0x8] sm:$0xff] }
 0x24a   :  { %1607 = vmatpush.msra.mxu2 %v1465_v16  ;;  %1627 = vmatpush.msra.mxu3 %v1481_v17  ;;  %v699_v16 = vld [vmem:[%s6093_s4 + $0x278] sm:$0xff]  ;;  %v698_v19 = vld [vmem:[%s6093_s4 + $0x270] sm:$0xff] }
 0x24c   :  { %1608 = vmatpush.msra.mxu2 %v1464_v21  ;;  %1628 = vmatpush.msra.mxu3 %v1480_v22 }
 0x24d   :  { %v585_v27 = vpop.permute.xlu0 %584 }
 0x24e   :  { %587 = vst.msk [vmem:[#allocation2 + $0xb] sm:$0x1] %vm282_vm3, %v585_v27  ;;  %1609 = vmatpush.msra.mxu2 %v1463_v25  ;;  %1629 = vmatpush.msra.mxu3 %v1479_v26  ;;  %v697_v25 = vld [vmem:[%s6093_s4 + $0x268] sm:$0xff]  ;;  %v695_v26 = vld [vmem:[%s6093_s4 + $0x258] sm:$0xff]  ;;  %v694_v27 = vld [vmem:[%s6093_s4 + $0x250] sm:$0xff] }
 0x250   :  { %1610 = vmatpush.msra.mxu2 %v1462_v28  ;;  %1630 = vmatpush.msra.mxu3 %v1478_v29  ;;  %v3599_v34 = vld.sshfl [vmem:[#allocation1 + $0x8] sm:$0xff pattern:$0x73625140]  ;;  %v3604_v37 = vld.sshfl [vmem:[#allocation1 + $0x10] sm:$0xff pattern:$0x73625140] }
 0x251   :  { %v3606_v38 = vld.sshfl [vmem:[#allocation1 + $0x18] sm:$0xff pattern:$0x73625140]  ;;  %v3612_v41 = vld.sshfl [vmem:[#allocation1] sm:$0xff pattern:$0x73625140] }
 0x252   :  { %1611 = vmatpush.msra.mxu2 %v1461_v30  ;;  %1631 = vmatpush.msra.mxu3 %v1477_v31  ;;  %1734 = vst [vmem:[#allocation1] ss:$4 sm:$0xff] %v613_v35  ;;  %v693_v28 = vld [vmem:[%s6093_s4 + $0x248] sm:$0xff]  ;;  %v692_v29 = vld [vmem:[%s6093_s4 + $0x240] sm:$0xff]  ;;  %v691_v30 = vld [vmem:[%s6093_s4 + $0x238] sm:$0xff] }
 0x253   :  { %v592_v36 = vpop.permute.xlu1 %591  ;;  %v690_v31 = vld [vmem:[%s6093_s4 + $0x230] sm:$0xff] }
 0x254   :  { %594 = vst.msk [vmem:[#allocation2 + $0xb] sm:$0x1] %vm290_vm4, %v592_v36  ;;  %1612 = vmatpush.msra.mxu2 %v1460_v32  ;;  %1632 = vmatpush.msra.mxu3 %v1476_v33  ;;  %v689_v32 = vld [vmem:[%s6093_s4 + $0x228] sm:$0xff]  ;;  %v688_v33 = vld [vmem:[%s6093_s4 + $0x220] sm:$0xff]  ;;  %v686_v35 = vld [vmem:[%s6093_s4 + $0x210] sm:$0xff] }
 0x255   :  { %603 = vst.msk [vmem:[#allocation2 + $0xb] sm:$0x1] %vm300_vm5, %v601_v39  ;;  %v432_v42 = vpop.permute.xlu0 %431  ;;  %v610_v36 = vld [vmem:[%s6090_s1 + $0x18] sm:$0xff] }
 0x256   :  { %1821 = vmatpush.msrb.mxu2 %v635_v52  ;;  %434 = vst.msk [vmem:[#allocation2 + $0xa] sm:$0x1] %vm300_vm5, %v432_v42  ;;  %v687_v52 = vld [vmem:[%s6093_s4 + $0x218] sm:$0xff] }
 0x258   :  { %1822 = vmatpush.msrb.mxu2 %v634_v40 }
 0x259   :  { %v3635_v51 = vld.sshfl [vmem:[#allocation1 + $0x8] sm:$0xff pattern:$0x73625140]  ;;  %v3637_v53 = vld.sshfl [vmem:[#allocation1 + $0x10] sm:$0xff pattern:$0x73625140] }
 0x25a   :  { %1823 = vmatpush.msrb.mxu2 %v633_v43  ;;  %v3639_v54 = vld.sshfl [vmem:[#allocation1 + $0x18] sm:$0xff pattern:$0x73625140]  ;;  %v3644_v56 = vld.sshfl [vmem:[#allocation1] sm:$0xff pattern:$0x73625140] }
 0x25b   :  { %v571_v46 = vpop.permute.xlu1 %570  ;;  %1744 = vst [vmem:[#allocation1] ss:$4 sm:$0xff] %v615_v49  ;;  %v760_v49 = vld [vmem:[%s6093_s4 + $0x460] sm:$0xff] }
 0x25c   :  { %1824 = vmatpush.msrb.mxu2 %v632_v44  ;;  %573 = vst.msk [vmem:[#allocation2 + $0x9] sm:$0x1] %vm300_vm5, %v571_v46  ;;  %v685_v44 = vld [vmem:[%s6093_s4 + $0x208] sm:$0xff]  ;;  %v763_v46 = vld [vmem:[%s6093_s4 + $0x478] sm:$0xff] }
 0x25e   :  { %1825 = vmatpush.msrb.mxu2 %v631_v45  ;;  %v684_v45 = vld [vmem:[%s6093_s4 + $0x200] sm:$0xff] }
 0x260   :  { %1826 = vmatpush.msrb.mxu2 %v630_v47  ;;  %v762_v47 = vld [vmem:[%s6093_s4 + $0x470] sm:$0xff] }
 0x262   :  { %1827 = vmatpush.msrb.mxu2 %v629_v48  ;;  %v3658_v62 = vld.sshfl [vmem:[#allocation1 + $0x8] sm:$0xff pattern:$0x73625140]  ;;  %v3663_v0 = vld.sshfl [vmem:[#allocation1 + $0x10] sm:$0xff pattern:$0x73625140] }
 0x263   :  { %v606_v58 = vld [vmem:[#allocation2 + $0x8] sm:$0x3f]  ;;  %v3665_v3 = vld.sshfl [vmem:[#allocation1 + $0x18] sm:$0xff pattern:$0x73625140]  ;;  %v761_v48 = vld [vmem:[%s6093_s4 + $0x468] sm:$0xff] }
 0x264   :  { %1828 = vmatpush.msrb.mxu2 %v628_v55  ;;  %1500 = vst [vmem:[#allocation1 + $0x20] ss:$4 sm:$0xff] %v606_v58  ;;  %v3673_v8 = vld.sshfl [vmem:[#allocation1] sm:$0xff pattern:$0x73625140]  ;;  %v759_v55 = vld [vmem:[%s6093_s4 + $0x458] sm:$0xff] }
 0x265   :  { %1754 = vst [vmem:[#allocation1] ss:$4 sm:$0xff] %v617_v63  ;;  %v758_v58 = vld [vmem:[%s6093_s4 + $0x450] sm:$0xff]  ;;  %v756_v63 = vld [vmem:[%s6093_s4 + $0x440] sm:$0xff] }
 0x266   :  { %1829 = vmatpush.msrb.mxu2 %v627_v57  ;;  %v651_v57 = vld [vmem:[%s6093_s4 + $0xf8] sm:$0xff] }
 0x267   :  { %1841 = vmatpush.msrb.mxu3 %v651_v57  ;;  %v824_v57 = vld [vmem:[%s6093_s4 + $0x660] sm:$0xff] }
 0x268   :  { %1830 = vmatpush.msrb.mxu2 %v626_v59  ;;  %v650_v59 = vld [vmem:[%s6093_s4 + $0xf0] sm:$0xff] }
 0x269   :  { %1842 = vmatpush.msrb.mxu3 %v650_v59  ;;  %v637_v59 = vld [vmem:[%s6093_s4 + $0x88] sm:$0xff] }
 0x26a   :  { %1831 = vmatpush.msrb.mxu2 %v625_v60  ;;  %v757_v60 = vld [vmem:[%s6093_s4 + $0x448] sm:$0xff] }
 0x26b   :  { %v1505_v9 = vld.sshfl [vmem:[#allocation1 + $0x20] sm:$0xff pattern:$0x73625140]  ;;  %v1506_v10 = vld.sshfl [vmem:[#allocation1 + $0x28] sm:$0xff pattern:$0x73625140] }
 0x26c   :  { %1832 = vmatpush.msrb.mxu2 %v624_v61  ;;  %1633 = vmatmul.f32.vlgmr.msra.gmra.mxu3 %v1506_v10  ;;  %v1507_v11 = vld.sshfl [vmem:[#allocation1 + $0x30] sm:$0xff pattern:$0x73625140]  ;;  %v3688_v17 = vld.sshfl [vmem:[#allocation1 + $0x8] sm:$0xff pattern:$0x73625140] }
 0x26d   :  { %1613 = vmatmul.f32.vlgmr.msra.gmra.mxu2 %v1505_v9  ;;  %2845 = vmatmul.msk.f32.vlgmr.msrb.gmra.mxu0 %vm1514_vm6, %v1507_v11  ;;  %1705 = vst [vmem:[#allocation1 + $0x20] ss:$4 sm:$0xff] %v608_v4  ;;  %v3697_v21 = vld.sshfl [vmem:[#allocation1 + $0x10] sm:$0xff pattern:$0x73625140]  ;;  %v649_v61 = vld [vmem:[%s6093_s4 + $0xe8] sm:$0xff] }
 0x26e   :  { %1833 = vmatpush.msrb.mxu2 %v623_v7  ;;  %v3699_v22 = vld.sshfl [vmem:[#allocation1 + $0x18] sm:$0xff pattern:$0x73625140]  ;;  %v3701_v23 = vld.sshfl [vmem:[#allocation1] sm:$0xff pattern:$0x73625140]  ;;  %1843 = vmatpush.msrb.mxu3 %v649_v61 }
 0x26f   :  { %1764 = vst [vmem:[#allocation1] ss:$4 sm:$0xff] %v619_v18  ;;  %v648_v4 = vld [vmem:[%s6093_s4 + $0xe0] sm:$0xff]  ;;  %v755_v7 = vld [vmem:[%s6093_s4 + $0x438] sm:$0xff]  ;;  %v754_v9 = vld [vmem:[%s6093_s4 + $0x430] sm:$0xff] }
 0x270   :  { %1834 = vmatpush.msrb.mxu2 %v622_v12  ;;  %1844 = vmatpush.msrb.mxu3 %v648_v4  ;;  %v647_v10 = vld [vmem:[%s6093_s4 + $0xd8] sm:$0xff]  ;;  %v646_v12 = vld [vmem:[%s6093_s4 + $0xd0] sm:$0xff]  ;;  %v665_v18 = vld [vmem:[%s6093_s4 + $0x168] sm:$0xff] }
 0x271   :  { %v667_v11 = vld [vmem:[%s6093_s4 + $0x178] sm:$0xff]  ;;  %v636_v4 = vld [vmem:[%s6093_s4 + $0x80] sm:$0xff] }
 0x272   :  { %1835 = vmatpush.msrb.mxu2 %v621_v14  ;;  %1845 = vmatpush.msrb.mxu3 %v647_v10  ;;  %v666_v14 = vld [vmem:[%s6093_s4 + $0x170] sm:$0xff]  ;;  %v823_v61 = vld [vmem:[%s6093_s4 + $0x658] sm:$0xff] }
 0x273   :  { %1861 = vmatpush.msra.mxu0 %v667_v11  ;;  %v715_v10 = vld [vmem:[%s6093_s4 + $0x2f8] sm:$0xff]  ;;  %v1663_v11 = vld [vmem:[%s6096_s7] sm:$0xff] }
 0x274   :  { %1836 = vmatpush.msrb.mxu2 %v620_v15  ;;  %v3742_v39 = vld.sshfl [vmem:[#allocation1 + $0x28] sm:$0xff pattern:$0x73625140]  ;;  %v3744_v40 = vld.sshfl [vmem:[#allocation1 + $0x30] sm:$0xff pattern:$0x73625140]  ;;  %1846 = vmatpush.msrb.mxu3 %v646_v12 }
 0x275   :  { %1837 = vmatmul.f32.vlgmr.msrb.gmra.mxu2 %v3504_v1  ;;  %v696_v1 = vld [vmem:[%s6093_s4 + $0x260] sm:$0xff]  ;;  %v3746_v43 = vld.sshfl [vmem:[#allocation1 + $0x38] sm:$0xff pattern:$0x73625140]  ;;  %v753_v15 = vld [vmem:[%s6093_s4 + $0x428] sm:$0xff]  ;;  %1862 = vmatpush.msra.mxu0 %v666_v14 }
 0x276   :  { %1901 = vmatpush.msra.mxu2 %v699_v16  ;;  %v1710_v42 = vld.sshfl [vmem:[#allocation1 + $0x20] sm:$0xff pattern:$0x73625140]  ;;  %v645_v16 = vld [vmem:[%s6093_s4 + $0xc8] sm:$0xff]  ;;  %v655_v12 = vld [vmem:[%s6093_s4 + $0x118] sm:$0xff] }
 0x277   :  { %1715 = vst [vmem:[#allocation1 + $0x20] ss:$4 sm:$0xff] %v610_v36  ;;  %1847 = vmatpush.msrb.mxu3 %v645_v16  ;;  %1863 = vmatpush.msra.mxu0 %v665_v18  ;;  %v640_v36 = vld [vmem:[%s6093_s4 + $0xa0] sm:$0xff]  ;;  %v683_v14 = vld [vmem:[%s6093_s4 + $0x1f8] sm:$0xff]  ;;  %v821_v16 = vld [vmem:[%s6093_s4 + $0x648] sm:$0xff] }
 0x278   :  { %1902 = vmatpush.msra.mxu2 %v698_v19  ;;  %v752_v19 = vld [vmem:[%s6093_s4 + $0x420] sm:$0xff]  ;;  %v654_v18 = vld [vmem:[%s6093_s4 + $0x110] sm:$0xff] }
 0x27a   :  { %1903 = vmatpush.msra.mxu2 %v697_v25  ;;  %v644_v25 = vld [vmem:[%s6093_s4 + $0xc0] sm:$0xff] }
 0x27b   :  { %1848 = vmatpush.msrb.mxu3 %v644_v25  ;;  %v713_v25 = vld [vmem:[%s6093_s4 + $0x2e8] sm:$0xff] }
 0x27c   :  { %1904 = vmatpush.msra.mxu2 %v696_v1  ;;  %v664_v1 = vld [vmem:[%s6093_s4 + $0x160] sm:$0xff] }
 0x27d   :  { %1864 = vmatpush.msra.mxu0 %v664_v1  ;;  %v820_v1 = vld [vmem:[%s6093_s4 + $0x640] sm:$0xff] }
 0x27e   :  { %1905 = vmatpush.msra.mxu2 %v695_v26  ;;  %v751_v26 = vld [vmem:[%s6093_s4 + $0x418] sm:$0xff] }
 0x280   :  { %1906 = vmatpush.msra.mxu2 %v694_v27  ;;  %v643_v27 = vld [vmem:[%s6093_s4 + $0xb8] sm:$0xff] }
 0x281   :  { %1849 = vmatpush.msrb.mxu3 %v643_v27  ;;  %v681_v27 = vld [vmem:[%s6093_s4 + $0x1e8] sm:$0xff] }
 0x282   :  { %1907 = vmatpush.msra.mxu2 %v693_v28  ;;  %v663_v28 = vld [vmem:[%s6093_s4 + $0x158] sm:$0xff] }
 0x283   :  { %1865 = vmatpush.msra.mxu0 %v663_v28  ;;  %v712_v28 = vld [vmem:[%s6093_s4 + $0x2e0] sm:$0xff] }
 0x284   :  { %1908 = vmatpush.msra.mxu2 %v692_v29  ;;  %v750_v29 = vld [vmem:[%s6093_s4 + $0x410] sm:$0xff] }
 0x286   :  { %1909 = vmatpush.msra.mxu2 %v691_v30  ;;  %v642_v30 = vld [vmem:[%s6093_s4 + $0xb0] sm:$0xff] }
 0x287   :  { %1850 = vmatpush.msrb.mxu3 %v642_v30  ;;  %v652_v30 = vld [vmem:[%s6093_s4 + $0x100] sm:$0xff] }
 0x288   :  { %1910 = vmatpush.msra.mxu2 %v690_v31  ;;  %v662_v31 = vld [vmem:[%s6093_s4 + $0x150] sm:$0xff] }
 0x289   :  { %1866 = vmatpush.msra.mxu0 %v662_v31  ;;  %v680_v31 = vld [vmem:[%s6093_s4 + $0x1e0] sm:$0xff] }
 0x28a   :  { %1911 = vmatpush.msra.mxu2 %v689_v32  ;;  %v749_v32 = vld [vmem:[%s6093_s4 + $0x408] sm:$0xff] }
 0x28c   :  { %1912 = vmatpush.msra.mxu2 %v688_v33  ;;  %v641_v33 = vld [vmem:[%s6093_s4 + $0xa8] sm:$0xff] }
 0x28d   :  { %1851 = vmatpush.msrb.mxu3 %v641_v33  ;;  %v731_v33 = vld [vmem:[%s6093_s4 + $0x378] sm:$0xff] }
 0x28e   :  { %1913 = vmatpush.msra.mxu2 %v687_v52  ;;  %v661_v52 = vld [vmem:[%s6093_s4 + $0x148] sm:$0xff] }
 0x28f   :  { %1867 = vmatpush.msra.mxu0 %v661_v52  ;;  %1852 = vmatpush.msrb.mxu3 %v640_v36  ;;  %v818_v52 = vld [vmem:[%s6093_s4 + $0x630] sm:$0xff] }
 0x290   :  { %1914 = vmatpush.msra.mxu2 %v686_v35  ;;  %v748_v35 = vld [vmem:[%s6093_s4 + $0x400] sm:$0xff]  ;;  %v710_v36 = vld [vmem:[%s6093_s4 + $0x2d0] sm:$0xff] }
 0x292   :  { %1915 = vmatpush.msra.mxu2 %v685_v44  ;;  %v827_v44 = vld [vmem:[%s6093_s4 + $0x678] sm:$0xff] }
 0x294   :  { %1916 = vmatpush.msra.mxu2 %v684_v45  ;;  %v826_v45 = vld [vmem:[%s6093_s4 + $0x670] sm:$0xff] }
 0x295   :  { %1917 = vmatmul.f32.vlgmr.msra.gmra.mxu2 %v1710_v42  ;;  %v660_v42 = vld [vmem:[%s6093_s4 + $0x140] sm:$0xff] }
 0x296   :  { %1981 = vmatpush.msrb.mxu2 %v763_v46  ;;  %1868 = vmatpush.msra.mxu0 %v660_v42  ;;  %v639_v46 = vld [vmem:[%s6093_s4 + $0x98] sm:$0xff]  ;;  %v730_v42 = vld [vmem:[%s6093_s4 + $0x370] sm:$0xff] }
 0x297   :  { %1853 = vmatpush.msrb.mxu3 %v639_v46  ;;  %v709_v46 = vld [vmem:[%s6093_s4 + $0x2c8] sm:$0xff] }
 0x298   :  { %1982 = vmatpush.msrb.mxu2 %v762_v47  ;;  %v659_v47 = vld [vmem:[%s6093_s4 + $0x138] sm:$0xff] }
 0x299   :  { %1869 = vmatpush.msra.mxu0 %v659_v47  ;;  %v729_v47 = vld [vmem:[%s6093_s4 + $0x368] sm:$0xff] }
 0x29a   :  { %1983 = vmatpush.msrb.mxu2 %v761_v48  ;;  %v825_v48 = vld [vmem:[%s6093_s4 + $0x668] sm:$0xff] }
 0x29c   :  { %1984 = vmatpush.msrb.mxu2 %v760_v49  ;;  %v638_v49 = vld [vmem:[%s6093_s4 + $0x90] sm:$0xff] }
 0x29d   :  { %1854 = vmatpush.msrb.mxu3 %v638_v49  ;;  %v708_v49 = vld [vmem:[%s6093_s4 + $0x2c0] sm:$0xff] }
 0x29e   :  { %1985 = vmatpush.msrb.mxu2 %v759_v55  ;;  %v658_v55 = vld [vmem:[%s6093_s4 + $0x130] sm:$0xff] }
 0x29f   :  { %1870 = vmatpush.msra.mxu0 %v658_v55  ;;  %1855 = vmatpush.msrb.mxu3 %v637_v59  ;;  %v815_v55 = vld [vmem:[%s6093_s4 + $0x618] sm:$0xff] }
 0x2a0   :  { %1986 = vmatpush.msrb.mxu2 %v758_v58  ;;  %v1665_v58 = vld [vmem:[%s6096_s7 + $0x10] sm:$0xff]  ;;  %v707_v59 = vld [vmem:[%s6093_s4 + $0x2b8] sm:$0xff] }
 0x2a1   :  { %1856 = vmatpush.msrb.mxu3 %v636_v4  ;;  %v813_v4 = vld [vmem:[%s6093_s4 + $0x608] sm:$0xff] }
 0x2a2   :  { %1987 = vmatpush.msrb.mxu2 %v757_v60  ;;  %v657_v60 = vld [vmem:[%s6093_s4 + $0x128] sm:$0xff]  ;;  %1857 = vmatmul.f32.vlgmr.msrb.gmra.mxu3 %v3506_v2  ;;  %v675_v2 = vld [vmem:[%s6093_s4 + $0x1b8] sm:$0xff] }
 0x2a3   :  { %1871 = vmatpush.msra.mxu0 %v657_v60  ;;  %1921 = vmatpush.msra.mxu3 %v715_v10  ;;  %v814_v60 = vld [vmem:[%s6093_s4 + $0x610] sm:$0xff]  ;;  %v705_v10 = vld [vmem:[%s6093_s4 + $0x2a8] sm:$0xff] }
 0x2a4   :  { %1988 = vmatpush.msrb.mxu2 %v756_v63  ;;  %v1664_v63 = vld [vmem:[%s6096_s7 + $0x8] sm:$0xff] }
 0x2a6   :  { %1989 = vmatpush.msrb.mxu2 %v755_v7  ;;  %v656_v7 = vld [vmem:[%s6093_s4 + $0x120] sm:$0xff] }
 0x2a7   :  { %1872 = vmatpush.msra.mxu0 %v656_v7  ;;  %v726_v7 = vld [vmem:[%s6093_s4 + $0x350] sm:$0xff] }
 0x2a8   :  { %1990 = vmatpush.msrb.mxu2 %v754_v9  ;;  %v822_v9 = vld [vmem:[%s6093_s4 + $0x650] sm:$0xff] }
 0x2a9   :  { %1873 = vmatpush.msra.mxu0 %v655_v12  ;;  %v725_v12 = vld [vmem:[%s6093_s4 + $0x348] sm:$0xff] }
 0x2aa   :  { %1991 = vmatpush.msrb.mxu2 %v753_v15  ;;  %v714_v15 = vld [vmem:[%s6093_s4 + $0x2f0] sm:$0xff] }
 0x2ab   :  { %1922 = vmatpush.msra.mxu3 %v714_v15  ;;  %1874 = vmatpush.msra.mxu0 %v654_v18  ;;  %v1720_v15 = vld.sshfl [vmem:[#allocation1 + $0x20] sm:$0xff pattern:$0x73625140]  ;;  %v889_v18 = vld [vmem:[%s6093_s4 + $0x868] sm:$0xff] }
 0x2ac   :  { %1992 = vmatpush.msrb.mxu2 %v752_v19  ;;  %v682_v19 = vld [vmem:[%s6093_s4 + $0x1f0] sm:$0xff] }
 0x2ad   :  { %1923 = vmatpush.msra.mxu3 %v713_v25  ;;  %v704_v25 = vld [vmem:[%s6093_s4 + $0x2a0] sm:$0xff] }
 0x2ae   :  { %1993 = vmatpush.msrb.mxu2 %v751_v26  ;;  %v653_v26 = vld [vmem:[%s6093_s4 + $0x108] sm:$0xff] }
 0x2af   :  { %1875 = vmatpush.msra.mxu0 %v653_v26  ;;  %1924 = vmatpush.msra.mxu3 %v712_v28  ;;  %v887_v26 = vld [vmem:[%s6093_s4 + $0x858] sm:$0xff] }
 0x2b0   :  { %1994 = vmatpush.msrb.mxu2 %v750_v29  ;;  %v819_v29 = vld [vmem:[%s6093_s4 + $0x638] sm:$0xff] }
 0x2b1   :  { %1876 = vmatpush.msra.mxu0 %v652_v30  ;;  %v703_v28 = vld [vmem:[%s6093_s4 + $0x298] sm:$0xff] }
 0x2b2   :  { %1995 = vmatpush.msrb.mxu2 %v749_v32  ;;  %v711_v32 = vld [vmem:[%s6093_s4 + $0x2d8] sm:$0xff]  ;;  %1877 = vmatmul.f32.vlgmr.msra.gmra.mxu0 %v3514_v5  ;;  %v888_v5 = vld [vmem:[%s6093_s4 + $0x860] sm:$0xff] }
 0x2b3   :  { %1925 = vmatpush.msra.mxu3 %v711_v32  ;;  %1941 = vmatpush.msrb.mxu0 %v731_v33  ;;  %v671_v30 = vld [vmem:[%s6093_s4 + $0x198] sm:$0xff]  ;;  %v702_v32 = vld [vmem:[%s6093_s4 + $0x290] sm:$0xff] }
 0x2b4   :  { %1996 = vmatpush.msrb.mxu2 %v748_v35  ;;  %v679_v35 = vld [vmem:[%s6093_s4 + $0x1d8] sm:$0xff]  ;;  %v722_v33 = vld [vmem:[%s6093_s4 + $0x330] sm:$0xff] }
 0x2b5   :  { %1997 = vmatmul.f32.vlgmr.msrb.gmra.mxu2 %v3569_v24  ;;  %v1666_v24 = vld [vmem:[%s6096_s7 + $0x18] sm:$0xff]  ;;  %1926 = vmatpush.msra.mxu3 %v710_v36  ;;  %v721_v36 = vld [vmem:[%s6093_s4 + $0x328] sm:$0xff] }
 0x2b6   :  { %2061 = vmatpush.msra.mxu2 %v827_v44  ;;  %1682 = vmatpush.msrb.mxu1 %v1666_v24  ;;  %v817_v44 = vld [vmem:[%s6093_s4 + $0x628] sm:$0xff] }
 0x2b7   :  { %1942 = vmatpush.msrb.mxu0 %v730_v42  ;;  %v677_v24 = vld [vmem:[%s6093_s4 + $0x1c8] sm:$0xff]  ;;  %1927 = vmatpush.msra.mxu3 %v709_v46  ;;  %v700_v46 = vld [vmem:[%s6093_s4 + $0x280] sm:$0xff] }
 0x2b8   :  { %2062 = vmatpush.msra.mxu2 %v826_v45  ;;  %1683 = vmatpush.msrb.mxu1 %v1665_v58  ;;  %v678_v45 = vld [vmem:[%s6093_s4 + $0x1d0] sm:$0xff]  ;;  %v676_v58 = vld [vmem:[%s6093_s4 + $0x1c0] sm:$0xff]  ;;  %v885_v42 = vld [vmem:[%s6093_s4 + $0x848] sm:$0xff] }
 0x2b9   :  { %1943 = vmatpush.msrb.mxu0 %v729_v47  ;;  %1928 = vmatpush.msra.mxu3 %v708_v49  ;;  %v720_v47 = vld [vmem:[%s6093_s4 + $0x320] sm:$0xff]  ;;  %v1554_v49 = vpop.f32.mrf.mxu3 }
 0x2ba   :  { %2063 = vmatpush.msra.mxu2 %v825_v48  ;;  %1684 = vmatpush.msrb.mxu1 %v1664_v63  ;;  %v816_v48 = vld [vmem:[%s6093_s4 + $0x620] sm:$0xff]  ;;  %v706_v63 = vld [vmem:[%s6093_s4 + $0x2b0] sm:$0xff] }
 0x2bb   :  { %1929 = vmatpush.msra.mxu3 %v707_v59  ;;  %v778_v59 = vld [vmem:[%s6093_s4 + $0x4f0] sm:$0xff] }
 0x2bc   :  { %2064 = vmatpush.msra.mxu2 %v824_v57  ;;  %1685 = vmatpush.msrb.mxu1 %v1663_v11  ;;  %v728_v57 = vld [vmem:[%s6093_s4 + $0x360] sm:$0xff] }
 0x2bd   :  { %1944 = vmatpush.msrb.mxu0 %v728_v57  ;;  %v812_v11 = vld [vmem:[%s6093_s4 + $0x600] sm:$0xff]  ;;  %1930 = vmatpush.msra.mxu3 %v706_v63  ;;  %v719_v57 = vld [vmem:[%s6093_s4 + $0x318] sm:$0xff]  ;;  %v717_v63 = vld [vmem:[%s6093_s4 + $0x308] sm:$0xff] }
 0x2be   :  { %2065 = vmatpush.msra.mxu2 %v823_v61  ;;  %1881 = vmatpush.msra.mxu1 %v683_v14  ;;  %v727_v61 = vld [vmem:[%s6093_s4 + $0x358] sm:$0xff] }
 0x2bf   :  { %1945 = vmatpush.msrb.mxu0 %v727_v61  ;;  %v891_v14 = vld [vmem:[%s6093_s4 + $0x878] sm:$0xff]  ;;  %1931 = vmatpush.msra.mxu3 %v705_v10  ;;  %v882_v61 = vld [vmem:[%s6093_s4 + $0x830] sm:$0xff]  ;;  %v880_v10 = vld [vmem:[%s6093_s4 + $0x820] sm:$0xff] }
 0x2c0   :  { %2066 = vmatpush.msra.mxu2 %v822_v9  ;;  %1882 = vmatpush.msra.mxu1 %v682_v19  ;;  %v674_v9 = vld [vmem:[%s6093_s4 + $0x1b0] sm:$0xff]  ;;  %v673_v19 = vld [vmem:[%s6093_s4 + $0x1a8] sm:$0xff] }
 0x2c1   :  { %1946 = vmatpush.msrb.mxu0 %v726_v7  ;;  %1932 = vmatpush.msra.mxu3 %v704_v25  ;;  %v776_v7 = vld [vmem:[%s6093_s4 + $0x4e0] sm:$0xff] }
 0x2c2   :  { %2067 = vmatpush.msra.mxu2 %v821_v16  ;;  %1883 = vmatpush.msra.mxu1 %v681_v27  ;;  %v890_v16 = vld [vmem:[%s6093_s4 + $0x870] sm:$0xff]  ;;  %v672_v27 = vld [vmem:[%s6093_s4 + $0x1a0] sm:$0xff] }
 0x2c3   :  { %1947 = vmatpush.msrb.mxu0 %v725_v12  ;;  %1933 = vmatpush.msra.mxu3 %v703_v28  ;;  %v772_v28 = vld [vmem:[%s6093_s4 + $0x4c0] sm:$0xff] }
 0x2c4   :  { %2068 = vmatpush.msra.mxu2 %v820_v1  ;;  %1884 = vmatpush.msra.mxu1 %v680_v31  ;;  %v724_v1 = vld [vmem:[%s6093_s4 + $0x340] sm:$0xff]  ;;  %v886_v31 = vld [vmem:[%s6093_s4 + $0x850] sm:$0xff] }
 0x2c5   :  { %1948 = vmatpush.msrb.mxu0 %v724_v1  ;;  %1934 = vmatpush.msra.mxu3 %v702_v32  ;;  %v878_v1 = vld [vmem:[%s6093_s4 + $0x810] sm:$0xff] }
 0x2c6   :  { %2069 = vmatpush.msra.mxu2 %v819_v29  ;;  %1885 = vmatpush.msra.mxu1 %v679_v35  ;;  %v723_v29 = vld [vmem:[%s6093_s4 + $0x338] sm:$0xff]  ;;  %v701_v35 = vld [vmem:[%s6093_s4 + $0x288] sm:$0xff] }
 0x2c7   :  { %1949 = vmatpush.msrb.mxu0 %v723_v29  ;;  %1935 = vmatpush.msra.mxu3 %v701_v35  ;;  %v792_v29 = vld [vmem:[%s6093_s4 + $0x560] sm:$0xff]  ;;  %v955_v35 = vld [vmem:[%s6093_s4 + $0xa78] sm:$0xff] }
 0x2c8   :  { %2070 = vmatpush.msra.mxu2 %v818_v52  ;;  %1886 = vmatpush.msra.mxu1 %v678_v45  ;;  %v670_v52 = vld [vmem:[%s6093_s4 + $0x190] sm:$0xff]  ;;  %v1534_v45 = vpop.f32.mrf.mxu2 }
 0x2c9   :  { %1950 = vmatpush.msrb.mxu0 %v722_v33  ;;  %1936 = vmatpush.msra.mxu3 %v700_v46  ;;  %v771_v33 = vld [vmem:[%s6093_s4 + $0x4b8] sm:$0xff]  ;;  %v2853_v46 = vld [vmem:[%s6095_s6] ss:$0 sm:$0xff] }
 0x2ca   :  { %2071 = vmatpush.msra.mxu2 %v817_v44  ;;  %1887 = vmatpush.msra.mxu1 %v677_v24  ;;  %v669_v44 = vld [vmem:[%s6093_s4 + $0x188] sm:$0xff]  ;;  %v779_v24 = vld [vmem:[%s6093_s4 + $0x4f8] sm:$0xff] }
 0x2cb   :  { %1951 = vmatpush.msrb.mxu0 %v721_v36  ;;  %2001 = vmatpush.msrb.mxu3 %v779_v24  ;;  %v791_v36 = vld [vmem:[%s6093_s4 + $0x558] sm:$0xff]  ;;  %v769_v24 = vld [vmem:[%s6093_s4 + $0x4a8] sm:$0xff] }
 0x2cc   :  { %2072 = vmatpush.msra.mxu2 %v816_v48  ;;  %1888 = vmatpush.msra.mxu1 %v676_v58  ;;  %v884_v48 = vld [vmem:[%s6093_s4 + $0x840] sm:$0xff]  ;;  %v883_v58 = vld [vmem:[%s6093_s4 + $0x838] sm:$0xff] }
 0x2cd   :  { %1952 = vmatpush.msrb.mxu0 %v720_v47  ;;  %2002 = vmatpush.msrb.mxu3 %v778_v59  ;;  %v954_v47 = vld [vmem:[%s6093_s4 + $0xa70] sm:$0xff]  ;;  %v952_v59 = vld [vmem:[%s6093_s4 + $0xa60] sm:$0xff] }
 0x2ce   :  { %2073 = vmatpush.msra.mxu2 %v815_v55  ;;  %1889 = vmatpush.msra.mxu1 %v675_v2  ;;  %v668_v55 = vld [vmem:[%s6093_s4 + $0x180] sm:$0xff]  ;;  %v777_v2 = vld [vmem:[%s6093_s4 + $0x4e8] sm:$0xff] }
 0x2cf   :  { %1953 = vmatpush.msrb.mxu0 %v719_v57  ;;  %1937 = vmatmul.f32.vlgmr.msra.gmra.mxu3 %v3742_v39  ;;  %v795_v39 = vld [vmem:[%s6093_s4 + $0x578] sm:$0xff]  ;;  %v768_v57 = vld [vmem:[%s6093_s4 + $0x4a0] sm:$0xff] }
 0x2d0   :  { %2074 = vmatpush.msra.mxu2 %v814_v60  ;;  %1890 = vmatpush.msra.mxu1 %v674_v9  ;;  %v718_v60 = vld [vmem:[%s6093_s4 + $0x310] sm:$0xff]  ;;  %v716_v9 = vld [vmem:[%s6093_s4 + $0x300] sm:$0xff]  ;;  %v1574_v12 = vpop.f32.mrf.mxu2 }
 0x2d1   :  { %1954 = vmatpush.msrb.mxu0 %v718_v60  ;;  %2003 = vmatpush.msrb.mxu3 %v777_v2  ;;  %v788_v60 = vld [vmem:[%s6093_s4 + $0x540] sm:$0xff] }
 0x2d2   :  { %2075 = vmatpush.msra.mxu2 %v813_v4  ;;  %1891 = vmatpush.msra.mxu1 %v673_v19  ;;  %v881_v4 = vld [vmem:[%s6093_s4 + $0x828] sm:$0xff]  ;;  %v794_v19 = vld [vmem:[%s6093_s4 + $0x570] sm:$0xff] }
 0x2d3   :  { %1955 = vmatpush.msrb.mxu0 %v717_v63  ;;  %2004 = vmatpush.msrb.mxu3 %v776_v7  ;;  %v951_v63 = vld [vmem:[%s6093_s4 + $0xa58] sm:$0xff] }
 0x2d4   :  { %2076 = vmatpush.msra.mxu2 %v812_v11  ;;  %1892 = vmatpush.msra.mxu1 %v672_v27  ;;  %v775_v11 = vld [vmem:[%s6093_s4 + $0x4d8] sm:$0xff]  ;;  %v877_v27 = vld [vmem:[%s6093_s4 + $0x808] sm:$0xff] }
 0x2d5   :  { %2077 = vmatmul.f32.vlgmr.msra.gmra.mxu2 %v1720_v15  ;;  %v879_v15 = vld [vmem:[%s6093_s4 + $0x818] sm:$0xff]  ;;  %1956 = vmatpush.msrb.mxu0 %v716_v9  ;;  %v766_v9 = vld [vmem:[%s6093_s4 + $0x490] sm:$0xff] }
 0x2d6   :  { %2141 = vmatpush.msrb.mxu2 %v891_v14  ;;  %1893 = vmatpush.msra.mxu1 %v671_v30  ;;  %v1555_v14 = vadd.f32 %v1554_v49, %v1534_v45  ;;  %v787_v7 = vld [vmem:[%s6093_s4 + $0x538] sm:$0xff] }
 0x2d7   :  { %2005 = vmatpush.msrb.mxu3 %v775_v11  ;;  %2021 = vmatpush.msra.mxu0 %v795_v39  ;;  %v746_v11 = vld [vmem:[%s6093_s4 + $0x3f0] sm:$0xff]  ;;  %v765_v39 = vld [vmem:[%s6093_s4 + $0x488] sm:$0xff] }
 0x2d8   :  { %2142 = vmatpush.msrb.mxu2 %v890_v16  ;;  %1894 = vmatpush.msra.mxu1 %v670_v52  ;;  %v774_v16 = vld [vmem:[%s6093_s4 + $0x4d0] sm:$0xff]  ;;  %v1575_v25 = vadd.f32 %v1574_v12, %v1555_v14  ;;  %v949_v14 = vld [vmem:[%s6093_s4 + $0xa48] sm:$0xff] }
 0x2d9   :  { %2006 = vmatpush.msrb.mxu3 %v774_v16  ;;  %2022 = vmatpush.msra.mxu0 %v794_v19  ;;  %v786_v12 = vld [vmem:[%s6093_s4 + $0x530] sm:$0xff]  ;;  %v785_v16 = vld [vmem:[%s6093_s4 + $0x528] sm:$0xff]  ;;  %v948_v19 = vld [vmem:[%s6093_s4 + $0xa40] sm:$0xff] }
 0x2da   :  { %2143 = vmatpush.msrb.mxu2 %v889_v18  ;;  %1895 = vmatpush.msra.mxu1 %v669_v44  ;;  %v1594_v18 = vpop.f32.mrf.mxu3  ;;  %v770_v44 = vld [vmem:[%s6093_s4 + $0x4b0] sm:$0xff] }
 0x2db   :  { %v1595_v30 = vadd.f32 %v1594_v18, %v1575_v25  ;;  %1957 = vmatmul.f32.vlgmr.msrb.gmra.mxu0 %v3744_v40  ;;  %v790_v40 = vld [vmem:[%s6093_s4 + $0x550] sm:$0xff]  ;;  %v764_v18 = vld [vmem:[%s6093_s4 + $0x480] sm:$0xff] }
 0x2dc   :  { %2144 = vmatpush.msrb.mxu2 %v888_v5  ;;  %1896 = vmatpush.msra.mxu1 %v668_v55  ;;  %v773_v5 = vld [vmem:[%s6093_s4 + $0x4c8] sm:$0xff]  ;;  %v744_v25 = vld [vmem:[%s6093_s4 + $0x3e0] sm:$0xff] }
 0x2dd   :  { %2007 = vmatpush.msrb.mxu3 %v773_v5  ;;  %v789_v55 = vld [vmem:[%s6093_s4 + $0x548] sm:$0xff]  ;;  %v947_v5 = vld [vmem:[%s6093_s4 + $0xa38] sm:$0xff] }
 0x2de   :  { %2145 = vmatpush.msrb.mxu2 %v887_v26  ;;  %v793_v26 = vld [vmem:[%s6093_s4 + $0x568] sm:$0xff] }
 0x2df   :  { %2023 = vmatpush.msra.mxu0 %v793_v26  ;;  %2008 = vmatpush.msrb.mxu3 %v772_v28  ;;  %v743_v26 = vld [vmem:[%s6093_s4 + $0x3d8] sm:$0xff]  ;;  %v946_v28 = vld [vmem:[%s6093_s4 + $0xa30] sm:$0xff] }
 0x2e0   :  { %2146 = vmatpush.msrb.mxu2 %v886_v31  ;;  %v876_v31 = vld [vmem:[%s6093_s4 + $0x800] sm:$0xff] }
 0x2e1   :  { %2024 = vmatpush.msra.mxu0 %v792_v29  ;;  %2009 = vmatpush.msrb.mxu3 %v771_v33  ;;  %v742_v29 = vld [vmem:[%s6093_s4 + $0x3d0] sm:$0xff]  ;;  %v741_v33 = vld [vmem:[%s6093_s4 + $0x3c8] sm:$0xff] }
 0x2e2   :  { %2147 = vmatpush.msrb.mxu2 %v885_v42 }
 0x2e3   :  { %2025 = vmatpush.msra.mxu0 %v791_v36  ;;  %2010 = vmatpush.msrb.mxu3 %v770_v44  ;;  %v781_v36 = vld [vmem:[%s6093_s4 + $0x508] sm:$0xff]  ;;  %v944_v44 = vld [vmem:[%s6093_s4 + $0xa20] sm:$0xff] }
 0x2e4   :  { %2148 = vmatpush.msrb.mxu2 %v884_v48 }
 0x2e5   :  { %2026 = vmatpush.msra.mxu0 %v790_v40  ;;  %2011 = vmatpush.msrb.mxu3 %v769_v24  ;;  %v739_v40 = vld [vmem:[%s6093_s4 + $0x3b8] sm:$0xff]  ;;  %v840_v24 = vld [vmem:[%s6093_s4 + $0x6e0] sm:$0xff] }
 0x2e6   :  { %2149 = vmatpush.msrb.mxu2 %v883_v58 }
 0x2e7   :  { %2027 = vmatpush.msra.mxu0 %v789_v55  ;;  %2012 = vmatpush.msrb.mxu3 %v768_v57  ;;  %v839_v55 = vld [vmem:[%s6093_s4 + $0x6d8] sm:$0xff] }
 0x2e8   :  { %2150 = vmatpush.msrb.mxu2 %v882_v61  ;;  %v767_v61 = vld [vmem:[%s6093_s4 + $0x498] sm:$0xff] }
 0x2e9   :  { %2028 = vmatpush.msra.mxu0 %v788_v60  ;;  %2013 = vmatpush.msrb.mxu3 %v767_v61  ;;  %v859_v57 = vld [vmem:[%s6093_s4 + $0x778] sm:$0xff]  ;;  %v940_v60 = vld [vmem:[%s6093_s4 + $0xa00] sm:$0xff] }
 0x2ea   :  { %2151 = vmatpush.msrb.mxu2 %v881_v4  ;;  %v1654_v48 = vpop.f32.mrf.mxu0  ;;  %v747_v4 = vld [vmem:[%s6093_s4 + $0x3f8] sm:$0xff] }
 0x2eb   :  { %2029 = vmatpush.msra.mxu0 %v787_v7  ;;  %2014 = vmatpush.msrb.mxu3 %v766_v9  ;;  %v1019_v61 = vld [vmem:[%s6093_s4 + $0xc78] sm:$0xff]  ;;  %v837_v7 = vld [vmem:[%s6093_s4 + $0x6c8] sm:$0xff]  ;;  %v1018_v9 = vld [vmem:[%s6093_s4 + $0xc70] sm:$0xff] }
 0x2ec   :  { %2152 = vmatpush.msrb.mxu2 %v880_v10  ;;  %v950_v10 = vld [vmem:[%s6093_s4 + $0xa50] sm:$0xff] }
 0x2ed   :  { %2030 = vmatpush.msra.mxu0 %v786_v12  ;;  %2015 = vmatpush.msrb.mxu3 %v765_v39  ;;  %v614_v12 = vld [vmem:[%s6090_s1 + $0x38] sm:$0xff] }
 0x2ee   :  { %2153 = vmatpush.msrb.mxu2 %v879_v15  ;;  %v745_v15 = vld [vmem:[%s6093_s4 + $0x3e8] sm:$0xff] }
 0x2ef   :  { %v1634_v42 = vpop.f32.mrf.mxu3  ;;  %2031 = vmatpush.msra.mxu0 %v785_v16  ;;  %2016 = vmatpush.msrb.mxu3 %v764_v18  ;;  %v734_v18 = vld [vmem:[%s6093_s4 + $0x390] sm:$0xff] }
 0x2f0   :  { %2154 = vmatpush.msrb.mxu2 %v878_v1  ;;  %v1614_v32 = vpop.f32.mrf.mxu2  ;;  %v784_v1 = vld [vmem:[%s6093_s4 + $0x520] sm:$0xff]  ;;  %2017 = vmatmul.f32.vlgmr.msrb.gmra.mxu3 %v3554_v20 }
 0x2f1   :  { %v1615_v52 = vadd.f32 %v1614_v32, %v1595_v30  ;;  %2032 = vmatpush.msra.mxu0 %v784_v1  ;;  %v843_v30 = vld [vmem:[%s6093_s4 + $0x6f8] sm:$0xff]  ;;  %v945_v32 = vld [vmem:[%s6093_s4 + $0xa28] sm:$0xff]  ;;  %v740_v20 = vld [vmem:[%s6093_s4 + $0x3c0] sm:$0xff] }
 0x2f2   :  { %2155 = vmatpush.msrb.mxu2 %v877_v27  ;;  %v783_v27 = vld [vmem:[%s6093_s4 + $0x518] sm:$0xff]  ;;  %2081 = vmatpush.msra.mxu3 %v843_v30 }
 0x2f3   :  { %v1635_v45 = vadd.f32 %v1634_v42, %v1615_v52  ;;  %2033 = vmatpush.msra.mxu0 %v783_v27  ;;  %v4312_v52 = vld.sshfl [vmem:[#allocation1 + $0x30] sm:$0xff pattern:$0x73625140]  ;;  %v4320_v42 = vld.sshfl [vmem:[#allocation1 + $0x38] sm:$0xff pattern:$0x73625140] }
 0x2f4   :  { %2156 = vmatpush.msrb.mxu2 %v876_v31  ;;  %v782_v31 = vld [vmem:[%s6093_s4 + $0x510] sm:$0xff]  ;;  %v835_v1 = vld [vmem:[%s6093_s4 + $0x6b8] sm:$0xff] }
 0x2f5   :  { %2157 = vmatmul.f32.vlgmr.msrb.gmra.mxu2 %v3612_v41  ;;  %v1655_v49 = vadd.f32 %v1654_v48, %v1635_v45  ;;  %v953_v41 = vld [vmem:[%s6093_s4 + $0xa68] sm:$0xff]  ;;  %2034 = vmatpush.msra.mxu0 %v782_v31  ;;  %v855_v27 = vld [vmem:[%s6093_s4 + $0x758] sm:$0xff] }
 0x2f6   :  { %2221 = vmatpush.msra.mxu2 %v955_v35  ;;  %v842_v35 = vld [vmem:[%s6093_s4 + $0x6f0] sm:$0xff]  ;;  %v841_v45 = vld [vmem:[%s6093_s4 + $0x6e8] sm:$0xff]  ;;  %v1015_v30 = vld [vmem:[%s6093_s4 + $0xc58] sm:$0xff] }
 0x2f7   :  { %v1661_v58 = vadd.f32 %v2853_v46, %v1655_v49  ;;  %1815 = vrot.lane.b32.xlu0 %v1655_v49, %s2883_s25  ;;  %v780_v46 = vld [vmem:[%s6093_s4 + $0x500] sm:$0xff]  ;;  %2082 = vmatpush.msra.mxu3 %v842_v35  ;;  %v612_v48 = vld [vmem:[%s6090_s1 + $0x28] sm:$0xff]  ;;  %v942_v49 = vld [vmem:[%s6093_s4 + $0xa10] sm:$0xff] }
 0x2f8   :  { %2222 = vmatpush.msra.mxu2 %v954_v47  ;;  %v943_v47 = vld [vmem:[%s6093_s4 + $0xa18] sm:$0xff]  ;;  %2035 = vmatpush.msra.mxu0 %v781_v36  ;;  %v833_v35 = vld [vmem:[%s6093_s4 + $0x6a8] sm:$0xff]  ;;  %v810_v36 = vld [vmem:[%s6093_s4 + $0x5f0] sm:$0xff] }
 0x2f9   :  { %v1662_v2 = vmax.f32 %v1661_v58, 0.0  ;;  %2083 = vmatpush.msra.mxu3 %v841_v45  ;;  %v941_v58 = vld [vmem:[%s6093_s4 + $0xa08] sm:$0xff]  ;;  %v811_v31 = vld [vmem:[%s6093_s4 + $0x5f8] sm:$0xff]  ;;  %v832_v45 = vld [vmem:[%s6093_s4 + $0x6a0] sm:$0xff] }
 0x2fa   :  { %2223 = vmatpush.msra.mxu2 %v953_v41  ;;  %v738_v41 = vld [vmem:[%s6093_s4 + $0x3b0] sm:$0xff]  ;;  %2036 = vmatpush.msra.mxu0 %v780_v46  ;;  %v852_v46 = vld [vmem:[%s6093_s4 + $0x740] sm:$0xff] }
 0x2fb   :  { %2846 = vmatmul.msk.f32.vlgmr.msrb.gmra.mxu1 %vm1514_vm6, %v1662_v2  ;;  %2084 = vmatpush.msra.mxu3 %v840_v24  ;;  %v838_v2 = vld [vmem:[%s6093_s4 + $0x6d0] sm:$0xff]  ;;  %v851_v24 = vld [vmem:[%s6093_s4 + $0x738] sm:$0xff] }
 0x2fc   :  { %2224 = vmatpush.msra.mxu2 %v952_v59  ;;  %1961 = vmatpush.msrb.mxu1 %v747_v4  ;;  %v737_v59 = vld [vmem:[%s6093_s4 + $0x3a8] sm:$0xff]  ;;  %v736_v4 = vld [vmem:[%s6093_s4 + $0x3a0] sm:$0xff] }
 0x2fd   :  { %2037 = vmatmul.f32.vlgmr.msra.gmra.mxu0 %v3556_v50  ;;  %v735_v50 = vld [vmem:[%s6093_s4 + $0x398] sm:$0xff]  ;;  %2085 = vmatpush.msra.mxu3 %v839_v55 }
 0x2fe   :  { %2225 = vmatpush.msra.mxu2 %v951_v63  ;;  %1962 = vmatpush.msrb.mxu1 %v746_v11  ;;  %v858_v63 = vld [vmem:[%s6093_s4 + $0x770] sm:$0xff]  ;;  %v836_v11 = vld [vmem:[%s6093_s4 + $0x6c0] sm:$0xff]  ;;  %v807_v55 = vld [vmem:[%s6093_s4 + $0x5d8] sm:$0xff] }
 0x2ff   :  { %2101 = vmatpush.msrb.mxu0 %v859_v57  ;;  %2086 = vmatpush.msra.mxu3 %v838_v2  ;;  %v850_v57 = vld [vmem:[%s6093_s4 + $0x730] sm:$0xff]  ;;  %v1009_v2 = vld [vmem:[%s6093_s4 + $0xc28] sm:$0xff] }
 0x300   :  { %2226 = vmatpush.msra.mxu2 %v950_v10  ;;  %1963 = vmatpush.msrb.mxu1 %v745_v15  ;;  %v857_v10 = vld [vmem:[%s6093_s4 + $0x768] sm:$0xff] }
 0x301   :  { %2102 = vmatpush.msrb.mxu0 %v858_v63  ;;  %2087 = vmatpush.msra.mxu3 %v837_v7  ;;  %v828_v63 = vld [vmem:[%s6093_s4 + $0x680] sm:$0xff] }
 0x302   :  { %2227 = vmatpush.msra.mxu2 %v949_v14  ;;  %1964 = vmatpush.msrb.mxu1 %v744_v25  ;;  %v1017_v25 = vld [vmem:[%s6093_s4 + $0xc68] sm:$0xff]  ;;  %v1008_v7 = vld [vmem:[%s6093_s4 + $0xc20] sm:$0xff] }
 0x303   :  { %1897 = vmatmul.f32.vlgmr.msra.gmra.mxu1 %v3516_v6  ;;  %v4303_v6 = vld.sshfl [vmem:[#allocation1 + $0x28] sm:$0xff pattern:$0x73625140]  ;;  %2103 = vmatpush.msrb.mxu0 %v857_v10  ;;  %v907_v10 = vld [vmem:[%s6093_s4 + $0x8f8] sm:$0xff] }
 0x304   :  { %2228 = vmatpush.msra.mxu2 %v948_v19  ;;  %1965 = vmatpush.msrb.mxu1 %v743_v26  ;;  %1725 = vst [vmem:[#allocation1 + $0x20] ss:$4 sm:$0xff] %v612_v48  ;;  %v856_v19 = vld [vmem:[%s6093_s4 + $0x760] sm:$0xff] }
 0x305   :  { %2088 = vmatpush.msra.mxu3 %v836_v11  ;;  %v1016_v26 = vld [vmem:[%s6093_s4 + $0xc60] sm:$0xff]  ;;  %2104 = vmatpush.msrb.mxu0 %v856_v19  ;;  %v1007_v11 = vld [vmem:[%s6093_s4 + $0xc18] sm:$0xff]  ;;  %v1006_v19 = vld [vmem:[%s6093_s4 + $0xc10] sm:$0xff] }
 0x306   :  { %2229 = vmatpush.msra.mxu2 %v947_v5  ;;  %1966 = vmatpush.msrb.mxu1 %v742_v29  ;;  %v733_v5 = vld [vmem:[%s6093_s4 + $0x388] sm:$0xff]  ;;  %v834_v29 = vld [vmem:[%s6093_s4 + $0x6b0] sm:$0xff]  ;;  %v808_v48 = vld [vmem:[%s6093_s4 + $0x5e0] sm:$0xff] }
 0x307   :  { %2089 = vmatpush.msra.mxu3 %v835_v1  ;;  %2105 = vmatpush.msrb.mxu0 %v855_v27  ;;  %v802_v1 = vld [vmem:[%s6093_s4 + $0x5b0] sm:$0xff]  ;;  %v801_v27 = vld [vmem:[%s6093_s4 + $0x5a8] sm:$0xff] }
 0x308   :  { %2230 = vmatpush.msra.mxu2 %v946_v28  ;;  %1967 = vmatpush.msrb.mxu1 %v741_v33  ;;  %v732_v28 = vld [vmem:[%s6093_s4 + $0x380] sm:$0xff]  ;;  %v1014_v33 = vld [vmem:[%s6093_s4 + $0xc50] sm:$0xff] }
 0x309   :  { %2090 = vmatpush.msra.mxu3 %v834_v29  ;;  %v1004_v29 = vld [vmem:[%s6093_s4 + $0xc00] sm:$0xff] }
 0x30a   :  { %2231 = vmatpush.msra.mxu2 %v945_v32  ;;  %1968 = vmatpush.msrb.mxu1 %v740_v20  ;;  %v854_v32 = vld [vmem:[%s6093_s4 + $0x750] sm:$0xff]  ;;  %v1013_v20 = vld [vmem:[%s6093_s4 + $0xc48] sm:$0xff] }
 0x30b   :  { %v1730_v39 = vld.sshfl [vmem:[#allocation1 + $0x20] sm:$0xff pattern:$0x73625140]  ;;  %v4398_v14 = vld.sshfl [vmem:[#allocation1 + $0x28] sm:$0xff pattern:$0x73625140]  ;;  %2106 = vmatpush.msrb.mxu0 %v854_v32  ;;  %2091 = vmatpush.msra.mxu3 %v833_v35 }
 0x30c   :  { %2232 = vmatpush.msra.mxu2 %v944_v44  ;;  %1969 = vmatpush.msrb.mxu1 %v739_v40  ;;  %v4400_v15 = vld.sshfl [vmem:[#allocation1 + $0x30] sm:$0xff pattern:$0x73625140]  ;;  %v4402_v16 = vld.sshfl [vmem:[#allocation1 + $0x38] sm:$0xff pattern:$0x73625140] }
 0x30d   :  { %1735 = vst [vmem:[#allocation1 + $0x20] ss:$4 sm:$0xff] %v614_v12  ;;  %v853_v44 = vld [vmem:[%s6093_s4 + $0x748] sm:$0xff]  ;;  %v831_v40 = vld [vmem:[%s6093_s4 + $0x698] sm:$0xff]  ;;  %2092 = vmatpush.msra.mxu3 %v832_v45 }
 0x30e   :  { %2233 = vmatpush.msra.mxu2 %v943_v47  ;;  %1970 = vmatpush.msrb.mxu1 %v738_v41  ;;  %v1012_v47 = vld [vmem:[%s6093_s4 + $0xc40] sm:$0xff]  ;;  %v830_v41 = vld [vmem:[%s6093_s4 + $0x690] sm:$0xff]  ;;  %v847_v12 = vld [vmem:[%s6093_s4 + $0x718] sm:$0xff] }
 0x30f   :  { %2107 = vmatpush.msrb.mxu0 %v853_v44  ;;  %2093 = vmatpush.msra.mxu3 %v831_v40  ;;  %v1083_v32 = vld [vmem:[%s6093_s4 + $0xe78] sm:$0xff]  ;;  %v1081_v45 = vld [vmem:[%s6093_s4 + $0xe68] sm:$0xff] }
 0x310   :  { %2234 = vmatpush.msra.mxu2 %v942_v49  ;;  %1971 = vmatpush.msrb.mxu1 %v737_v59  ;;  %v1011_v49 = vld [vmem:[%s6093_s4 + $0xc38] sm:$0xff]  ;;  %v829_v59 = vld [vmem:[%s6093_s4 + $0x688] sm:$0xff] }
 0x311   :  { %2108 = vmatpush.msrb.mxu0 %v852_v46  ;;  %2094 = vmatpush.msra.mxu3 %v830_v41  ;;  %v903_v35 = vld [vmem:[%s6093_s4 + $0x8d8] sm:$0xff]  ;;  %v797_v46 = vld [vmem:[%s6093_s4 + $0x588] sm:$0xff] }
 0x312   :  { %2235 = vmatpush.msra.mxu2 %v941_v58  ;;  %1972 = vmatpush.msrb.mxu1 %v736_v4  ;;  %v1010_v58 = vld [vmem:[%s6093_s4 + $0xc30] sm:$0xff]  ;;  %v805_v4 = vld [vmem:[%s6093_s4 + $0x5c8] sm:$0xff]  ;;  %v923_v44 = vld [vmem:[%s6093_s4 + $0x978] sm:$0xff] }
 0x313   :  { %2109 = vmatpush.msrb.mxu0 %v851_v24  ;;  %2095 = vmatpush.msra.mxu3 %v829_v59  ;;  %v921_v40 = vld [vmem:[%s6093_s4 + $0x968] sm:$0xff]  ;;  %v900_v24 = vld [vmem:[%s6093_s4 + $0x8c0] sm:$0xff]  ;;  %v875_v41 = vld [vmem:[%s6093_s4 + $0x7f8] sm:$0xff] }
 0x314   :  { %2236 = vmatpush.msra.mxu2 %v940_v60  ;;  %1973 = vmatpush.msrb.mxu1 %v735_v50  ;;  %v806_v60 = vld [vmem:[%s6093_s4 + $0x5d0] sm:$0xff]  ;;  %v848_v50 = vld [vmem:[%s6093_s4 + $0x720] sm:$0xff] }
 0x315   :  { %2237 = vmatmul.f32.vlgmr.msra.gmra.mxu2 %v1730_v39  ;;  %2110 = vmatpush.msrb.mxu0 %v850_v57  ;;  %v803_v39 = vld [vmem:[%s6093_s4 + $0x5b8] sm:$0xff]  ;;  %v1078_v57 = vld [vmem:[%s6093_s4 + $0xe50] sm:$0xff] }
 0x316   :  { %2301 = vmatpush.msrb.mxu2 %v1019_v61  ;;  %1974 = vmatpush.msrb.mxu1 %v734_v18  ;;  %v849_v61 = vld [vmem:[%s6093_s4 + $0x728] sm:$0xff]  ;;  %v906_v18 = vld [vmem:[%s6093_s4 + $0x8f0] sm:$0xff] }
 0x317   :  { %2111 = vmatpush.msrb.mxu0 %v849_v61  ;;  %2096 = vmatpush.msra.mxu3 %v828_v63  ;;  %v874_v59 = vld [vmem:[%s6093_s4 + $0x7f0] sm:$0xff]  ;;  %v1077_v61 = vld [vmem:[%s6093_s4 + $0xe48] sm:$0xff] }
 0x318   :  { %2302 = vmatpush.msrb.mxu2 %v1018_v9  ;;  %1975 = vmatpush.msrb.mxu1 %v733_v5  ;;  %v804_v9 = vld [vmem:[%s6093_s4 + $0x5c0] sm:$0xff]  ;;  %v1005_v5 = vld [vmem:[%s6093_s4 + $0xc08] sm:$0xff]  ;;  %v918_v63 = vld [vmem:[%s6093_s4 + $0x950] sm:$0xff] }
 0x319   :  { %2112 = vmatpush.msrb.mxu0 %v848_v50  ;;  %2097 = vmatmul.f32.vlgmr.msra.gmra.mxu3 %v4303_v6  ;;  %v905_v6 = vld [vmem:[%s6093_s4 + $0x8e8] sm:$0xff] }
 0x31a   :  { %2303 = vmatpush.msrb.mxu2 %v1017_v25  ;;  %1976 = vmatpush.msrb.mxu1 %v732_v28  ;;  %v846_v25 = vld [vmem:[%s6093_s4 + $0x710] sm:$0xff]  ;;  %v904_v28 = vld [vmem:[%s6093_s4 + $0x8e0] sm:$0xff]  ;;  %v897_v50 = vld [vmem:[%s6093_s4 + $0x8a8] sm:$0xff] }
 0x31b   :  { %1977 = vmatmul.f32.vlgmr.msrb.gmra.mxu1 %v3746_v43  ;;  %v809_v43 = vld [vmem:[%s6093_s4 + $0x5e8] sm:$0xff]  ;;  %2161 = vmatpush.msrb.mxu3 %v907_v10  ;;  %v1075_v10 = vld [vmem:[%s6093_s4 + $0xe38] sm:$0xff] }
 0x31c   :  { %2304 = vmatpush.msrb.mxu2 %v1016_v26  ;;  %2041 = vmatpush.msra.mxu1 %v811_v31  ;;  %v845_v26 = vld [vmem:[%s6093_s4 + $0x708] sm:$0xff]  ;;  %v800_v31 = vld [vmem:[%s6093_s4 + $0x5a0] sm:$0xff] }
 0x31d   :  { %2113 = vmatpush.msrb.mxu0 %v847_v12  ;;  %2162 = vmatpush.msrb.mxu3 %v906_v18  ;;  %v871_v12 = vld [vmem:[%s6093_s4 + $0x7d8] sm:$0xff]  ;;  %v1074_v18 = vld [vmem:[%s6093_s4 + $0xe30] sm:$0xff] }
 0x31e   :  { %2305 = vmatpush.msrb.mxu2 %v1015_v30  ;;  %2042 = vmatpush.msra.mxu1 %v810_v36  ;;  %v844_v30 = vld [vmem:[%s6093_s4 + $0x700] sm:$0xff]  ;;  %v1082_v36 = vld [vmem:[%s6093_s4 + $0xe70] sm:$0xff] }
 0x31f   :  { %2114 = vmatpush.msrb.mxu0 %v846_v25  ;;  %2163 = vmatpush.msrb.mxu3 %v905_v6  ;;  %v870_v25 = vld [vmem:[%s6093_s4 + $0x7d0] sm:$0xff]  ;;  %v1073_v6 = vld [vmem:[%s6093_s4 + $0xe28] sm:$0xff] }
 0x320   :  { %2306 = vmatpush.msrb.mxu2 %v1014_v33  ;;  %2043 = vmatpush.msra.mxu1 %v809_v43  ;;  %v799_v33 = vld [vmem:[%s6093_s4 + $0x598] sm:$0xff]  ;;  %v922_v43 = vld [vmem:[%s6093_s4 + $0x970] sm:$0xff] }
 0x321   :  { %2115 = vmatpush.msrb.mxu0 %v845_v26  ;;  %2164 = vmatpush.msrb.mxu3 %v904_v28  ;;  %v4691_v26 = vld.sshfl [vmem:[#allocation1 + $0x28] sm:$0xff pattern:$0x73625140]  ;;  %v914_v28 = vld [vmem:[%s6093_s4 + $0x930] sm:$0xff] }
 0x322   :  { %2307 = vmatpush.msrb.mxu2 %v1013_v20  ;;  %2044 = vmatpush.msra.mxu1 %v808_v48  ;;  %v798_v20 = vld [vmem:[%s6093_s4 + $0x590] sm:$0xff]  ;;  %v796_v48 = vld [vmem:[%s6093_s4 + $0x580] sm:$0xff] }
 0x323   :  { %2116 = vmatpush.msrb.mxu0 %v844_v30  ;;  %2165 = vmatpush.msrb.mxu3 %v903_v35  ;;  %v1072_v30 = vld [vmem:[%s6093_s4 + $0xe20] sm:$0xff]  ;;  %v913_v35 = vld [vmem:[%s6093_s4 + $0x928] sm:$0xff] }
 0x324   :  { %2308 = vmatpush.msrb.mxu2 %v1012_v47  ;;  %2045 = vmatpush.msra.mxu1 %v807_v55  ;;  %v1080_v47 = vld [vmem:[%s6093_s4 + $0xe60] sm:$0xff] }
 0x325   :  { %2117 = vmatmul.f32.vlgmr.msrb.gmra.mxu0 %v4312_v52  ;;  %v901_v52 = vld [vmem:[%s6093_s4 + $0x8c8] sm:$0xff]  ;;  %v920_v55 = vld [vmem:[%s6093_s4 + $0x960] sm:$0xff] }
 0x326   :  { %2309 = vmatpush.msrb.mxu2 %v1011_v49  ;;  %2046 = vmatpush.msra.mxu1 %v806_v60  ;;  %v1079_v49 = vld [vmem:[%s6093_s4 + $0xe58] sm:$0xff] }
 0x327   :  { %2181 = vmatpush.msra.mxu0 %v923_v44  ;;  %v919_v60 = vld [vmem:[%s6093_s4 + $0x958] sm:$0xff] }
 0x328   :  { %2310 = vmatpush.msrb.mxu2 %v1010_v58  ;;  %2047 = vmatpush.msra.mxu1 %v805_v4  ;;  %v899_v58 = vld [vmem:[%s6093_s4 + $0x8b8] sm:$0xff]  ;;  %v1076_v4 = vld [vmem:[%s6093_s4 + $0xe40] sm:$0xff] }
 0x329   :  { %2182 = vmatpush.msra.mxu0 %v922_v43  ;;  %v867_v44 = vld [vmem:[%s6093_s4 + $0x7b8] sm:$0xff]  ;;  %v4730_v43 = vld.sshfl [vmem:[#allocation1 + $0x20] sm:$0xff pattern:$0x73625140] }
 0x32a   :  { %2311 = vmatpush.msrb.mxu2 %v1009_v2  ;;  %2048 = vmatpush.msra.mxu1 %v804_v9  ;;  %v898_v2 = vld [vmem:[%s6093_s4 + $0x8b0] sm:$0xff]  ;;  %v917_v9 = vld [vmem:[%s6093_s4 + $0x948] sm:$0xff] }
 0x32b   :  { %2183 = vmatpush.msra.mxu0 %v921_v40  ;;  %v1069_v40 = vld [vmem:[%s6093_s4 + $0xe08] sm:$0xff] }
 0x32c   :  { %2312 = vmatpush.msrb.mxu2 %v1008_v7  ;;  %2049 = vmatpush.msra.mxu1 %v803_v39  ;;  %v872_v7 = vld [vmem:[%s6093_s4 + $0x7e0] sm:$0xff] }
 0x32d   :  { %2184 = vmatpush.msra.mxu0 %v920_v55  ;;  %v916_v39 = vld [vmem:[%s6093_s4 + $0x940] sm:$0xff]  ;;  %v910_v55 = vld [vmem:[%s6093_s4 + $0x910] sm:$0xff] }
 0x32e   :  { %2313 = vmatpush.msrb.mxu2 %v1007_v11  ;;  %2050 = vmatpush.msra.mxu1 %v802_v1  ;;  %v896_v11 = vld [vmem:[%s6093_s4 + $0x8a0] sm:$0xff]  ;;  %v915_v1 = vld [vmem:[%s6093_s4 + $0x938] sm:$0xff] }
 0x32f   :  { %2185 = vmatpush.msra.mxu0 %v919_v60  ;;  %v1146_v60 = vld [vmem:[%s6093_s4 + $0x1070] sm:$0xff] }
 0x330   :  { %2314 = vmatpush.msrb.mxu2 %v1006_v19  ;;  %2051 = vmatpush.msra.mxu1 %v801_v27  ;;  %v895_v19 = vld [vmem:[%s6093_s4 + $0x898] sm:$0xff]  ;;  %v869_v27 = vld [vmem:[%s6093_s4 + $0x7c8] sm:$0xff] }
 0x331   :  { %2186 = vmatpush.msra.mxu0 %v918_v63  ;;  %v1145_v63 = vld [vmem:[%s6093_s4 + $0x1068] sm:$0xff] }
 0x332   :  { %2315 = vmatpush.msrb.mxu2 %v1005_v5  ;;  %2052 = vmatpush.msra.mxu1 %v800_v31  ;;  %v894_v5 = vld [vmem:[%s6093_s4 + $0x890] sm:$0xff]  ;;  %v893_v31 = vld [vmem:[%s6093_s4 + $0x888] sm:$0xff] }
 0x333   :  { %2187 = vmatpush.msra.mxu0 %v917_v9  ;;  %v861_v9 = vld [vmem:[%s6093_s4 + $0x788] sm:$0xff] }
 0x334   :  { %2316 = vmatpush.msrb.mxu2 %v1004_v29  ;;  %2053 = vmatpush.msra.mxu1 %v799_v33  ;;  %v4699_v29 = vld.sshfl [vmem:[#allocation1 + $0x30] sm:$0xff pattern:$0x73625140]  ;;  %v868_v33 = vld [vmem:[%s6093_s4 + $0x7c0] sm:$0xff] }
 0x335   :  { %2317 = vmatmul.f32.vlgmr.msrb.gmra.mxu2 %v3644_v56  ;;  %v902_v56 = vld [vmem:[%s6093_s4 + $0x8d0] sm:$0xff]  ;;  %2188 = vmatpush.msra.mxu0 %v916_v39  ;;  %v860_v39 = vld [vmem:[%s6093_s4 + $0x780] sm:$0xff] }
 0x336   :  { %2381 = vmatpush.msra.mxu2 %v1083_v32  ;;  %2054 = vmatpush.msra.mxu1 %v798_v20  ;;  %v4707_v32 = vld.sshfl [vmem:[#allocation1 + $0x38] sm:$0xff pattern:$0x73625140]  ;;  %v892_v20 = vld [vmem:[%s6093_s4 + $0x880] sm:$0xff] }
 0x337   :  { %2166 = vmatpush.msrb.mxu3 %v902_v56  ;;  %2189 = vmatpush.msra.mxu0 %v915_v1  ;;  %v912_v56 = vld [vmem:[%s6093_s4 + $0x920] sm:$0xff]  ;;  %v985_v1 = vld [vmem:[%s6093_s4 + $0xb68] sm:$0xff] }
 0x338   :  { %2382 = vmatpush.msra.mxu2 %v1082_v36  ;;  %2055 = vmatpush.msra.mxu1 %v797_v46  ;;  %v1071_v36 = vld [vmem:[%s6093_s4 + $0xe18] sm:$0xff]  ;;  %v1070_v46 = vld [vmem:[%s6093_s4 + $0xe10] sm:$0xff] }
 0x339   :  { %2167 = vmatpush.msrb.mxu3 %v901_v52  ;;  %2190 = vmatpush.msra.mxu0 %v914_v28  ;;  %v866_v52 = vld [vmem:[%s6093_s4 + $0x7b0] sm:$0xff]  ;;  %v984_v28 = vld [vmem:[%s6093_s4 + $0xb60] sm:$0xff] }
 0x33a   :  { %2383 = vmatpush.msra.mxu2 %v1081_v45  ;;  %2056 = vmatpush.msra.mxu1 %v796_v48  ;;  %v616_v45 = vld [vmem:[%s6090_s1 + $0x48] sm:$0xff]  ;;  %v911_v48 = vld [vmem:[%s6093_s4 + $0x918] sm:$0xff] }
 0x33b   :  { %2168 = vmatpush.msrb.mxu3 %v900_v24  ;;  %2057 = vmatmul.f32.vlgmr.msra.gmra.mxu1 %v3567_v13  ;;  %v873_v13 = vld [vmem:[%s6093_s4 + $0x7e8] sm:$0xff]  ;;  %1745 = vst [vmem:[#allocation1 + $0x20] ss:$4 sm:$0xff] %v616_v45  ;;  %v982_v45 = vld [vmem:[%s6093_s4 + $0xb50] sm:$0xff] }
 0x33c   :  { %2384 = vmatpush.msra.mxu2 %v1080_v47  ;;  %2121 = vmatpush.msrb.mxu1 %v875_v41  ;;  %v971_v47 = vld [vmem:[%s6093_s4 + $0xaf8] sm:$0xff]  ;;  %v865_v24 = vld [vmem:[%s6093_s4 + $0x7a8] sm:$0xff]  ;;  %v1068_v41 = vld [vmem:[%s6093_s4 + $0xe00] sm:$0xff] }
 0x33d   :  { %2169 = vmatpush.msrb.mxu3 %v899_v58  ;;  %2191 = vmatpush.msra.mxu0 %v913_v35  ;;  %v969_v58 = vld [vmem:[%s6093_s4 + $0xae8] sm:$0xff]  ;;  %v1139_v35 = vld [vmem:[%s6093_s4 + $0x1038] sm:$0xff] }
 0x33e   :  { %2385 = vmatpush.msra.mxu2 %v1079_v49  ;;  %2122 = vmatpush.msrb.mxu1 %v874_v59  ;;  %v970_v49 = vld [vmem:[%s6093_s4 + $0xaf0] sm:$0xff]  ;;  %v909_v59 = vld [vmem:[%s6093_s4 + $0x908] sm:$0xff] }
 0x33f   :  { %2170 = vmatpush.msrb.mxu3 %v898_v2  ;;  %2192 = vmatpush.msra.mxu0 %v912_v56  ;;  %v968_v2 = vld [vmem:[%s6093_s4 + $0xae0] sm:$0xff]  ;;  %v1138_v56 = vld [vmem:[%s6093_s4 + $0x1030] sm:$0xff] }
 0x340   :  { %2386 = vmatpush.msra.mxu2 %v1078_v57  ;;  %2123 = vmatpush.msrb.mxu1 %v873_v13  ;;  %v1147_v57 = vld [vmem:[%s6093_s4 + $0x1078] sm:$0xff]  ;;  %v908_v13 = vld [vmem:[%s6093_s4 + $0x900] sm:$0xff] }
 0x341   :  { %2171 = vmatpush.msrb.mxu3 %v897_v50  ;;  %2193 = vmatpush.msra.mxu0 %v911_v48  ;;  %v967_v50 = vld [vmem:[%s6093_s4 + $0xad8] sm:$0xff]  ;;  %v933_v48 = vld [vmem:[%s6093_s4 + $0x9c8] sm:$0xff] }
 0x342   :  { %2387 = vmatpush.msra.mxu2 %v1077_v61  ;;  %2124 = vmatpush.msrb.mxu1 %v872_v7  ;;  %v863_v61 = vld [vmem:[%s6093_s4 + $0x798] sm:$0xff]  ;;  %v1144_v7 = vld [vmem:[%s6093_s4 + $0x1060] sm:$0xff] }
 0x343   :  { %2172 = vmatpush.msrb.mxu3 %v896_v11  ;;  %2194 = vmatpush.msra.mxu0 %v910_v55  ;;  %v966_v11 = vld [vmem:[%s6093_s4 + $0xad0] sm:$0xff]  ;;  %v932_v55 = vld [vmem:[%s6093_s4 + $0x9c0] sm:$0xff] }
 0x344   :  { %2388 = vmatpush.msra.mxu2 %v1076_v4  ;;  %2125 = vmatpush.msrb.mxu1 %v871_v12  ;;  %v862_v4 = vld [vmem:[%s6093_s4 + $0x790] sm:$0xff]  ;;  %v1143_v12 = vld [vmem:[%s6093_s4 + $0x1058] sm:$0xff] }
 0x345   :  { %2173 = vmatpush.msrb.mxu3 %v895_v19  ;;  %2195 = vmatpush.msra.mxu0 %v909_v59  ;;  %v939_v19 = vld [vmem:[%s6093_s4 + $0x9f8] sm:$0xff] }
 0x346   :  { %2389 = vmatpush.msra.mxu2 %v1075_v10  ;;  %2126 = vmatpush.msrb.mxu1 %v870_v25  ;;  %v987_v10 = vld [vmem:[%s6093_s4 + $0xb78] sm:$0xff]  ;;  %v1142_v25 = vld [vmem:[%s6093_s4 + $0x1050] sm:$0xff] }
 0x347   :  { %2174 = vmatpush.msrb.mxu3 %v894_v5  ;;  %2196 = vmatpush.msra.mxu0 %v908_v13  ;;  %v1141_v5 = vld [vmem:[%s6093_s4 + $0x1048] sm:$0xff]  ;;  %v931_v59 = vld [vmem:[%s6093_s4 + $0x9b8] sm:$0xff]  ;;  %v930_v13 = vld [vmem:[%s6093_s4 + $0x9b0] sm:$0xff] }
 0x348   :  { %2390 = vmatpush.msra.mxu2 %v1074_v18  ;;  %2127 = vmatpush.msrb.mxu1 %v869_v27  ;;  %v986_v18 = vld [vmem:[%s6093_s4 + $0xb70] sm:$0xff]  ;;  %v964_v27 = vld [vmem:[%s6093_s4 + $0xac0] sm:$0xff] }
 0x349   :  { %2175 = vmatpush.msrb.mxu3 %v893_v31  ;;  %2197 = vmatmul.f32.vlgmr.msra.gmra.mxu0 %v3604_v37  ;;  %v965_v37 = vld [vmem:[%s6093_s4 + $0xac8] sm:$0xff]  ;;  %v963_v31 = vld [vmem:[%s6093_s4 + $0xab8] sm:$0xff] }
 0x34a   :  { %2391 = vmatpush.msra.mxu2 %v1073_v6  ;;  %2128 = vmatpush.msrb.mxu1 %v868_v33  ;;  %v938_v6 = vld [vmem:[%s6093_s4 + $0x9f0] sm:$0xff]  ;;  %v936_v33 = vld [vmem:[%s6093_s4 + $0x9e0] sm:$0xff] }
 0x34b   :  { %2176 = vmatpush.msrb.mxu3 %v892_v20  ;;  %2261 = vmatpush.msrb.mxu0 %v987_v10  ;;  %v935_v20 = vld [vmem:[%s6093_s4 + $0x9d8] sm:$0xff]  ;;  %v976_v10 = vld [vmem:[%s6093_s4 + $0xb20] sm:$0xff] }
 0x34c   :  { %2392 = vmatpush.msra.mxu2 %v1072_v30  ;;  %2129 = vmatpush.msrb.mxu1 %v867_v44  ;;  %v1140_v30 = vld [vmem:[%s6093_s4 + $0x1040] sm:$0xff]  ;;  %v962_v44 = vld [vmem:[%s6093_s4 + $0xab0] sm:$0xff] }
 0x34d   :  { %2177 = vmatmul.f32.vlgmr.msrb.gmra.mxu3 %v3599_v34  ;;  %v864_v34 = vld [vmem:[%s6093_s4 + $0x7a0] sm:$0xff]  ;;  %2262 = vmatpush.msrb.mxu0 %v986_v18  ;;  %v1210_v18 = vld [vmem:[%s6093_s4 + $0x1270] sm:$0xff] }
 0x34e   :  { %2393 = vmatpush.msra.mxu2 %v1071_v36  ;;  %2130 = vmatpush.msrb.mxu1 %v866_v52  ;;  %v983_v36 = vld [vmem:[%s6093_s4 + $0xb58] sm:$0xff]  ;;  %v934_v52 = vld [vmem:[%s6093_s4 + $0x9d0] sm:$0xff] }
 0x34f   :  { %2241 = vmatpush.msra.mxu3 %v971_v47  ;;  %2263 = vmatpush.msrb.mxu0 %v985_v1  ;;  %v1137_v47 = vld [vmem:[%s6093_s4 + $0x1028] sm:$0xff]  ;;  %v926_v1 = vld [vmem:[%s6093_s4 + $0x990] sm:$0xff] }
 0x350   :  { %2394 = vmatpush.msra.mxu2 %v1070_v46  ;;  %2131 = vmatpush.msrb.mxu1 %v865_v24  ;;  %v961_v46 = vld [vmem:[%s6093_s4 + $0xaa8] sm:$0xff]  ;;  %v1136_v24 = vld [vmem:[%s6093_s4 + $0x1020] sm:$0xff] }
 0x351   :  { %2242 = vmatpush.msra.mxu3 %v970_v49  ;;  %2264 = vmatpush.msrb.mxu0 %v984_v28  ;;  %v980_v49 = vld [vmem:[%s6093_s4 + $0xb40] sm:$0xff]  ;;  %v925_v28 = vld [vmem:[%s6093_s4 + $0x988] sm:$0xff] }
 0x352   :  { %2395 = vmatpush.msra.mxu2 %v1069_v40  ;;  %2132 = vmatpush.msrb.mxu1 %v864_v34  ;;  %v960_v40 = vld [vmem:[%s6093_s4 + $0xaa0] sm:$0xff]  ;;  %v979_v34 = vld [vmem:[%s6093_s4 + $0xb38] sm:$0xff] }
 0x353   :  { %2243 = vmatpush.msra.mxu3 %v969_v58  ;;  %2265 = vmatpush.msrb.mxu0 %v983_v36  ;;  %v958_v58 = vld [vmem:[%s6093_s4 + $0xa90] sm:$0xff] }
 0x354   :  { %2396 = vmatpush.msra.mxu2 %v1068_v41  ;;  %2133 = vmatpush.msrb.mxu1 %v863_v61  ;;  %v959_v41 = vld [vmem:[%s6093_s4 + $0xa98] sm:$0xff]  ;;  %v978_v61 = vld [vmem:[%s6093_s4 + $0xb30] sm:$0xff] }
 0x355   :  { %2244 = vmatpush.msra.mxu3 %v968_v2  ;;  %2397 = vmatmul.f32.vlgmr.msra.gmra.mxu2 %v4730_v43  ;;  %v981_v43 = vld [vmem:[%s6093_s4 + $0xb48] sm:$0xff]  ;;  %v1206_v36 = vld [vmem:[%s6093_s4 + $0x1250] sm:$0xff] }
 0x356   :  { %2461 = vmatpush.msrb.mxu2 %v1147_v57  ;;  %2134 = vmatpush.msrb.mxu1 %v862_v4  ;;  %v1135_v57 = vld [vmem:[%s6093_s4 + $0x1018] sm:$0xff]  ;;  %v957_v2 = vld [vmem:[%s6093_s4 + $0xa88] sm:$0xff] }
 0x357   :  { %2245 = vmatpush.msra.mxu3 %v967_v50  ;;  %2266 = vmatpush.msrb.mxu0 %v982_v45  ;;  %v977_v4 = vld [vmem:[%s6093_s4 + $0xb28] sm:$0xff]  ;;  %v956_v50 = vld [vmem:[%s6093_s4 + $0xa80] sm:$0xff]  ;;  %v1051_v45 = vld [vmem:[%s6093_s4 + $0xd78] sm:$0xff] }
 0x358   :  { %2462 = vmatpush.msrb.mxu2 %v1146_v60  ;;  %2135 = vmatpush.msrb.mxu1 %v861_v9  ;;  %v1134_v60 = vld [vmem:[%s6093_s4 + $0x1010] sm:$0xff]  ;;  %v1132_v9 = vld [vmem:[%s6093_s4 + $0x1000] sm:$0xff] }
 0x359   :  { %2246 = vmatpush.msra.mxu3 %v966_v11  ;;  %2267 = vmatpush.msrb.mxu0 %v981_v43  ;;  %v1211_v11 = vld [vmem:[%s6093_s4 + $0x1278] sm:$0xff]  ;;  %v1029_v43 = vld [vmem:[%s6093_s4 + $0xcc8] sm:$0xff] }
 0x35a   :  { %2463 = vmatpush.msrb.mxu2 %v1145_v63  ;;  %2136 = vmatpush.msrb.mxu1 %v860_v39  ;;  %v1133_v63 = vld [vmem:[%s6093_s4 + $0x1008] sm:$0xff]  ;;  %v975_v39 = vld [vmem:[%s6093_s4 + $0xb18] sm:$0xff] }
 0x35b   :  { %2137 = vmatmul.f32.vlgmr.msrb.gmra.mxu1 %v4320_v42  ;;  %v937_v42 = vld [vmem:[%s6093_s4 + $0x9e8] sm:$0xff]  ;;  %2247 = vmatpush.msra.mxu3 %v965_v37  ;;  %v974_v37 = vld [vmem:[%s6093_s4 + $0xb10] sm:$0xff] }
 0x35c   :  { %2464 = vmatpush.msrb.mxu2 %v1144_v7  ;;  %2201 = vmatpush.msra.mxu1 %v939_v19  ;;  %v929_v7 = vld [vmem:[%s6093_s4 + $0x9a8] sm:$0xff]  ;;  %v927_v19 = vld [vmem:[%s6093_s4 + $0x998] sm:$0xff] }
 0x35d   :  { %2248 = vmatpush.msra.mxu3 %v964_v27  ;;  %2268 = vmatpush.msrb.mxu0 %v980_v49  ;;  %v1208_v27 = vld [vmem:[%s6093_s4 + $0x1260] sm:$0xff]  ;;  %v999_v49 = vld [vmem:[%s6093_s4 + $0xbd8] sm:$0xff] }
 0x35e   :  { %2465 = vmatpush.msrb.mxu2 %v1143_v12  ;;  %2202 = vmatpush.msra.mxu1 %v938_v6  ;;  %v928_v12 = vld [vmem:[%s6093_s4 + $0x9a0] sm:$0xff]  ;;  %v1034_v6 = vld [vmem:[%s6093_s4 + $0xcf0] sm:$0xff] }
 0x35f   :  { %2249 = vmatpush.msra.mxu3 %v963_v31  ;;  %2269 = vmatpush.msrb.mxu0 %v979_v34  ;;  %v924_v31 = vld [vmem:[%s6093_s4 + $0x980] sm:$0xff]  ;;  %v998_v34 = vld [vmem:[%s6093_s4 + $0xbd0] sm:$0xff] }
 0x360   :  { %2466 = vmatpush.msrb.mxu2 %v1142_v25  ;;  %2203 = vmatpush.msra.mxu1 %v937_v42  ;;  %v1035_v25 = vld [vmem:[%s6093_s4 + $0xcf8] sm:$0xff]  ;;  %v972_v42 = vld [vmem:[%s6093_s4 + $0xb00] sm:$0xff] }
 0x361   :  { %2250 = vmatpush.msra.mxu3 %v962_v44  ;;  %2270 = vmatpush.msrb.mxu0 %v978_v61  ;;  %v1031_v44 = vld [vmem:[%s6093_s4 + $0xcd8] sm:$0xff]  ;;  %v997_v61 = vld [vmem:[%s6093_s4 + $0xbc8] sm:$0xff] }
 0x362   :  { %2467 = vmatpush.msrb.mxu2 %v1141_v5  ;;  %2204 = vmatpush.msra.mxu1 %v936_v33  ;;  %v973_v5 = vld [vmem:[%s6093_s4 + $0xb08] sm:$0xff]  ;;  %v1032_v33 = vld [vmem:[%s6093_s4 + $0xce0] sm:$0xff] }
 0x363   :  { %2251 = vmatpush.msra.mxu3 %v961_v46  ;;  %2271 = vmatpush.msrb.mxu0 %v977_v4  ;;  %v1030_v46 = vld [vmem:[%s6093_s4 + $0xcd0] sm:$0xff]  ;;  %v996_v4 = vld [vmem:[%s6093_s4 + $0xbc0] sm:$0xff] }
 0x364   :  { %2468 = vmatpush.msrb.mxu2 %v1140_v30  ;;  %2205 = vmatpush.msra.mxu1 %v935_v20  ;;  %v1207_v30 = vld [vmem:[%s6093_s4 + $0x1258] sm:$0xff]  ;;  %v1002_v20 = vld [vmem:[%s6093_s4 + $0xbf0] sm:$0xff] }
 0x365   :  { %2252 = vmatpush.msra.mxu3 %v960_v40  ;;  %2272 = vmatpush.msrb.mxu0 %v976_v10  ;;  %v1000_v40 = vld [vmem:[%s6093_s4 + $0xbe0] sm:$0xff]  ;;  %v995_v10 = vld [vmem:[%s6093_s4 + $0xbb8] sm:$0xff] }
 0x366   :  { %2469 = vmatpush.msrb.mxu2 %v1139_v35  ;;  %2206 = vmatpush.msra.mxu1 %v934_v52  ;;  %v1003_v35 = vld [vmem:[%s6093_s4 + $0xbf8] sm:$0xff]  ;;  %v1204_v52 = vld [vmem:[%s6093_s4 + $0x1240] sm:$0xff] }
 0x367   :  { %2253 = vmatpush.msra.mxu3 %v959_v41  ;;  %2273 = vmatpush.msrb.mxu0 %v975_v39  ;;  %v1202_v41 = vld [vmem:[%s6093_s4 + $0x1230] sm:$0xff]  ;;  %v1023_v39 = vld [vmem:[%s6093_s4 + $0xc98] sm:$0xff] }
 0x368   :  { %2470 = vmatpush.msrb.mxu2 %v1138_v56  ;;  %2207 = vmatpush.msra.mxu1 %v933_v48  ;;  %v1205_v56 = vld [vmem:[%s6093_s4 + $0x1248] sm:$0xff] }
 0x369   :  { %2254 = vmatpush.msra.mxu3 %v958_v58  ;;  %2274 = vmatpush.msrb.mxu0 %v974_v37  ;;  %v1049_v48 = vld [vmem:[%s6093_s4 + $0xd68] sm:$0xff]  ;;  %v1022_v37 = vld [vmem:[%s6093_s4 + $0xc90] sm:$0xff] }
 0x36a   :  { %2471 = vmatpush.msrb.mxu2 %v1137_v47  ;;  %2208 = vmatpush.msra.mxu1 %v932_v55  ;;  %v1050_v47 = vld [vmem:[%s6093_s4 + $0xd70] sm:$0xff]  ;;  %v1048_v55 = vld [vmem:[%s6093_s4 + $0xd60] sm:$0xff]  ;;  %v1201_v58 = vld [vmem:[%s6093_s4 + $0x1228] sm:$0xff] }
 0x36b   :  { %2255 = vmatpush.msra.mxu3 %v957_v2  ;;  %2275 = vmatpush.msrb.mxu0 %v973_v5  ;;  %v1200_v2 = vld [vmem:[%s6093_s4 + $0x1220] sm:$0xff]  ;;  %v1042_v5 = vld [vmem:[%s6093_s4 + $0xd30] sm:$0xff] }
 0x36c   :  { %2472 = vmatpush.msrb.mxu2 %v1136_v24  ;;  %2209 = vmatpush.msra.mxu1 %v931_v59  ;;  %v1028_v24 = vld [vmem:[%s6093_s4 + $0xcc0] sm:$0xff]  ;;  %v1047_v59 = vld [vmem:[%s6093_s4 + $0xd58] sm:$0xff] }
 0x36d   :  { %2256 = vmatpush.msra.mxu3 %v956_v50  ;;  %2276 = vmatpush.msrb.mxu0 %v972_v42  ;;  %v1199_v50 = vld [vmem:[%s6093_s4 + $0x1218] sm:$0xff]  ;;  %v1041_v42 = vld [vmem:[%s6093_s4 + $0xd28] sm:$0xff] }
 0x36e   :  { %2473 = vmatpush.msrb.mxu2 %v1135_v57  ;;  %2210 = vmatpush.msra.mxu1 %v930_v13  ;;  %v1027_v57 = vld [vmem:[%s6093_s4 + $0xcb8] sm:$0xff]  ;;  %v1046_v13 = vld [vmem:[%s6093_s4 + $0xd50] sm:$0xff] }
 0x36f   :  { %2257 = vmatmul.f32.vlgmr.msra.gmra.mxu3 %v4398_v14  ;;  %v1033_v14 = vld [vmem:[%s6093_s4 + $0xce8] sm:$0xff]  ;;  %2277 = vmatmul.f32.vlgmr.msrb.gmra.mxu0 %v4400_v15  ;;  %v1203_v15 = vld [vmem:[%s6093_s4 + $0x1238] sm:$0xff] }
 0x370   :  { %2474 = vmatpush.msrb.mxu2 %v1134_v60  ;;  %2211 = vmatpush.msra.mxu1 %v929_v7  ;;  %v1026_v60 = vld [vmem:[%s6093_s4 + $0xcb0] sm:$0xff]  ;;  %v1045_v7 = vld [vmem:[%s6093_s4 + $0xd48] sm:$0xff] }
 0x371   :  { %2321 = vmatpush.msrb.mxu3 %v1035_v25  ;;  %2341 = vmatpush.msra.mxu0 %v1051_v45  ;;  %v1043_v25 = vld [vmem:[%s6093_s4 + $0xd38] sm:$0xff] }
 0x372   :  { %2475 = vmatpush.msrb.mxu2 %v1133_v63  ;;  %2212 = vmatpush.msra.mxu1 %v928_v12  ;;  %v1025_v63 = vld [vmem:[%s6093_s4 + $0xca8] sm:$0xff]  ;;  %v1044_v12 = vld [vmem:[%s6093_s4 + $0xd40] sm:$0xff]  ;;  %v1039_v45 = vld [vmem:[%s6093_s4 + $0xd18] sm:$0xff] }
 0x373   :  { %2322 = vmatpush.msrb.mxu3 %v1034_v6  ;;  %2342 = vmatpush.msra.mxu0 %v1050_v47  ;;  %v1275_v6 = vld [vmem:[%s6093_s4 + $0x1478] sm:$0xff]  ;;  %v1038_v47 = vld [vmem:[%s6093_s4 + $0xd10] sm:$0xff] }
 0x374   :  { %2476 = vmatpush.msrb.mxu2 %v1132_v9  ;;  %2213 = vmatpush.msra.mxu1 %v927_v19  ;;  %v1024_v9 = vld [vmem:[%s6093_s4 + $0xca0] sm:$0xff]  ;;  %v1197_v19 = vld [vmem:[%s6093_s4 + $0x1208] sm:$0xff] }
 0x375   :  { %2477 = vmatmul.f32.vlgmr.msrb.gmra.mxu2 %v3673_v8  ;;  %v1209_v8 = vld [vmem:[%s6093_s4 + $0x1268] sm:$0xff]  ;;  %2323 = vmatpush.msrb.mxu3 %v1033_v14  ;;  %v1274_v14 = vld [vmem:[%s6093_s4 + $0x1470] sm:$0xff] }
 0x376   :  { %2541 = vmatpush.msra.mxu2 %v1211_v11  ;;  %2214 = vmatpush.msra.mxu1 %v926_v1  ;;  %v1198_v11 = vld [vmem:[%s6093_s4 + $0x1210] sm:$0xff]  ;;  %v1196_v1 = vld [vmem:[%s6093_s4 + $0x1200] sm:$0xff] }
 0x377   :  { %2324 = vmatpush.msrb.mxu3 %v1032_v33  ;;  %2343 = vmatpush.msra.mxu0 %v1049_v48  ;;  %v1273_v33 = vld [vmem:[%s6093_s4 + $0x1468] sm:$0xff] }
 0x378   :  { %2542 = vmatpush.msra.mxu2 %v1210_v18  ;;  %2215 = vmatpush.msra.mxu1 %v925_v28  ;;  %v994_v18 = vld [vmem:[%s6093_s4 + $0xbb0] sm:$0xff]  ;;  %v1021_v28 = vld [vmem:[%s6093_s4 + $0xc88] sm:$0xff] }
 0x379   :  { %2325 = vmatpush.msrb.mxu3 %v1031_v44  ;;  %2344 = vmatpush.msra.mxu0 %v1048_v55  ;;  %v1272_v44 = vld [vmem:[%s6093_s4 + $0x1460] sm:$0xff]  ;;  %v1037_v48 = vld [vmem:[%s6093_s4 + $0xd08] sm:$0xff] }
 0x37a   :  { %2543 = vmatpush.msra.mxu2 %v1209_v8  ;;  %2216 = vmatpush.msra.mxu1 %v924_v31  ;;  %v993_v8 = vld [vmem:[%s6093_s4 + $0xba8] sm:$0xff]  ;;  %v1020_v31 = vld [vmem:[%s6093_s4 + $0xc80] sm:$0xff] }
 0x37b   :  { %2217 = vmatmul.f32.vlgmr.msra.gmra.mxu1 %v3606_v38  ;;  %v1001_v38 = vld [vmem:[%s6093_s4 + $0xbe8] sm:$0xff]  ;;  %2326 = vmatpush.msrb.mxu3 %v1030_v46  ;;  %v1271_v46 = vld [vmem:[%s6093_s4 + $0x1458] sm:$0xff]  ;;  %v1036_v55 = vld [vmem:[%s6093_s4 + $0xd00] sm:$0xff] }
 0x37c   :  { %2544 = vmatpush.msra.mxu2 %v1208_v27  ;;  %2281 = vmatpush.msrb.mxu1 %v1003_v35  ;;  %v992_v27 = vld [vmem:[%s6093_s4 + $0xba0] sm:$0xff] }
 0x37d   :  { %2327 = vmatpush.msrb.mxu3 %v1029_v43  ;;  %2345 = vmatpush.msra.mxu0 %v1047_v59  ;;  %v1040_v35 = vld [vmem:[%s6093_s4 + $0xd20] sm:$0xff]  ;;  %v1067_v43 = vld [vmem:[%s6093_s4 + $0xdf8] sm:$0xff] }
 0x37e   :  { %2545 = vmatpush.msra.mxu2 %v1207_v30  ;;  %2282 = vmatpush.msrb.mxu1 %v1002_v20  ;;  %v991_v30 = vld [vmem:[%s6093_s4 + $0xb98] sm:$0xff] }
 0x37f   :  { %2328 = vmatpush.msrb.mxu3 %v1028_v24  ;;  %2346 = vmatpush.msra.mxu0 %v1046_v13  ;;  %v1099_v20 = vld [vmem:[%s6093_s4 + $0xef8] sm:$0xff]  ;;  %v1066_v24 = vld [vmem:[%s6093_s4 + $0xdf0] sm:$0xff] }
 0x380   :  { %2546 = vmatpush.msra.mxu2 %v1206_v36  ;;  %2283 = vmatpush.msrb.mxu1 %v1001_v38  ;;  %v990_v36 = vld [vmem:[%s6093_s4 + $0xb90] sm:$0xff]  ;;  %v1267_v59 = vld [vmem:[%s6093_s4 + $0x1438] sm:$0xff] }
 0x381   :  { %2329 = vmatpush.msrb.mxu3 %v1027_v57  ;;  %2347 = vmatpush.msra.mxu0 %v1045_v7  ;;  %v1098_v38 = vld [vmem:[%s6093_s4 + $0xef0] sm:$0xff]  ;;  %v1095_v57 = vld [vmem:[%s6093_s4 + $0xed8] sm:$0xff]  ;;  %v1092_v7 = vld [vmem:[%s6093_s4 + $0xec0] sm:$0xff] }
 0x382   :  { %2547 = vmatpush.msra.mxu2 %v1205_v56  ;;  %2284 = vmatpush.msrb.mxu1 %v1000_v40  ;;  %v989_v56 = vld [vmem:[%s6093_s4 + $0xb88] sm:$0xff]  ;;  %v1266_v13 = vld [vmem:[%s6093_s4 + $0x1430] sm:$0xff] }
 0x383   :  { %2330 = vmatpush.msrb.mxu3 %v1026_v60  ;;  %2348 = vmatpush.msra.mxu0 %v1044_v12  ;;  %v1097_v40 = vld [vmem:[%s6093_s4 + $0xee8] sm:$0xff]  ;;  %v1094_v60 = vld [vmem:[%s6093_s4 + $0xed0] sm:$0xff]  ;;  %v1750_v12 = vld.sshfl [vmem:[#allocation1 + $0x20] sm:$0xff pattern:$0x73625140] }
 0x384   :  { %2548 = vmatpush.msra.mxu2 %v1204_v52  ;;  %2285 = vmatpush.msrb.mxu1 %v999_v49  ;;  %v988_v52 = vld [vmem:[%s6093_s4 + $0xb80] sm:$0xff] }
 0x385   :  { %2331 = vmatpush.msrb.mxu3 %v1025_v63  ;;  %2349 = vmatpush.msra.mxu0 %v1043_v25  ;;  %v1096_v49 = vld [vmem:[%s6093_s4 + $0xee0] sm:$0xff]  ;;  %v1113_v63 = vld [vmem:[%s6093_s4 + $0xf68] sm:$0xff]  ;;  %v1263_v25 = vld [vmem:[%s6093_s4 + $0x1418] sm:$0xff] }
 0x386   :  { %2549 = vmatpush.msra.mxu2 %v1203_v15  ;;  %2286 = vmatpush.msrb.mxu1 %v998_v34  ;;  %v1269_v15 = vld [vmem:[%s6093_s4 + $0x1448] sm:$0xff]  ;;  %v1115_v34 = vld [vmem:[%s6093_s4 + $0xf78] sm:$0xff] }
 0x387   :  { %2332 = vmatpush.msrb.mxu3 %v1024_v9  ;;  %2350 = vmatpush.msra.mxu0 %v1042_v5  ;;  %v1112_v9 = vld [vmem:[%s6093_s4 + $0xf60] sm:$0xff]  ;;  %v1089_v5 = vld [vmem:[%s6093_s4 + $0xea8] sm:$0xff] }
 0x388   :  { %2550 = vmatpush.msra.mxu2 %v1202_v41  ;;  %2287 = vmatpush.msrb.mxu1 %v997_v61  ;;  %v1268_v41 = vld [vmem:[%s6093_s4 + $0x1440] sm:$0xff]  ;;  %v1114_v61 = vld [vmem:[%s6093_s4 + $0xf70] sm:$0xff] }
 0x389   :  { %2333 = vmatpush.msrb.mxu3 %v1023_v39  ;;  %2351 = vmatpush.msra.mxu0 %v1041_v42  ;;  %v1091_v39 = vld [vmem:[%s6093_s4 + $0xeb8] sm:$0xff]  ;;  %v1088_v42 = vld [vmem:[%s6093_s4 + $0xea0] sm:$0xff] }
 0x38a   :  { %2551 = vmatpush.msra.mxu2 %v1201_v58  ;;  %2288 = vmatpush.msrb.mxu1 %v996_v4  ;;  %v1064_v58 = vld [vmem:[%s6093_s4 + $0xde0] sm:$0xff]  ;;  %v1062_v4 = vld [vmem:[%s6093_s4 + $0xdd0] sm:$0xff] }
 0x38b   :  { %2334 = vmatpush.msrb.mxu3 %v1022_v37  ;;  %2352 = vmatpush.msra.mxu0 %v1040_v35  ;;  %v1090_v37 = vld [vmem:[%s6093_s4 + $0xeb0] sm:$0xff]  ;;  %v1087_v35 = vld [vmem:[%s6093_s4 + $0xe98] sm:$0xff] }
 0x38c   :  { %2552 = vmatpush.msra.mxu2 %v1200_v2  ;;  %2289 = vmatpush.msrb.mxu1 %v995_v10  ;;  %v1063_v2 = vld [vmem:[%s6093_s4 + $0xdd8] sm:$0xff]  ;;  %v1061_v10 = vld [vmem:[%s6093_s4 + $0xdc8] sm:$0xff] }
 0x38d   :  { %2335 = vmatpush.msrb.mxu3 %v1021_v28  ;;  %2353 = vmatpush.msra.mxu0 %v1039_v45  ;;  %v1109_v28 = vld [vmem:[%s6093_s4 + $0xf48] sm:$0xff]  ;;  %v1086_v45 = vld [vmem:[%s6093_s4 + $0xe90] sm:$0xff] }
 0x38e   :  { %2553 = vmatpush.msra.mxu2 %v1199_v50  ;;  %2290 = vmatpush.msrb.mxu1 %v994_v18  ;;  %v1265_v50 = vld [vmem:[%s6093_s4 + $0x1428] sm:$0xff]  ;;  %v1060_v18 = vld [vmem:[%s6093_s4 + $0xdc0] sm:$0xff] }
 0x38f   :  { %2336 = vmatpush.msrb.mxu3 %v1020_v31  ;;  %2354 = vmatpush.msra.mxu0 %v1038_v47  ;;  %v1108_v31 = vld [vmem:[%s6093_s4 + $0xf40] sm:$0xff]  ;;  %v1085_v47 = vld [vmem:[%s6093_s4 + $0xe88] sm:$0xff] }
 0x390   :  { %2554 = vmatpush.msra.mxu2 %v1198_v11  ;;  %2291 = vmatpush.msrb.mxu1 %v993_v8  ;;  %v1264_v11 = vld [vmem:[%s6093_s4 + $0x1420] sm:$0xff]  ;;  %v1059_v8 = vld [vmem:[%s6093_s4 + $0xdb8] sm:$0xff] }
 0x391   :  { %2337 = vmatmul.f32.vlgmr.msrb.gmra.mxu3 %v3635_v51  ;;  %v1270_v51 = vld [vmem:[%s6093_s4 + $0x1450] sm:$0xff]  ;;  %2355 = vmatpush.msra.mxu0 %v1037_v48 }
 0x392   :  { %2555 = vmatpush.msra.mxu2 %v1197_v19  ;;  %2292 = vmatpush.msrb.mxu1 %v992_v27  ;;  %v1111_v19 = vld [vmem:[%s6093_s4 + $0xf58] sm:$0xff]  ;;  %v1058_v27 = vld [vmem:[%s6093_s4 + $0xdb0] sm:$0xff] }
 0x393   :  { %2401 = vmatpush.msra.mxu3 %v1099_v20  ;;  %2356 = vmatpush.msra.mxu0 %v1036_v55  ;;  %v1107_v20 = vld [vmem:[%s6093_s4 + $0xf38] sm:$0xff]  ;;  %v5355_v48 = vld.sshfl [vmem:[#allocation1 + $0x30] sm:$0xff pattern:$0x73625140]  ;;  %v1052_v55 = vld [vmem:[%s6093_s4 + $0xd80] sm:$0xff] }
 0x394   :  { %2556 = vmatpush.msra.mxu2 %v1196_v1  ;;  %2293 = vmatpush.msrb.mxu1 %v991_v30  ;;  %v1110_v1 = vld [vmem:[%s6093_s4 + $0xf50] sm:$0xff]  ;;  %v1057_v30 = vld [vmem:[%s6093_s4 + $0xda8] sm:$0xff] }
 0x395   :  { %2402 = vmatpush.msra.mxu3 %v1098_v38  ;;  %2357 = vmatmul.f32.vlgmr.msra.gmra.mxu0 %v3637_v53  ;;  %v1093_v53 = vld [vmem:[%s6093_s4 + $0xec8] sm:$0xff]  ;;  %v1106_v38 = vld [vmem:[%s6093_s4 + $0xf30] sm:$0xff] }
 0x396   :  { %2621 = vmatpush.msrb.mxu2 %v1275_v6  ;;  %2294 = vmatpush.msrb.mxu1 %v990_v36  ;;  %v1262_v6 = vld [vmem:[%s6093_s4 + $0x1410] sm:$0xff]  ;;  %v1056_v36 = vld [vmem:[%s6093_s4 + $0xda0] sm:$0xff] }
 0x397   :  { %2403 = vmatpush.msra.mxu3 %v1097_v40  ;;  %2421 = vmatpush.msrb.mxu0 %v1115_v34  ;;  %v1053_v40 = vld [vmem:[%s6093_s4 + $0xd88] sm:$0xff]  ;;  %v1103_v34 = vld [vmem:[%s6093_s4 + $0xf18] sm:$0xff] }
 0x398   :  { %2622 = vmatpush.msrb.mxu2 %v1274_v14  ;;  %2295 = vmatpush.msrb.mxu1 %v989_v56  ;;  %v1261_v14 = vld [vmem:[%s6093_s4 + $0x1408] sm:$0xff]  ;;  %v1055_v56 = vld [vmem:[%s6093_s4 + $0xd98] sm:$0xff] }
 0x399   :  { %2404 = vmatpush.msra.mxu3 %v1096_v49  ;;  %2422 = vmatpush.msrb.mxu0 %v1114_v61  ;;  %v1104_v49 = vld [vmem:[%s6093_s4 + $0xf20] sm:$0xff]  ;;  %v1334_v61 = vld [vmem:[%s6093_s4 + $0x1650] sm:$0xff] }
 0x39a   :  { %2623 = vmatpush.msrb.mxu2 %v1273_v33  ;;  %2296 = vmatpush.msrb.mxu1 %v988_v52  ;;  %v1260_v33 = vld [vmem:[%s6093_s4 + $0x1400] sm:$0xff]  ;;  %v1054_v52 = vld [vmem:[%s6093_s4 + $0xd90] sm:$0xff] }
 0x39b   :  { %2297 = vmatmul.f32.vlgmr.msrb.gmra.mxu1 %v4402_v16  ;;  %v1065_v16 = vld [vmem:[%s6093_s4 + $0xde8] sm:$0xff]  ;;  %2405 = vmatpush.msra.mxu3 %v1095_v57  ;;  %v1335_v57 = vld [vmem:[%s6093_s4 + $0x1658] sm:$0xff] }
 0x39c   :  { %2624 = vmatpush.msrb.mxu2 %v1272_v44  ;;  %2361 = vmatpush.msra.mxu1 %v1067_v43  ;;  %v1339_v44 = vld [vmem:[%s6093_s4 + $0x1678] sm:$0xff]  ;;  %v5347_v43 = vld.sshfl [vmem:[#allocation1 + $0x28] sm:$0xff pattern:$0x73625140] }
 0x39d   :  { %2406 = vmatpush.msra.mxu3 %v1094_v60  ;;  %2423 = vmatpush.msrb.mxu0 %v1113_v63  ;;  %v1162_v60 = vld [vmem:[%s6093_s4 + $0x10f0] sm:$0xff]  ;;  %v1101_v63 = vld [vmem:[%s6093_s4 + $0xf08] sm:$0xff] }
 0x39e   :  { %2625 = vmatpush.msrb.mxu2 %v1271_v46  ;;  %2362 = vmatpush.msra.mxu1 %v1066_v24  ;;  %v1338_v46 = vld [vmem:[%s6093_s4 + $0x1670] sm:$0xff]  ;;  %v1336_v24 = vld [vmem:[%s6093_s4 + $0x1660] sm:$0xff] }
 0x39f   :  { %2407 = vmatpush.msra.mxu3 %v1093_v53  ;;  %2424 = vmatpush.msrb.mxu0 %v1112_v9  ;;  %v1333_v53 = vld [vmem:[%s6093_s4 + $0x1648] sm:$0xff]  ;;  %v1128_v9 = vld [vmem:[%s6093_s4 + $0xfe0] sm:$0xff] }
 0x3a0   :  { %2626 = vmatpush.msrb.mxu2 %v1270_v51  ;;  %2363 = vmatpush.msra.mxu1 %v1065_v16  ;;  %v1105_v51 = vld [vmem:[%s6093_s4 + $0xf28] sm:$0xff]  ;;  %v1163_v16 = vld [vmem:[%s6093_s4 + $0x10f8] sm:$0xff] }
 0x3a1   :  { %2408 = vmatpush.msra.mxu3 %v1092_v7  ;;  %2557 = vmatmul.f32.vlgmr.msra.gmra.mxu2 %v1750_v12  ;;  %v1100_v7 = vld [vmem:[%s6093_s4 + $0xf00] sm:$0xff]  ;;  %v1331_v12 = vld [vmem:[%s6093_s4 + $0x1638] sm:$0xff] }
 0x3a2   :  { %2627 = vmatpush.msrb.mxu2 %v1269_v15  ;;  %2364 = vmatpush.msra.mxu1 %v1064_v58  ;;  %v1084_v15 = vld [vmem:[%s6093_s4 + $0xe80] sm:$0xff]  ;;  %v618_v58 = vld [vmem:[%s6090_s1 + $0x58] sm:$0xff] }
 0x3a3   :  { %2409 = vmatpush.msra.mxu3 %v1091_v39  ;;  %2425 = vmatpush.msrb.mxu0 %v1111_v19  ;;  %v1127_v39 = vld [vmem:[%s6093_s4 + $0xfd8] sm:$0xff]  ;;  %v1178_v19 = vld [vmem:[%s6093_s4 + $0x1170] sm:$0xff] }
 0x3a4   :  { %2628 = vmatpush.msrb.mxu2 %v1268_v41  ;;  %2365 = vmatpush.msra.mxu1 %v1063_v2  ;;  %v5363_v41 = vld.sshfl [vmem:[#allocation1 + $0x38] sm:$0xff pattern:$0x73625140]  ;;  %v1130_v2 = vld [vmem:[%s6093_s4 + $0xff0] sm:$0xff] }
 0x3a5   :  { %2410 = vmatpush.msra.mxu3 %v1090_v37  ;;  %2426 = vmatpush.msrb.mxu0 %v1110_v1  ;;  %1755 = vst [vmem:[#allocation1 + $0x20] ss:$4 sm:$0xff] %v618_v58  ;;  %v1126_v37 = vld [vmem:[%s6093_s4 + $0xfd0] sm:$0xff]  ;;  %v1329_v1 = vld [vmem:[%s6093_s4 + $0x1628] sm:$0xff] }
 0x3a6   :  { %2629 = vmatpush.msrb.mxu2 %v1267_v59  ;;  %2366 = vmatpush.msra.mxu1 %v1062_v4  ;;  %v1131_v59 = vld [vmem:[%s6093_s4 + $0xff8] sm:$0xff]  ;;  %v1160_v4 = vld [vmem:[%s6093_s4 + $0x10e0] sm:$0xff]  ;;  %v1393_v58 = vld [vmem:[%s6093_s4 + $0x1828] sm:$0xff] }
 0x3a7   :  { %2411 = vmatpush.msra.mxu3 %v1089_v5  ;;  %2427 = vmatpush.msrb.mxu0 %v1109_v28  ;;  %v1156_v5 = vld [vmem:[%s6093_s4 + $0x10c0] sm:$0xff] }
 0x3a8   :  { %2630 = vmatpush.msrb.mxu2 %v1266_v13  ;;  %2367 = vmatpush.msra.mxu1 %v1061_v10  ;;  %v1161_v13 = vld [vmem:[%s6093_s4 + $0x10e8] sm:$0xff]  ;;  %v1159_v10 = vld [vmem:[%s6093_s4 + $0x10d8] sm:$0xff]  ;;  %v1328_v28 = vld [vmem:[%s6093_s4 + $0x1620] sm:$0xff] }
 0x3a9   :  { %2412 = vmatpush.msra.mxu3 %v1088_v42  ;;  %2428 = vmatpush.msrb.mxu0 %v1108_v31  ;;  %v1155_v42 = vld [vmem:[%s6093_s4 + $0x10b8] sm:$0xff] }
 0x3aa   :  { %2631 = vmatpush.msrb.mxu2 %v1265_v50  ;;  %2368 = vmatpush.msra.mxu1 %v1060_v18  ;;  %v1332_v50 = vld [vmem:[%s6093_s4 + $0x1640] sm:$0xff]  ;;  %v1158_v18 = vld [vmem:[%s6093_s4 + $0x10d0] sm:$0xff]  ;;  %v1327_v31 = vld [vmem:[%s6093_s4 + $0x1618] sm:$0xff] }
 0x3ab   :  { %2413 = vmatpush.msra.mxu3 %v1087_v35  ;;  %2429 = vmatpush.msrb.mxu0 %v1107_v20  ;;  %v1154_v35 = vld [vmem:[%s6093_s4 + $0x10b0] sm:$0xff] }
 0x3ac   :  { %2632 = vmatpush.msrb.mxu2 %v1264_v11  ;;  %2369 = vmatpush.msra.mxu1 %v1059_v8  ;;  %v1179_v11 = vld [vmem:[%s6093_s4 + $0x1178] sm:$0xff]  ;;  %v1177_v8 = vld [vmem:[%s6093_s4 + $0x1168] sm:$0xff]  ;;  %v1122_v20 = vld [vmem:[%s6093_s4 + $0xfb0] sm:$0xff] }
 0x3ad   :  { %2414 = vmatpush.msra.mxu3 %v1086_v45  ;;  %2430 = vmatpush.msrb.mxu0 %v1106_v38  ;;  %v1173_v45 = vld [vmem:[%s6093_s4 + $0x1148] sm:$0xff] }
 0x3ae   :  { %2633 = vmatpush.msrb.mxu2 %v1263_v25  ;;  %2370 = vmatpush.msra.mxu1 %v1058_v27  ;;  %v1330_v25 = vld [vmem:[%s6093_s4 + $0x1630] sm:$0xff]  ;;  %v1176_v27 = vld [vmem:[%s6093_s4 + $0x1160] sm:$0xff]  ;;  %v1121_v38 = vld [vmem:[%s6093_s4 + $0xfa8] sm:$0xff] }
 0x3af   :  { %2415 = vmatpush.msra.mxu3 %v1085_v47  ;;  %2431 = vmatpush.msrb.mxu0 %v1105_v51  ;;  %v1172_v47 = vld [vmem:[%s6093_s4 + $0x1140] sm:$0xff] }
 0x3b0   :  { %2634 = vmatpush.msrb.mxu2 %v1262_v6  ;;  %2371 = vmatpush.msra.mxu1 %v1057_v30  ;;  %v1125_v6 = vld [vmem:[%s6093_s4 + $0xfc8] sm:$0xff]  ;;  %v1175_v30 = vld [vmem:[%s6093_s4 + $0x1158] sm:$0xff]  ;;  %v1120_v51 = vld [vmem:[%s6093_s4 + $0xfa0] sm:$0xff] }
 0x3b1   :  { %2416 = vmatpush.msra.mxu3 %v1084_v15  ;;  %2432 = vmatpush.msrb.mxu0 %v1104_v49  ;;  %v1151_v15 = vld [vmem:[%s6093_s4 + $0x1098] sm:$0xff] }
 0x3b2   :  { %2635 = vmatpush.msrb.mxu2 %v1261_v14  ;;  %2372 = vmatpush.msra.mxu1 %v1056_v36  ;;  %v1124_v14 = vld [vmem:[%s6093_s4 + $0xfc0] sm:$0xff]  ;;  %v1174_v36 = vld [vmem:[%s6093_s4 + $0x1150] sm:$0xff]  ;;  %v1119_v49 = vld [vmem:[%s6093_s4 + $0xf98] sm:$0xff] }
 0x3b3   :  { %2417 = vmatmul.f32.vlgmr.msra.gmra.mxu3 %v4691_v26  ;;  %v1102_v26 = vld [vmem:[%s6093_s4 + $0xf10] sm:$0xff]  ;;  %2433 = vmatpush.msrb.mxu0 %v1103_v34 }
 0x3b4   :  { %2636 = vmatpush.msrb.mxu2 %v1260_v33  ;;  %2373 = vmatpush.msra.mxu1 %v1055_v56  ;;  %v1123_v33 = vld [vmem:[%s6093_s4 + $0xfb8] sm:$0xff]  ;;  %v1153_v56 = vld [vmem:[%s6093_s4 + $0x10a8] sm:$0xff]  ;;  %v1118_v34 = vld [vmem:[%s6093_s4 + $0xf90] sm:$0xff] }
 0x3b5   :  { %2637 = vmatmul.f32.vlgmr.msrb.gmra.mxu2 %v3701_v23  ;;  %v1337_v23 = vld [vmem:[%s6093_s4 + $0x1668] sm:$0xff]  ;;  %2481 = vmatpush.msrb.mxu3 %v1163_v16  ;;  %v1150_v16 = vld [vmem:[%s6093_s4 + $0x1090] sm:$0xff] }
 0x3b6   :  { %2701 = vmatpush.msra.mxu2 %v1339_v44  ;;  %2374 = vmatpush.msra.mxu1 %v1054_v52  ;;  %v1326_v44 = vld [vmem:[%s6093_s4 + $0x1610] sm:$0xff]  ;;  %v1152_v52 = vld [vmem:[%s6093_s4 + $0x10a0] sm:$0xff] }
 0x3b7   :  { %2482 = vmatpush.msrb.mxu3 %v1162_v60  ;;  %2434 = vmatpush.msrb.mxu0 %v1102_v26  ;;  %v1169_v60 = vld [vmem:[%s6093_s4 + $0x1128] sm:$0xff]  ;;  %v1392_v26 = vld [vmem:[%s6093_s4 + $0x1820] sm:$0xff] }
 0x3b8   :  { %2702 = vmatpush.msra.mxu2 %v1338_v46  ;;  %2375 = vmatpush.msra.mxu1 %v1053_v40  ;;  %v1325_v46 = vld [vmem:[%s6093_s4 + $0x1608] sm:$0xff]  ;;  %v1395_v40 = vld [vmem:[%s6093_s4 + $0x1838] sm:$0xff] }
 0x3b9   :  { %2483 = vmatpush.msrb.mxu3 %v1161_v13  ;;  %2435 = vmatpush.msrb.mxu0 %v1101_v63  ;;  %v1168_v13 = vld [vmem:[%s6093_s4 + $0x1120] sm:$0xff]  ;;  %v1391_v63 = vld [vmem:[%s6093_s4 + $0x1818] sm:$0xff] }
 0x3ba   :  { %2703 = vmatpush.msra.mxu2 %v1337_v23  ;;  %2376 = vmatpush.msra.mxu1 %v1052_v55  ;;  %v1324_v23 = vld [vmem:[%s6093_s4 + $0x1600] sm:$0xff]  ;;  %v1394_v55 = vld [vmem:[%s6093_s4 + $0x1830] sm:$0xff] }
 0x3bb   :  { %2377 = vmatmul.f32.vlgmr.msra.gmra.mxu1 %v3639_v54  ;;  %v1129_v54 = vld [vmem:[%s6093_s4 + $0xfe8] sm:$0xff]  ;;  %2484 = vmatpush.msrb.mxu3 %v1160_v4  ;;  %v1116_v4 = vld [vmem:[%s6093_s4 + $0xf80] sm:$0xff] }
 0x3bc   :  { %2704 = vmatpush.msra.mxu2 %v1336_v24  ;;  %2441 = vmatpush.msrb.mxu1 %v1131_v59  ;;  %v1171_v24 = vld [vmem:[%s6093_s4 + $0x1138] sm:$0xff]  ;;  %v1149_v59 = vld [vmem:[%s6093_s4 + $0x1088] sm:$0xff] }
 0x3bd   :  { %2436 = vmatpush.msrb.mxu0 %v1100_v7  ;;  %2485 = vmatpush.msrb.mxu3 %v1159_v10  ;;  %v1195_v7 = vld [vmem:[%s6093_s4 + $0x11f8] sm:$0xff]  ;;  %v1390_v10 = vld [vmem:[%s6093_s4 + $0x1810] sm:$0xff] }
 0x3be   :  { %2705 = vmatpush.msra.mxu2 %v1335_v57  ;;  %2442 = vmatpush.msrb.mxu1 %v1130_v2  ;;  %v1170_v57 = vld [vmem:[%s6093_s4 + $0x1130] sm:$0xff]  ;;  %v1148_v2 = vld [vmem:[%s6093_s4 + $0x1080] sm:$0xff] }
 0x3bf   :  { %2437 = vmatmul.f32.vlgmr.msrb.gmra.mxu0 %v4699_v29  ;;  %v1157_v29 = vld [vmem:[%s6093_s4 + $0x10c8] sm:$0xff]  ;;  %2486 = vmatpush.msrb.mxu3 %v1158_v18 }
 0x3c0   :  { %2706 = vmatpush.msra.mxu2 %v1334_v61  ;;  %2443 = vmatpush.msrb.mxu1 %v1129_v54  ;;  %v1117_v61 = vld [vmem:[%s6093_s4 + $0xf88] sm:$0xff]  ;;  %v1227_v54 = vld [vmem:[%s6093_s4 + $0x12f8] sm:$0xff] }
 0x3c1   :  { %2501 = vmatpush.msra.mxu0 %v1179_v11  ;;  %2487 = vmatpush.msrb.mxu3 %v1157_v29  ;;  %v1166_v11 = vld [vmem:[%s6093_s4 + $0x1110] sm:$0xff]  ;;  %v1165_v18 = vld [vmem:[%s6093_s4 + $0x1108] sm:$0xff]  ;;  %v1192_v29 = vld [vmem:[%s6093_s4 + $0x11e0] sm:$0xff] }
 0x3c2   :  { %2707 = vmatpush.msra.mxu2 %v1333_v53  ;;  %2444 = vmatpush.msrb.mxu1 %v1128_v9  ;;  %v1760_v53 = vld.sshfl [vmem:[#allocation1 + $0x20] sm:$0xff pattern:$0x73625140]  ;;  %v1226_v9 = vld [vmem:[%s6093_s4 + $0x12f0] sm:$0xff] }
 0x3c3   :  { %2502 = vmatpush.msra.mxu0 %v1178_v19  ;;  %2488 = vmatpush.msrb.mxu3 %v1156_v5  ;;  %v1224_v19 = vld [vmem:[%s6093_s4 + $0x12e0] sm:$0xff]  ;;  %v1191_v5 = vld [vmem:[%s6093_s4 + $0x11d8] sm:$0xff] }
 0x3c4   :  { %2708 = vmatpush.msra.mxu2 %v1332_v50  ;;  %2445 = vmatpush.msrb.mxu1 %v1127_v39  ;;  %v1167_v50 = vld [vmem:[%s6093_s4 + $0x1118] sm:$0xff]  ;;  %v1389_v39 = vld [vmem:[%s6093_s4 + $0x1808] sm:$0xff] }
 0x3c5   :  { %2503 = vmatpush.msra.mxu0 %v1177_v8  ;;  %2489 = vmatpush.msrb.mxu3 %v1155_v42  ;;  %v1223_v8 = vld [vmem:[%s6093_s4 + $0x12d8] sm:$0xff]  ;;  %v1241_v42 = vld [vmem:[%s6093_s4 + $0x1368] sm:$0xff] }
 0x3c6   :  { %2709 = vmatpush.msra.mxu2 %v1331_v12  ;;  %2446 = vmatpush.msrb.mxu1 %v1126_v37  ;;  %v1225_v12 = vld [vmem:[%s6093_s4 + $0x12e8] sm:$0xff]  ;;  %v1164_v37 = vld [vmem:[%s6093_s4 + $0x1100] sm:$0xff] }
 0x3c7   :  { %2504 = vmatpush.msra.mxu0 %v1176_v27  ;;  %2490 = vmatpush.msrb.mxu3 %v1154_v35  ;;  %v1222_v27 = vld [vmem:[%s6093_s4 + $0x12d0] sm:$0xff]  ;;  %v1188_v35 = vld [vmem:[%s6093_s4 + $0x11c0] sm:$0xff] }
 0x3c8   :  { %2710 = vmatpush.msra.mxu2 %v1330_v25  ;;  %2447 = vmatpush.msrb.mxu1 %v1125_v6  ;;  %v1388_v25 = vld [vmem:[%s6093_s4 + $0x1800] sm:$0xff]  ;;  %v1243_v6 = vld [vmem:[%s6093_s4 + $0x1378] sm:$0xff] }
 0x3c9   :  { %2505 = vmatpush.msra.mxu0 %v1175_v30  ;;  %2491 = vmatpush.msrb.mxu3 %v1153_v56  ;;  %v1189_v30 = vld [vmem:[%s6093_s4 + $0x11c8] sm:$0xff]  ;;  %v1218_v56 = vld [vmem:[%s6093_s4 + $0x12b0] sm:$0xff] }
 0x3ca   :  { %2711 = vmatpush.msra.mxu2 %v1329_v1  ;;  %2448 = vmatpush.msrb.mxu1 %v1124_v14  ;;  %v1765_v1 = vld.sshfl [vmem:[#allocation1] sm:$0xff pattern:$0x73625140]  ;;  %v1190_v14 = vld [vmem:[%s6093_s4 + $0x11d0] sm:$0xff] }
 0x3cb   :  { %2506 = vmatpush.msra.mxu0 %v1174_v36  ;;  %2492 = vmatpush.msrb.mxu3 %v1152_v52  ;;  %v1219_v36 = vld [vmem:[%s6093_s4 + $0x12b8] sm:$0xff]  ;;  %v1237_v52 = vld [vmem:[%s6093_s4 + $0x1348] sm:$0xff] }
 0x3cc   :  { %2712 = vmatpush.msra.mxu2 %v1328_v28  ;;  %2449 = vmatpush.msrb.mxu1 %v1123_v33  ;;  %v1242_v28 = vld [vmem:[%s6093_s4 + $0x1370] sm:$0xff]  ;;  %v1240_v33 = vld [vmem:[%s6093_s4 + $0x1360] sm:$0xff] }
 0x3cd   :  { %2507 = vmatpush.msra.mxu0 %v1173_v45  ;;  %2493 = vmatpush.msrb.mxu3 %v1151_v15  ;;  %v1238_v45 = vld [vmem:[%s6093_s4 + $0x1350] sm:$0xff]  ;;  %v1215_v15 = vld [vmem:[%s6093_s4 + $0x1298] sm:$0xff] }
 0x3ce   :  { %2713 = vmatpush.msra.mxu2 %v1327_v31  ;;  %2450 = vmatpush.msrb.mxu1 %v1122_v20  ;;  %v1220_v31 = vld [vmem:[%s6093_s4 + $0x12c0] sm:$0xff]  ;;  %v1187_v20 = vld [vmem:[%s6093_s4 + $0x11b8] sm:$0xff] }
 0x3cf   :  { %2508 = vmatpush.msra.mxu0 %v1172_v47  ;;  %2494 = vmatpush.msrb.mxu3 %v1150_v16  ;;  %v1185_v47 = vld [vmem:[%s6093_s4 + $0x11a8] sm:$0xff]  ;;  %v1234_v16 = vld [vmem:[%s6093_s4 + $0x1330] sm:$0xff] }
 0x3d0   :  { %2714 = vmatpush.msra.mxu2 %v1326_v44  ;;  %2451 = vmatpush.msrb.mxu1 %v1121_v38  ;;  %v1239_v44 = vld [vmem:[%s6093_s4 + $0x1358] sm:$0xff]  ;;  %v1217_v38 = vld [vmem:[%s6093_s4 + $0x12a8] sm:$0xff] }
 0x3d1   :  { %2509 = vmatpush.msra.mxu0 %v1171_v24  ;;  %2495 = vmatpush.msrb.mxu3 %v1149_v59  ;;  %v1235_v24 = vld [vmem:[%s6093_s4 + $0x1338] sm:$0xff]  ;;  %v1181_v59 = vld [vmem:[%s6093_s4 + $0x1188] sm:$0xff] }
 0x3d2   :  { %2715 = vmatpush.msra.mxu2 %v1325_v46  ;;  %2452 = vmatpush.msrb.mxu1 %v1120_v51  ;;  %v1186_v46 = vld [vmem:[%s6093_s4 + $0x11b0] sm:$0xff]  ;;  %v1236_v51 = vld [vmem:[%s6093_s4 + $0x1340] sm:$0xff] }
 0x3d3   :  { %2510 = vmatpush.msra.mxu0 %v1170_v57  ;;  %2496 = vmatpush.msrb.mxu3 %v1148_v2  ;;  %v1182_v57 = vld [vmem:[%s6093_s4 + $0x1190] sm:$0xff]  ;;  %v1180_v2 = vld [vmem:[%s6093_s4 + $0x1180] sm:$0xff] }
 0x3d4   :  { %2716 = vmatpush.msra.mxu2 %v1324_v23  ;;  %2453 = vmatpush.msrb.mxu1 %v1119_v49  ;;  %v1216_v23 = vld [vmem:[%s6093_s4 + $0x12a0] sm:$0xff]  ;;  %v1183_v49 = vld [vmem:[%s6093_s4 + $0x1198] sm:$0xff] }
 0x3d5   :  { %2511 = vmatpush.msra.mxu0 %v1169_v60  ;;  %2717 = vmatmul.f32.vlgmr.msra.gmra.mxu2 %v1760_v53  ;;  %v1212_v60 = vld [vmem:[%s6093_s4 + $0x1280] sm:$0xff]  ;;  %v1259_v53 = vld [vmem:[%s6093_s4 + $0x13f8] sm:$0xff] }
 0x3d6   :  { %2789 = vmatpush.msrb.mxu2 %v1395_v40  ;;  %2454 = vmatpush.msrb.mxu1 %v1118_v34  ;;  %v1184_v40 = vld [vmem:[%s6093_s4 + $0x11a0] sm:$0xff]  ;;  %v1213_v34 = vld [vmem:[%s6093_s4 + $0x1288] sm:$0xff] }
 0x3d7   :  { %2512 = vmatpush.msra.mxu0 %v1168_v13  ;;  %2497 = vmatmul.f32.vlgmr.msrb.gmra.mxu3 %v3658_v62  ;;  %v1194_v62 = vld [vmem:[%s6093_s4 + $0x11f0] sm:$0xff]  ;;  %v1231_v13 = vld [vmem:[%s6093_s4 + $0x1318] sm:$0xff] }
 0x3d8   :  { %2790 = vmatpush.msrb.mxu2 %v1394_v55  ;;  %2455 = vmatpush.msrb.mxu1 %v1117_v61  ;;  %v1214_v55 = vld [vmem:[%s6093_s4 + $0x1290] sm:$0xff]  ;;  %v1232_v61 = vld [vmem:[%s6093_s4 + $0x1320] sm:$0xff] }
 0x3d9   :  { %2561 = vmatpush.msra.mxu3 %v1227_v54  ;;  %2513 = vmatpush.msra.mxu0 %v1167_v50  ;;  %v1230_v54 = vld [vmem:[%s6093_s4 + $0x1310] sm:$0xff]  ;;  %v1229_v50 = vld [vmem:[%s6093_s4 + $0x1308] sm:$0xff] }
 0x3da   :  { %2791 = vmatpush.msrb.mxu2 %v1393_v58  ;;  %2456 = vmatpush.msrb.mxu1 %v1116_v4  ;;  %v1233_v58 = vld [vmem:[%s6093_s4 + $0x1328] sm:$0xff] }
 0x3db   :  { %2457 = vmatmul.f32.vlgmr.msrb.gmra.mxu1 %v4707_v32  ;;  %2562 = vmatpush.msra.mxu3 %v1226_v9  ;;  %v1193_v32 = vld [vmem:[%s6093_s4 + $0x11e8] sm:$0xff]  ;;  %v1228_v9 = vld [vmem:[%s6093_s4 + $0x1300] sm:$0xff] }
 0x3dc   :  { %2792 = vmatpush.msrb.mxu2 %v1392_v26  ;;  %2521 = vmatpush.msra.mxu1 %v1195_v7  ;;  %v1291_v26 = vld [vmem:[%s6093_s4 + $0x14f8] sm:$0xff]  ;;  %v1289_v4 = vld [vmem:[%s6093_s4 + $0x14e8] sm:$0xff] }
 0x3dd   :  { %2514 = vmatpush.msra.mxu0 %v1166_v11  ;;  %2563 = vmatpush.msra.mxu3 %v1225_v12  ;;  %v1257_v7 = vld [vmem:[%s6093_s4 + $0x13e8] sm:$0xff]  ;;  %v1287_v11 = vld [vmem:[%s6093_s4 + $0x14d8] sm:$0xff] }
 0x3de   :  { %2793 = vmatpush.msrb.mxu2 %v1391_v63  ;;  %2522 = vmatpush.msra.mxu1 %v1194_v62  ;;  %v1290_v63 = vld [vmem:[%s6093_s4 + $0x14f0] sm:$0xff]  ;;  %v1307_v62 = vld [vmem:[%s6093_s4 + $0x1578] sm:$0xff] }
 0x3df   :  { %2515 = vmatpush.msra.mxu0 %v1165_v18  ;;  %2564 = vmatpush.msra.mxu3 %v1224_v19  ;;  %v1255_v12 = vld [vmem:[%s6093_s4 + $0x13d8] sm:$0xff]  ;;  %v1306_v18 = vld [vmem:[%s6093_s4 + $0x1570] sm:$0xff]  ;;  %v1305_v19 = vld [vmem:[%s6093_s4 + $0x1568] sm:$0xff] }
 0x3e0   :  { %2794 = vmatpush.msrb.mxu2 %v1390_v10  ;;  %2523 = vmatpush.msra.mxu1 %v1193_v32  ;;  %v1256_v10 = vld [vmem:[%s6093_s4 + $0x13e0] sm:$0xff]  ;;  %v1254_v32 = vld [vmem:[%s6093_s4 + $0x13d0] sm:$0xff] }
 0x3e1   :  { %2516 = vmatpush.msra.mxu0 %v1164_v37  ;;  %2565 = vmatpush.msra.mxu3 %v1223_v8  ;;  %v1284_v37 = vld [vmem:[%s6093_s4 + $0x14c0] sm:$0xff] }
 0x3e2   :  { %2795 = vmatpush.msrb.mxu2 %v1389_v39  ;;  %2517 = vmatmul.f32.vlgmr.msra.gmra.mxu0 %v3663_v0  ;;  %v1221_v0 = vld [vmem:[%s6093_s4 + $0x12c8] sm:$0xff]  ;;  %v1286_v39 = vld [vmem:[%s6093_s4 + $0x14d0] sm:$0xff]  ;;  %v1252_v8 = vld [vmem:[%s6093_s4 + $0x13c0] sm:$0xff] }
 0x3e3   :  { %2524 = vmatpush.msra.mxu1 %v1192_v29  ;;  %2581 = vmatpush.msrb.mxu0 %v1243_v6  ;;  %v1304_v29 = vld [vmem:[%s6093_s4 + $0x1560] sm:$0xff]  ;;  %v1303_v6 = vld [vmem:[%s6093_s4 + $0x1558] sm:$0xff] }
 0x3e4   :  { %2796 = vmatpush.msrb.mxu2 %v1388_v25  ;;  %2566 = vmatpush.msra.mxu3 %v1222_v27  ;;  %v1253_v25 = vld [vmem:[%s6093_s4 + $0x13c8] sm:$0xff]  ;;  %v1282_v27 = vld [vmem:[%s6093_s4 + $0x14b0] sm:$0xff] }
 0x3e5   :  { %2847 = vmatmul.msk.f32.vlgmr.msrb.gmra.mxu2 %vm1818_vm7, %v1765_v1  ;;  %2525 = vmatpush.msra.mxu1 %v1191_v5  ;;  %v1283_v1 = vld [vmem:[%s6093_s4 + $0x14b8] sm:$0xff] }
 0x3e6   :  { %2582 = vmatpush.msrb.mxu0 %v1242_v28  ;;  %2567 = vmatpush.msra.mxu3 %v1221_v0  ;;  %v1251_v5 = vld [vmem:[%s6093_s4 + $0x13b8] sm:$0xff]  ;;  %v1302_v28 = vld [vmem:[%s6093_s4 + $0x1550] sm:$0xff]  ;;  %v1281_v0 = vld [vmem:[%s6093_s4 + $0x14a8] sm:$0xff] }
 0x3e7   :  { %2526 = vmatpush.msra.mxu1 %v1190_v14  ;;  %v1250_v14 = vld [vmem:[%s6093_s4 + $0x13b0] sm:$0xff] }
 0x3e8   :  { %2583 = vmatpush.msrb.mxu0 %v1241_v42  ;;  %2568 = vmatpush.msra.mxu3 %v1220_v31  ;;  %v1301_v42 = vld [vmem:[%s6093_s4 + $0x1548] sm:$0xff]  ;;  %v1280_v31 = vld [vmem:[%s6093_s4 + $0x14a0] sm:$0xff] }
 0x3e9   :  { %2527 = vmatpush.msra.mxu1 %v1189_v30  ;;  %v1249_v30 = vld [vmem:[%s6093_s4 + $0x13a8] sm:$0xff] }
 0x3ea   :  { %2584 = vmatpush.msrb.mxu0 %v1240_v33  ;;  %2569 = vmatpush.msra.mxu3 %v1219_v36  ;;  %v1300_v33 = vld [vmem:[%s6093_s4 + $0x1540] sm:$0xff]  ;;  %v1279_v36 = vld [vmem:[%s6093_s4 + $0x1498] sm:$0xff] }
 0x3eb   :  { %2528 = vmatpush.msra.mxu1 %v1188_v35  ;;  %v1248_v35 = vld [vmem:[%s6093_s4 + $0x13a0] sm:$0xff] }
 0x3ec   :  { %2585 = vmatpush.msrb.mxu0 %v1239_v44  ;;  %2570 = vmatpush.msra.mxu3 %v1218_v56  ;;  %v1299_v44 = vld [vmem:[%s6093_s4 + $0x1538] sm:$0xff]  ;;  %v1278_v56 = vld [vmem:[%s6093_s4 + $0x1490] sm:$0xff] }
 0x3ed   :  { %2529 = vmatpush.msra.mxu1 %v1187_v20  ;;  %v1247_v20 = vld [vmem:[%s6093_s4 + $0x1398] sm:$0xff] }
 0x3ee   :  { %2586 = vmatpush.msrb.mxu0 %v1238_v45  ;;  %2571 = vmatpush.msra.mxu3 %v1217_v38  ;;  %v1298_v45 = vld [vmem:[%s6093_s4 + $0x1530] sm:$0xff]  ;;  %v1277_v38 = vld [vmem:[%s6093_s4 + $0x1488] sm:$0xff] }
 0x3ef   :  { %2530 = vmatpush.msra.mxu1 %v1186_v46  ;;  %v1246_v46 = vld [vmem:[%s6093_s4 + $0x1390] sm:$0xff] }
 0x3f0   :  { %2587 = vmatpush.msrb.mxu0 %v1237_v52  ;;  %2572 = vmatpush.msra.mxu3 %v1216_v23  ;;  %v1297_v52 = vld [vmem:[%s6093_s4 + $0x1528] sm:$0xff]  ;;  %v1276_v23 = vld [vmem:[%s6093_s4 + $0x1480] sm:$0xff] }
 0x3f1   :  { %2531 = vmatpush.msra.mxu1 %v1185_v47  ;;  %v1245_v47 = vld [vmem:[%s6093_s4 + $0x1388] sm:$0xff] }
 0x3f2   :  { %2588 = vmatpush.msrb.mxu0 %v1236_v51  ;;  %2573 = vmatpush.msra.mxu3 %v1215_v15  ;;  %v1296_v51 = vld [vmem:[%s6093_s4 + $0x1520] sm:$0xff]  ;;  %v1355_v15 = vld [vmem:[%s6093_s4 + $0x16f8] sm:$0xff] }
 0x3f3   :  { %2532 = vmatpush.msra.mxu1 %v1184_v40  ;;  %v1244_v40 = vld [vmem:[%s6093_s4 + $0x1380] sm:$0xff] }
 0x3f4   :  { %2589 = vmatpush.msrb.mxu0 %v1235_v24  ;;  %2574 = vmatpush.msra.mxu3 %v1214_v55  ;;  %v1295_v24 = vld [vmem:[%s6093_s4 + $0x1518] sm:$0xff]  ;;  %v1354_v55 = vld [vmem:[%s6093_s4 + $0x16f0] sm:$0xff] }
 0x3f5   :  { %2533 = vmatpush.msra.mxu1 %v1183_v49  ;;  %v1323_v49 = vld [vmem:[%s6093_s4 + $0x15f8] sm:$0xff] }
 0x3f6   :  { %2590 = vmatpush.msrb.mxu0 %v1234_v16  ;;  %2575 = vmatpush.msra.mxu3 %v1213_v34  ;;  %v1294_v16 = vld [vmem:[%s6093_s4 + $0x1510] sm:$0xff]  ;;  %v1293_v34 = vld [vmem:[%s6093_s4 + $0x1508] sm:$0xff] }
 0x3f7   :  { %2534 = vmatpush.msra.mxu1 %v1182_v57  ;;  %v1353_v57 = vld [vmem:[%s6093_s4 + $0x16e8] sm:$0xff] }
 0x3f8   :  { %2591 = vmatpush.msrb.mxu0 %v1233_v58  ;;  %2576 = vmatpush.msra.mxu3 %v1212_v60  ;;  %v1321_v58 = vld [vmem:[%s6093_s4 + $0x15e8] sm:$0xff]  ;;  %v1320_v60 = vld [vmem:[%s6093_s4 + $0x15e0] sm:$0xff] }
 0x3f9   :  { %2535 = vmatpush.msra.mxu1 %v1181_v59  ;;  %2577 = vmatmul.f32.vlgmr.msra.gmra.mxu3 %v5347_v43  ;;  %v1258_v43 = vld [vmem:[%s6093_s4 + $0x13f0] sm:$0xff]  ;;  %v1292_v59 = vld [vmem:[%s6093_s4 + $0x1500] sm:$0xff] }
 0x3fa   :  { %2592 = vmatpush.msrb.mxu0 %v1232_v61  ;;  %2641 = vmatpush.msrb.mxu3 %v1291_v26  ;;  %v1351_v61 = vld [vmem:[%s6093_s4 + $0x16d8] sm:$0xff] }
 0x3fb   :  { %2536 = vmatpush.msra.mxu1 %v1180_v2  ;;  %v1371_v26 = vld [vmem:[%s6093_s4 + $0x1778] sm:$0xff] }
 0x3fc   :  { %2593 = vmatpush.msrb.mxu0 %v1231_v13  ;;  %2537 = vmatmul.f32.vlgmr.msra.gmra.mxu1 %v3665_v3  ;;  %v1288_v3 = vld [vmem:[%s6093_s4 + $0x14e0] sm:$0xff]  ;;  %v1319_v2 = vld [vmem:[%s6093_s4 + $0x15d8] sm:$0xff]  ;;  %v1350_v13 = vld [vmem:[%s6093_s4 + $0x16d0] sm:$0xff] }
 0x3fd   :  { %2601 = vmatpush.msrb.mxu1 %v1259_v53  ;;  %2642 = vmatpush.msrb.mxu3 %v1290_v63  ;;  %v1370_v53 = vld [vmem:[%s6093_s4 + $0x1770] sm:$0xff] }
 0x3fe   :  { %2594 = vmatpush.msrb.mxu0 %v1230_v54  ;;  %v1318_v63 = vld [vmem:[%s6093_s4 + $0x15d0] sm:$0xff]  ;;  %v1369_v54 = vld [vmem:[%s6093_s4 + $0x1768] sm:$0xff] }
 0x3ff   :  { %2602 = vmatpush.msrb.mxu1 %v1258_v43  ;;  %2643 = vmatpush.msrb.mxu3 %v1289_v4  ;;  %v1317_v43 = vld [vmem:[%s6093_s4 + $0x15c8] sm:$0xff]  ;;  %v1348_v4 = vld [vmem:[%s6093_s4 + $0x16c0] sm:$0xff] }
 0x400   :  { %2595 = vmatpush.msrb.mxu0 %v1229_v50  ;;  %v1368_v50 = vld [vmem:[%s6093_s4 + $0x1760] sm:$0xff] }
 0x401   :  { %2603 = vmatpush.msrb.mxu1 %v1257_v7  ;;  %2644 = vmatpush.msrb.mxu3 %v1288_v3  ;;  %v1316_v7 = vld [vmem:[%s6093_s4 + $0x15c0] sm:$0xff]  ;;  %v1347_v3 = vld [vmem:[%s6093_s4 + $0x16b8] sm:$0xff] }
 0x402   :  { %2596 = vmatpush.msrb.mxu0 %v1228_v9  ;;  %v1367_v9 = vld [vmem:[%s6093_s4 + $0x1758] sm:$0xff] }
 0x403   :  { %2597 = vmatmul.f32.vlgmr.msrb.gmra.mxu0 %v5355_v48  ;;  %2604 = vmatpush.msrb.mxu1 %v1256_v10  ;;  %v1285_v48 = vld [vmem:[%s6093_s4 + $0x14c8] sm:$0xff]  ;;  %v1315_v10 = vld [vmem:[%s6093_s4 + $0x15b8] sm:$0xff] }
 0x404   :  { %2645 = vmatpush.msrb.mxu3 %v1287_v11  ;;  %2661 = vmatpush.msra.mxu0 %v1307_v62  ;;  %v1346_v11 = vld [vmem:[%s6093_s4 + $0x16b0] sm:$0xff] }
 0x405   :  { %2605 = vmatpush.msrb.mxu1 %v1255_v12  ;;  %v1366_v62 = vld [vmem:[%s6093_s4 + $0x1750] sm:$0xff] }
 0x406   :  { %2646 = vmatpush.msrb.mxu3 %v1286_v39  ;;  %2662 = vmatpush.msra.mxu0 %v1306_v18  ;;  %v1314_v12 = vld [vmem:[%s6093_s4 + $0x15b0] sm:$0xff]  ;;  %v1345_v39 = vld [vmem:[%s6093_s4 + $0x16a8] sm:$0xff] }
 0x407   :  { %2606 = vmatpush.msrb.mxu1 %v1254_v32  ;;  %v1365_v18 = vld [vmem:[%s6093_s4 + $0x1748] sm:$0xff] }
 0x408   :  { %2647 = vmatpush.msrb.mxu3 %v1285_v48  ;;  %2663 = vmatpush.msra.mxu0 %v1305_v19  ;;  %v1313_v32 = vld [vmem:[%s6093_s4 + $0x15a8] sm:$0xff]  ;;  %v1344_v48 = vld [vmem:[%s6093_s4 + $0x16a0] sm:$0xff] }
 0x409   :  { %2607 = vmatpush.msrb.mxu1 %v1253_v25  ;;  %v1364_v19 = vld [vmem:[%s6093_s4 + $0x1740] sm:$0xff] }
 0x40a   :  { %2648 = vmatpush.msrb.mxu3 %v1284_v37  ;;  %2664 = vmatpush.msra.mxu0 %v1304_v29  ;;  %v1312_v25 = vld [vmem:[%s6093_s4 + $0x15a0] sm:$0xff]  ;;  %v1343_v37 = vld [vmem:[%s6093_s4 + $0x1698] sm:$0xff] }
 0x40b   :  { %2608 = vmatpush.msrb.mxu1 %v1252_v8  ;;  %v1363_v29 = vld [vmem:[%s6093_s4 + $0x1738] sm:$0xff] }
 0x40c   :  { %2649 = vmatpush.msrb.mxu3 %v1283_v1  ;;  %2665 = vmatpush.msra.mxu0 %v1303_v6  ;;  %v1311_v8 = vld [vmem:[%s6093_s4 + $0x1598] sm:$0xff]  ;;  %v1816_v1 = vpop.permute.xlu0 %1815  ;;  %v5992_v6 = vpop.f32.mrf.mxu1 }
 0x40d   :  { %2609 = vmatpush.msrb.mxu1 %v1251_v5  ;;  %v1342_v5 = vld [vmem:[%s6093_s4 + $0x1690] sm:$0xff] }
 0x40e   :  { %2650 = vmatpush.msrb.mxu3 %v1282_v27  ;;  %2666 = vmatpush.msra.mxu0 %v1302_v28  ;;  %v1362_v27 = vld [vmem:[%s6093_s4 + $0x1730] sm:$0xff] }
 0x40f   :  { %2610 = vmatpush.msrb.mxu1 %v1250_v14  ;;  %v1310_v28 = vld [vmem:[%s6093_s4 + $0x1590] sm:$0xff]  ;;  %v1838_v14 = vpop.f32.mrf.mxu2 }
 0x410   :  { %2651 = vmatpush.msrb.mxu3 %v1281_v0  ;;  %2667 = vmatpush.msra.mxu0 %v1301_v42  ;;  %v1341_v0 = vld [vmem:[%s6093_s4 + $0x1688] sm:$0xff] }
 0x411   :  { %2611 = vmatpush.msrb.mxu1 %v1249_v30  ;;  %v1361_v42 = vld [vmem:[%s6093_s4 + $0x1728] sm:$0xff]  ;;  %v1839_v30 = vadd.f32 %v1838_v14, %v1816_v1 }
 0x412   :  { %2652 = vmatpush.msrb.mxu3 %v1280_v31  ;;  %2668 = vmatpush.msra.mxu0 %v1300_v33  ;;  %v1309_v31 = vld [vmem:[%s6093_s4 + $0x1588] sm:$0xff]  ;;  %v1858_v33 = vpop.f32.mrf.mxu3 }
 0x413   :  { %2612 = vmatpush.msrb.mxu1 %v1248_v35  ;;  %v1340_v35 = vld [vmem:[%s6093_s4 + $0x1680] sm:$0xff] }
 0x414   :  { %2653 = vmatpush.msrb.mxu3 %v1279_v36  ;;  %2669 = vmatpush.msra.mxu0 %v1299_v44  ;;  %v1360_v36 = vld [vmem:[%s6093_s4 + $0x1720] sm:$0xff]  ;;  %v1761_v44 = vld.sshfl [vmem:[#allocation1 + $0x28] sm:$0xff pattern:$0x73625140] }
 0x415   :  { %2613 = vmatpush.msrb.mxu1 %v1247_v20  ;;  %v1308_v20 = vld [vmem:[%s6093_s4 + $0x1580] sm:$0xff] }
 0x416   :  { %2654 = vmatpush.msrb.mxu3 %v1278_v56  ;;  %2670 = vmatpush.msra.mxu0 %v1298_v45  ;;  %v1359_v56 = vld [vmem:[%s6093_s4 + $0x1718] sm:$0xff]  ;;  %v1859_v45 = vadd.f32 %v1858_v33, %v1839_v30 }
 0x417   :  { %2614 = vmatpush.msrb.mxu1 %v1246_v46  ;;  %v1387_v46 = vld [vmem:[%s6093_s4 + $0x17f8] sm:$0xff] }
 0x418   :  { %2655 = vmatpush.msrb.mxu3 %v1277_v38  ;;  %2671 = vmatpush.msra.mxu0 %v1297_v52  ;;  %v1878_v38 = vpop.f32.mrf.mxu0  ;;  %v1358_v52 = vld [vmem:[%s6093_s4 + $0x1710] sm:$0xff] }
 0x419   :  { %2615 = vmatpush.msrb.mxu1 %v1245_v47  ;;  %v1386_v47 = vld [vmem:[%s6093_s4 + $0x17f0] sm:$0xff] }
 0x41a   :  { %2656 = vmatpush.msrb.mxu3 %v1276_v23  ;;  %2672 = vmatpush.msra.mxu0 %v1296_v51  ;;  %v1898_v23 = vpop.f32.mrf.mxu1  ;;  %v1357_v51 = vld [vmem:[%s6093_s4 + $0x1708] sm:$0xff] }
 0x41b   :  { %2657 = vmatmul.f32.vlgmr.msrb.gmra.mxu3 %v3688_v17  ;;  %2616 = vmatpush.msrb.mxu1 %v1244_v40  ;;  %v1322_v17 = vld [vmem:[%s6093_s4 + $0x15f0] sm:$0xff]  ;;  %v1879_v40 = vadd.f32 %v1878_v38, %v1859_v45 }
 0x41c   :  { %2721 = vmatpush.msra.mxu3 %v1355_v15  ;;  %2673 = vmatpush.msra.mxu0 %v1295_v24  ;;  %v1385_v15 = vld [vmem:[%s6093_s4 + $0x17e8] sm:$0xff] }
 0x41d   :  { %2617 = vmatmul.f32.vlgmr.msrb.gmra.mxu1 %v5363_v41  ;;  %v1352_v41 = vld [vmem:[%s6093_s4 + $0x16e0] sm:$0xff]  ;;  %v1899_v24 = vadd.f32 %v1898_v23, %v1879_v40 }
 0x41e   :  { %2681 = vmatpush.msra.mxu1 %v1323_v49  ;;  %2722 = vmatpush.msra.mxu3 %v1354_v55  ;;  %v1762_v49 = vld.sshfl [vmem:[#allocation1 + $0x30] sm:$0xff pattern:$0x73625140]  ;;  %v1384_v55 = vld [vmem:[%s6093_s4 + $0x17e0] sm:$0xff] }
 0x41f   :  { %2674 = vmatpush.msra.mxu0 %v1294_v16  ;;  %v1383_v16 = vld [vmem:[%s6093_s4 + $0x17d8] sm:$0xff] }
 0x420   :  { %2682 = vmatpush.msra.mxu1 %v1322_v17  ;;  %2723 = vmatpush.msra.mxu3 %v1353_v57  ;;  %v1918_v17 = vpop.f32.mrf.mxu2 }
 0x421   :  { %2675 = vmatpush.msra.mxu0 %v1293_v34  ;;  %v1919_v57 = vadd.f32 %v1918_v17, %v1899_v24  ;;  %v1382_v34 = vld [vmem:[%s6093_s4 + $0x17d0] sm:$0xff] }
 0x422   :  { %2683 = vmatpush.msra.mxu1 %v1321_v58  ;;  %2724 = vmatpush.msra.mxu3 %v1352_v41  ;;  %v1938_v58 = vpop.f32.mrf.mxu3  ;;  %v1381_v41 = vld [vmem:[%s6093_s4 + $0x17c8] sm:$0xff] }
 0x423   :  { %2676 = vmatpush.msra.mxu0 %v1292_v59  ;;  %v1939_v59 = vadd.f32 %v1938_v58, %v1919_v57 }
 0x424   :  { %2677 = vmatmul.f32.vlgmr.msra.gmra.mxu0 %v3697_v21  ;;  %2684 = vmatpush.msra.mxu1 %v1320_v60  ;;  %v1349_v21 = vld [vmem:[%s6093_s4 + $0x16c8] sm:$0xff]  ;;  %v1380_v60 = vld [vmem:[%s6093_s4 + $0x17c0] sm:$0xff] }
 0x425   :  { %2725 = vmatpush.msra.mxu3 %v1351_v61  ;;  %2741 = vmatpush.msrb.mxu0 %v1371_v26  ;;  %v1958_v61 = vpop.f32.mrf.mxu0  ;;  %v1379_v26 = vld [vmem:[%s6093_s4 + $0x17b8] sm:$0xff] }
 0x426   :  { %2685 = vmatpush.msra.mxu1 %v1319_v2  ;;  %v1978_v2 = vpop.f32.mrf.mxu1 }
 0x427   :  { %2726 = vmatpush.msra.mxu3 %v1350_v13  ;;  %2742 = vmatpush.msrb.mxu0 %v1370_v53  ;;  %v1959_v13 = vadd.f32 %v1958_v61, %v1939_v59  ;;  %v1378_v53 = vld [vmem:[%s6093_s4 + $0x17b0] sm:$0xff] }
 0x428   :  { %2686 = vmatpush.msra.mxu1 %v1318_v63 }
 0x429   :  { %2727 = vmatpush.msra.mxu3 %v1349_v21  ;;  %2743 = vmatpush.msrb.mxu0 %v1369_v54  ;;  %v1979_v63 = vadd.f32 %v1978_v2, %v1959_v13  ;;  %v1377_v21 = vld [vmem:[%s6093_s4 + $0x17a8] sm:$0xff]  ;;  %v1376_v54 = vld [vmem:[%s6093_s4 + $0x17a0] sm:$0xff] }
 0x42a   :  { %2687 = vmatpush.msra.mxu1 %v1317_v43  ;;  %v1998_v43 = vpop.f32.mrf.mxu2 }
 0x42b   :  { %2728 = vmatpush.msra.mxu3 %v1348_v4  ;;  %2744 = vmatpush.msrb.mxu0 %v1368_v50  ;;  %v1999_v4 = vadd.f32 %v1998_v43, %v1979_v63  ;;  %v1375_v50 = vld [vmem:[%s6093_s4 + $0x1798] sm:$0xff] }
 0x42c   :  { %2688 = vmatpush.msra.mxu1 %v1316_v7  ;;  %v2018_v7 = vpop.f32.mrf.mxu3 }
 0x42d   :  { %2729 = vmatpush.msra.mxu3 %v1347_v3  ;;  %2745 = vmatpush.msrb.mxu0 %v1367_v9  ;;  %v1374_v3 = vld [vmem:[%s6093_s4 + $0x1790] sm:$0xff]  ;;  %v2019_v9 = vadd.f32 %v2018_v7, %v1999_v4 }
 0x42e   :  { %2689 = vmatpush.msra.mxu1 %v1315_v10  ;;  %v1373_v10 = vld [vmem:[%s6093_s4 + $0x1788] sm:$0xff] }
 0x42f   :  { %2730 = vmatpush.msra.mxu3 %v1346_v11  ;;  %2746 = vmatpush.msrb.mxu0 %v1366_v62  ;;  %v2038_v11 = vpop.f32.mrf.mxu0  ;;  %v1372_v62 = vld [vmem:[%s6093_s4 + $0x1780] sm:$0xff] }
 0x430   :  { %2690 = vmatpush.msra.mxu1 %v1314_v12  ;;  %v2058_v12 = vpop.f32.mrf.mxu1 }
 0x431   :  { %2731 = vmatpush.msra.mxu3 %v1345_v39  ;;  %2747 = vmatpush.msrb.mxu0 %v1365_v18  ;;  %v1763_v39 = vld.sshfl [vmem:[#allocation1 + $0x38] sm:$0xff pattern:$0x73625140]  ;;  %v2039_v18 = vadd.f32 %v2038_v11, %v2019_v9 }
 0x432   :  { %2691 = vmatpush.msra.mxu1 %v1313_v32 }
 0x433   :  { %2732 = vmatpush.msra.mxu3 %v1344_v48  ;;  %2748 = vmatpush.msrb.mxu0 %v1364_v19  ;;  %v2059_v32 = vadd.f32 %v2058_v12, %v2039_v18  ;;  %v2078_v48 = vpop.f32.mrf.mxu2 }
 0x434   :  { %2692 = vmatpush.msra.mxu1 %v1312_v25  ;;  %v2098_v25 = vpop.f32.mrf.mxu3 }
 0x435   :  { %2733 = vmatpush.msra.mxu3 %v1343_v37  ;;  %2749 = vmatpush.msrb.mxu0 %v1363_v29  ;;  %v2079_v19 = vadd.f32 %v2078_v48, %v2059_v32 }
 0x436   :  { %2693 = vmatpush.msra.mxu1 %v1311_v8 }
 0x437   :  { %2734 = vmatpush.msra.mxu3 %v1342_v5  ;;  %2750 = vmatpush.msrb.mxu0 %v1362_v27  ;;  %v2099_v37 = vadd.f32 %v2098_v25, %v2079_v19  ;;  %v2118_v29 = vpop.f32.mrf.mxu0 }
 0x438   :  { %2694 = vmatpush.msra.mxu1 %v1310_v28  ;;  %v2138_v8 = vpop.f32.mrf.mxu1 }
 0x439   :  { %2735 = vmatpush.msra.mxu3 %v1341_v0  ;;  %2751 = vmatpush.msrb.mxu0 %v1361_v42  ;;  %v2119_v1 = vadd.f32 %v2118_v29, %v2099_v37 }
 0x43a   :  { %2695 = vmatpush.msra.mxu1 %v1309_v31 }
 0x43b   :  { %2736 = vmatpush.msra.mxu3 %v1340_v35  ;;  %2752 = vmatpush.msrb.mxu0 %v1360_v36  ;;  %v2139_v5 = vadd.f32 %v2138_v8, %v2119_v1  ;;  %v2158_v27 = vpop.f32.mrf.mxu2 }
 0x43c   :  { %2737 = vmatmul.f32.vlgmr.msra.gmra.mxu3 %v1761_v44  ;;  %2696 = vmatpush.msra.mxu1 %v1308_v20  ;;  %v2178_v14 = vpop.f32.mrf.mxu3 }
 0x43d   :  { %2753 = vmatpush.msrb.mxu0 %v1359_v56  ;;  %2697 = vmatmul.f32.vlgmr.msra.gmra.mxu1 %v3699_v22  ;;  %v1356_v22 = vld [vmem:[%s6093_s4 + $0x1700] sm:$0xff]  ;;  %v2159_v28 = vadd.f32 %v2158_v27, %v2139_v5 }
 0x43e   :  { %2761 = vmatpush.msrb.mxu1 %v1387_v46 }
 0x43f   :  { %2754 = vmatpush.msrb.mxu0 %v1358_v52  ;;  %v2179_v0 = vadd.f32 %v2178_v14, %v2159_v28  ;;  %v2198_v42 = vpop.f32.mrf.mxu0 }
 0x440   :  { %2762 = vmatpush.msrb.mxu1 %v1386_v47  ;;  %v2218_v30 = vpop.f32.mrf.mxu1 }
 0x441   :  { %2755 = vmatpush.msrb.mxu0 %v1357_v51  ;;  %v2199_v31 = vadd.f32 %v2198_v42, %v2179_v0  ;;  %v2854_v0 = vld [vmem:[%s6097_s8] ss:$0 sm:$0xff] }
 0x442   :  { %2763 = vmatpush.msrb.mxu1 %v1385_v15 }
 0x443   :  { %2756 = vmatpush.msrb.mxu0 %v1356_v22  ;;  %v2219_v33 = vadd.f32 %v2218_v30, %v2199_v31  ;;  %v2238_v35 = vpop.f32.mrf.mxu2 }
 0x444   :  { %2757 = vmatmul.f32.vlgmr.msrb.gmra.mxu0 %v1762_v49  ;;  %2764 = vmatpush.msrb.mxu1 %v1384_v55  ;;  %v2258_v44 = vpop.f32.mrf.mxu3 }
 0x445   :  { %v2239_v36 = vadd.f32 %v2238_v35, %v2219_v33 }
 0x446   :  { %2765 = vmatpush.msrb.mxu1 %v1383_v16 }
 0x447   :  { %v2259_v20 = vadd.f32 %v2258_v44, %v2239_v36  ;;  %v2278_v56 = vpop.f32.mrf.mxu0 }
 0x448   :  { %2766 = vmatpush.msrb.mxu1 %v1382_v34  ;;  %v2298_v45 = vpop.f32.mrf.mxu1 }
 0x449   :  { %v2279_v46 = vadd.f32 %v2278_v56, %v2259_v20 }
 0x44a   :  { %2767 = vmatpush.msrb.mxu1 %v1381_v41 }
 0x44b   :  { %v2299_v38 = vadd.f32 %v2298_v45, %v2279_v46  ;;  %v2318_v52 = vpop.f32.mrf.mxu2 }
 0x44c   :  { %2768 = vmatpush.msrb.mxu1 %v1380_v60  ;;  %v2338_v23 = vpop.f32.mrf.mxu3 }
 0x44d   :  { %v2319_v47 = vadd.f32 %v2318_v52, %v2299_v38 }
 0x44e   :  { %2769 = vmatpush.msrb.mxu1 %v1379_v26 }
 0x44f   :  { %v2339_v51 = vadd.f32 %v2338_v23, %v2319_v47  ;;  %v2358_v40 = vpop.f32.mrf.mxu0 }
 0x450   :  { %2770 = vmatpush.msrb.mxu1 %v1378_v53  ;;  %v2378_v15 = vpop.f32.mrf.mxu1 }
 0x451   :  { %v2359_v22 = vadd.f32 %v2358_v40, %v2339_v51 }
 0x452   :  { %2771 = vmatpush.msrb.mxu1 %v1377_v21 }
 0x453   :  { %v2379_v24 = vadd.f32 %v2378_v15, %v2359_v22  ;;  %v2398_v49 = vpop.f32.mrf.mxu2 }
 0x454   :  { %2772 = vmatpush.msrb.mxu1 %v1376_v54  ;;  %v2418_v16 = vpop.f32.mrf.mxu3 }
 0x455   :  { %v2399_v55 = vadd.f32 %v2398_v49, %v2379_v24 }
 0x456   :  { %2773 = vmatpush.msrb.mxu1 %v1375_v50 }
 0x457   :  { %v2419_v17 = vadd.f32 %v2418_v16, %v2399_v55  ;;  %v2438_v57 = vpop.f32.mrf.mxu0 }
 0x458   :  { %2774 = vmatpush.msrb.mxu1 %v1374_v3  ;;  %v2458_v34 = vpop.f32.mrf.mxu1 }
 0x459   :  { %v2439_v58 = vadd.f32 %v2438_v57, %v2419_v17 }
 0x45a   :  { %2775 = vmatpush.msrb.mxu1 %v1373_v10 }
 0x45b   :  { %v2459_v41 = vadd.f32 %v2458_v34, %v2439_v58  ;;  %v2478_v59 = vpop.f32.mrf.mxu2 }
 0x45c   :  { %2776 = vmatpush.msrb.mxu1 %v1372_v62  ;;  %v2498_v61 = vpop.f32.mrf.mxu3 }
 0x45d   :  { %2777 = vmatmul.f32.vlgmr.msrb.gmra.mxu1 %v1763_v39  ;;  %v2479_v60 = vadd.f32 %v2478_v59, %v2459_v41 }
 0x45f   :  { %v2499_v26 = vadd.f32 %v2498_v61, %v2479_v60  ;;  %v2518_v2 = vpop.f32.mrf.mxu0 }
 0x461   :  { %v2519_v53 = vadd.f32 %v2518_v2, %v2499_v26 }
 0x463   :  { %v2558_v21 = vpop.f32.mrf.mxu2 }
 0x46b   :  { %v2638_v10 = vpop.f32.mrf.mxu2 }
 0x473   :  { %v2718_v19 = vpop.f32.mrf.mxu2 }
 0x479   :  { %v2538_v13 = vpop.f32.mrf.mxu1 }
 0x47a   :  { %v2539_v63 = vadd.f32 %v2538_v13, %v2519_v53 }
 0x47b   :  { %v2798_v28 = vpop.f32.mrf.mxu2 }
 0x47c   :  { %v2559_v54 = vadd.f32 %v2558_v21, %v2539_v63  ;;  %v2578_v43 = vpop.f32.mrf.mxu3 }
 0x47e   :  { %v2579_v4 = vadd.f32 %v2578_v43, %v2559_v54 }
 0x480   :  { %v2598_v50 = vpop.f32.mrf.mxu0 }
 0x481   :  { %v2599_v3 = vadd.f32 %v2598_v50, %v2579_v4 }
 0x49a   :  { %v2618_v7 = vpop.f32.mrf.mxu1 }
 0x49b   :  { %v2619_v9 = vadd.f32 %v2618_v7, %v2599_v3 }
 0x49d   :  { %v2639_v11 = vadd.f32 %v2638_v10, %v2619_v9 }
 0x49e   :  { %v2658_v62 = vpop.f32.mrf.mxu3 }
 0x49f   :  { %v2659_v12 = vadd.f32 %v2658_v62, %v2639_v11 }
 0x4a1   :  { %v2678_v39 = vpop.f32.mrf.mxu0 }
 0x4a2   :  { %v2679_v32 = vadd.f32 %v2678_v39, %v2659_v12 }
 0x4ba   :  { %v2698_v18 = vpop.f32.mrf.mxu1 }
 0x4bb   :  { %v2699_v48 = vadd.f32 %v2698_v18, %v2679_v32 }
 0x4bd   :  { %v2719_v25 = vadd.f32 %v2718_v19, %v2699_v48 }
 0x4bf   :  { %v2738_v37 = vpop.f32.mrf.mxu3 }
 0x4c0   :  { %v2739_v29 = vadd.f32 %v2738_v37, %v2719_v25 }
 0x4c1   :  { %v2758_v8 = vpop.f32.mrf.mxu0 }
 0x4c2   :  { %v2759_v1 = vadd.f32 %v2758_v8, %v2739_v29 }
 0x4da   :  { %v2778_v5 = vpop.f32.mrf.mxu1 }
 0x4db   :  { %v2779_v27 = vadd.f32 %v2778_v5, %v2759_v1 }
 0x4dd   :  { %v2799_v14 = vadd.f32 %v2798_v28, %v2779_v27 }
 0x4df   :  { %v2801_v42 = vadd.f32 %v2799_v14, %v5992_v6 }
 0x4e1   :  { %v2806_v30 = vadd.f32 %v2854_v0, %v2801_v42 }
 0x4e3   :  { %2808 = vst.msk [vmem:[#allocation3] sm:$0x3] %vm2807_vm8, %v2806_v30 }
 0x4e4   :  { %2819 = dma.vmem_to_hbm [thread:$0]  %s2815_s14, 32, %s2817_s16, [#allocation4]  }
 0x4e5   :  { %2879 = dma.done.wait [#allocation4], 32  }
 0x4e6   :  { %2880 = vsyncadd [#allocation4], 4294967264 }
 0x4e7   :  { %2824 = vsyncpa [#allocation4], 1 }

</bundles_post_ra>
